<compile_context>
chip_gen: v6e
topology: v6e:2x2x1
jax: 0.10.0
libtpu: 0.0.40
codegen_flags: <defaults>
</compile_context>

<pallas_src>
import functools

import jax
import jax.numpy as jnp
from jax.experimental import pallas as pl
from jax.experimental.pallas import tpu as pltpu

POINT_DIM = 3
LATENT_CODE_SIZE = 32
BN_EPS = 1e-5
# Row tile of points.  1024 is safe on all generations (incl. v7x 64 MiB VMEM);
# sweep to 2048 on v5e/v6e for a little extra overhead amortization.
DEFAULT_POINT_TILE = 1024
VMEM_LIMIT_BYTES = 48 * 1024 * 1024


def _round_up(x, m):
    return (x + m - 1) // m * m


# -------- fused [point-MLP -> max-over-points -> small FC tail] kernel --------

def _point_encoder_kernel(*refs, tail_relus, relu_last, point_tile, n_valid,
                          need_mask):
    n_tail = len(tail_relus)
    x_ref, w1_ref, b1_ref, w2_ref, b2_ref, w3_ref, b3_ref = refs[:7]
    tail_refs = refs[7:7 + 2 * n_tail]
    out_ref = refs[7 + 2 * n_tail]
    gmax_ref = refs[7 + 2 * n_tail + 1]

    t = pl.program_id(1)
    last = pl.num_programs(1) - 1

    x = x_ref[0]          # (tile, 3)  f32
    w1 = w1_ref[0]        # (3, 64)    f32

    # 3 -> 64 as three broadcast FMAs on the VPU (K=3 on the MXU is ~all padding).
    h = (x[:, 0:1] * w1[0:1, :]
         + x[:, 1:2] * w1[1:2, :]
         + x[:, 2:3] * w1[2:3, :])
    h = jnp.maximum(h + b1_ref[...], 0.0)                         # (tile, 64)

    # 64 -> 128 on the MXU (bf16 in, f32 accumulate) + folded-BN bias + ReLU.
    h = jnp.dot(h.astype(w2_ref.dtype), w2_ref[...],
                preferred_element_type=jnp.float32) + b2_ref[...]
    h = jnp.maximum(h, 0.0)                                        # (tile, 128)

    # 128 -> 1024 on the MXU (+ optional ReLU; layer2's last conv has none).
    h = jnp.dot(h.astype(w3_ref.dtype), w3_ref[...],
                preferred_element_type=jnp.float32) + b3_ref[...]
    if relu_last:
        h = jnp.maximum(h, 0.0)                                    # (tile, 1024)

    def _accumulate(hval):
        tile_max = jnp.max(hval, axis=0, keepdims=True)            # (1, 1024)

        @pl.when(t == 0)
        def _():
            gmax_ref[...] = tile_max

        @pl.when(t > 0)
        def _():
            gmax_ref[...] = jnp.maximum(gmax_ref[...], tile_max)

    if need_mask:
        # Padding only exists in the final point tile: gate the -inf select
        # there; all other tiles take the plain max path (no extra VPU work).
        is_last = t == last

        @pl.when(is_last)
        def _():
            row = t * point_tile + jax.lax.broadcasted_iota(
                jnp.int32, (point_tile, 1), 0)                     # (tile, 1)
            _accumulate(jnp.where(row < n_valid, h, -jnp.inf))

        @pl.when(jnp.logical_not(is_last))
        def _():
            _accumulate(h)
    else:
        _accumulate(h)

    # Epilogue on the last point tile: run the small FC tail directly on the
    # resident (1, 1024) max accumulator and emit only the tiny tail output.
    @pl.when(t == last)
    def _():
        hh = gmax_ref[...]                                          # (1, 1024) f32
        for i, relu in enumerate(tail_relus):
            w_r = tail_refs[2 * i]
            b_r = tail_refs[2 * i + 1]
            hh = jnp.dot(hh.astype(w_r.dtype), w_r[...],
                         preferred_element_type=jnp.float32) + b_r[...]
            if relu:
                hh = jnp.maximum(hh, 0.0)
        out_ref[...] = hh.reshape(out_ref.shape).astype(out_ref.dtype)


def point_encoder(x, w1, b1, w2, b2, w3, b3, *, tail, tail_relus, relu_last,
                  point_tile=DEFAULT_POINT_TILE):
    """Fused [conv1(+folded transform) -> conv2 -> conv3 -> max -> FC tail].

    x:    (B, N, 3) f32 points.
    w1:   (3, 64) shared weights, or (B, 3, 64) per-batch (input transform folded).
    tail: list of (w, b) for the small FC chain applied to the (B, 1024) max.
    Returns (B, tail_out) f32.
    """
    B, N, D = x.shape
    assert D == POINT_DIM
    assert N >= 1, "need at least one point (max over 0 points is undefined)"
    if w1.ndim == 2:
        w1 = w1[None]
    shared_w1 = w1.shape[0] == 1
    c1, c2, c3 = w1.shape[-1], w2.shape[-1], w3.shape[-1]
    out_dim = tail[-1][0].shape[1]

    tile = point_tile if N >= point_tile else _round_up(N, 8)
    n_pad = _round_up(N, tile)
    if n_pad != N:
        x = jnp.pad(x, ((0, 0), (0, n_pad - N), (0, 0)))
    n_tiles = n_pad // tile

    kernel = functools.partial(
        _point_encoder_kernel, tail_relus=tuple(tail_relus),
        relu_last=relu_last, point_tile=tile, n_valid=N,
        need_mask=(n_pad != N))

    w1_map = (lambda bi, ti: (0, 0, 0)) if shared_w1 else (lambda bi, ti: (bi, 0, 0))

    in_specs = [
        pl.BlockSpec((1, tile, D), lambda bi, ti: (bi, ti, 0)),
        pl.BlockSpec((1, D, c1), w1_map),
        pl.BlockSpec((1, c1), lambda bi, ti: (0, 0)),
        pl.BlockSpec((c1, c2), lambda bi, ti: (0, 0)),
        pl.BlockSpec((1, c2), lambda bi, ti: (0, 0)),
        pl.BlockSpec((c2, c3), lambda bi, ti: (0, 0)),
        pl.BlockSpec((1, c3), lambda bi, ti: (0, 0)),
    ]
    args = [
        x.astype(jnp.float32),
        w1.astype(jnp.float32),
        b1.reshape(1, c1).astype(jnp.float32),
        w2.astype(jnp.bfloat16),
        b2.reshape(1, c2).astype(jnp.float32),
        w3.astype(jnp.bfloat16),
        b3.reshape(1, c3).astype(jnp.float32),
    ]
    for tw, tb in tail:
        cin, cout = tw.shape
        in_specs.append(pl.BlockSpec((cin, cout), lambda bi, ti: (0, 0)))
        in_specs.append(pl.BlockSpec((1, cout), lambda bi, ti: (0, 0)))
        args.append(tw.astype(jnp.bfloat16))
        args.append(tb.reshape(1, cout).astype(jnp.float32))

    out = pl.pallas_call(
        kernel,
        out_shape=jax.ShapeDtypeStruct((B, 1, out_dim), jnp.float32),
        grid=(B, n_tiles),
        in_specs=in_specs,
        out_specs=pl.BlockSpec((1, 1, out_dim), lambda bi, ti: (bi, 0, 0)),
        scratch_shapes=[pltpu.VMEM((1, c3), jnp.float32)],
        compiler_params=pltpu.CompilerParams(
            dimension_semantics=("parallel", "arbitrary"),
            vmem_limit_bytes=VMEM_LIMIT_BYTES,
        ),
    )(*args)
    return out.reshape(B, out_dim)


# --------------------------- parameters (synthetic) ---------------------------

def _fold_bn(w, b, gamma, beta, mean, var):
    scale = gamma / jnp.sqrt(var + BN_EPS)
    return w * scale[None, :], (b - mean) * scale + beta


def _init_linear_bn(key, cin, cout, with_bn=True):
    k = jax.random.split(key, 6)
    w = jax.random.normal(k[0], (cin, cout), jnp.float32) * (1.0 / jnp.sqrt(cin))
    b = jax.random.normal(k[1], (cout,), jnp.float32) * 0.01
    if not with_bn:
        return w, b
    gamma = 1.0 + 0.1 * jax.random.normal(k[2], (cout,), jnp.float32)
    beta = 0.1 * jax.random.normal(k[3], (cout,), jnp.float32)
    mean = 0.1 * jax.random.normal(k[4], (cout,), jnp.float32)
    var = jax.random.uniform(k[5], (cout,), jnp.float32, 0.5, 1.5)
    return _fold_bn(w, b, gamma, beta, mean, var)


def init_params(key):
    keys = jax.random.split(key, 10)
    p = {}
    # STN3d: layers1 (conv+bn+relu x3) and layers2 (fc+bn+relu x2, fc)
    p["stn_c1"] = _init_linear_bn(keys[0], POINT_DIM, 64)
    p["stn_c2"] = _init_linear_bn(keys[1], 64, 128)
    p["stn_c3"] = _init_linear_bn(keys[2], 128, 1024)
    p["stn_f1"] = _init_linear_bn(keys[3], 1024, 512)
    p["stn_f2"] = _init_linear_bn(keys[4], 512, 256)
    p["stn_f3"] = _init_linear_bn(keys[5], 256, POINT_DIM * POINT_DIM, with_bn=False)
    # PointNetfeat: layer1, layer2, latent_layers
    p["l1"] = _init_linear_bn(keys[6], POINT_DIM, 64)
    p["l2a"] = _init_linear_bn(keys[7], 64, 128)
    p["l2b"] = _init_linear_bn(keys[8], 128, 1024)
    p["latent"] = _init_linear_bn(keys[9], 1024, LATENT_CODE_SIZE, with_bn=False)
    return p


# ------------------------------ forward pass -------------------------------

def stn3d(xt, p, *, point_tile=DEFAULT_POINT_TILE):
    """Input transform net. xt: (B, N, 3) -> (B, 3, 3). Single fused kernel."""
    B = xt.shape[0]
    w3, b3 = p["stn_f3"]
    # Identity add folded into fc3's bias.
    b3_eff = b3 + jnp.eye(POINT_DIM, dtype=jnp.float32).reshape(-1)
    t = point_encoder(
        xt, *p["stn_c1"], *p["stn_c2"], *p["stn_c3"],
        tail=[p["stn_f1"], p["stn_f2"], (w3, b3_eff)],
        tail_relus=(True, True, False),
        relu_last=True, point_tile=point_tile)                     # (B, 9)
    return t.reshape(B, POINT_DIM, POINT_DIM)


def pointnetfeat(x, p, *, point_tile=DEFAULT_POINT_TILE):
    """x: (B, 3, N) PyTorch NCW layout. Returns (latent_code, input_trans)."""
    B, D, N = x.shape
    xt = jnp.transpose(x, (0, 2, 1)).astype(jnp.float32)            # (B, N, 3)

    input_trans = stn3d(xt, p, point_tile=point_tile)               # (B, 3, 3)

    # Fold torch.bmm(x^T, trans) into conv1: (p @ T) @ W1 == p @ (T @ W1).
    w1, b1 = p["l1"]
    w1_fold = jnp.einsum("bij,jk->bik", input_trans, w1)            # (B, 3, 64), tiny

    # Fused layer1 -> layer2 -> max over points -> latent (1024 -> 32, ReLU).
    # (use_global_feat=True branch; layer2's last conv has no ReLU.)
    latent = point_encoder(
        xt, w1_fold, b1, *p["l2a"], *p["l2b"],
        tail=[p["latent"]], tail_relus=(True,),
        relu_last=False, point_tile=point_tile)                     # (B, 32)
    return latent, input_trans


# ---------------------------------- main ------------------------------------

if __name__ == "__main__":
    key = jax.random.PRNGKey(0)
    kx, kp = jax.random.split(key)

    B, N = 2, 16
    x = jax.random.normal(kx, (B, POINT_DIM, N), jnp.float32)
    params = init_params(kp)

    fwd = jax.jit(functools.partial(pointnetfeat, point_tile=DEFAULT_POINT_TILE))
    latent, input_trans = fwd(x, params)
    jax.block_until_ready((latent, input_trans))

    assert latent.shape == (B, LATENT_CODE_SIZE) and latent.dtype == jnp.float32
    assert input_trans.shape == (B, POINT_DIM, POINT_DIM)
    assert bool(jnp.all(jnp.isfinite(latent))) and bool(jnp.all(jnp.isfinite(input_trans)))
    print("KERNEL_OK")
</pallas_src>

<mosaic_0001>
module attributes {stable_mosaic.version = 11 : i64} {
  func.func @_point_encoder_kernel(%arg0: i32, %arg1: i32, %arg2: memref<1x16x3xf32, #tpu.memory_space<vmem>>, %arg3: memref<1x3x64xf32, #tpu.memory_space<vmem>>, %arg4: memref<1x64xf32, #tpu.memory_space<vmem>>, %arg5: memref<64x128xbf16, #tpu.memory_space<vmem>>, %arg6: memref<1x128xf32, #tpu.memory_space<vmem>>, %arg7: memref<128x1024xbf16, #tpu.memory_space<vmem>>, %arg8: memref<1x1024xf32, #tpu.memory_space<vmem>>, %arg9: memref<1024x512xbf16, #tpu.memory_space<vmem>>, %arg10: memref<1x512xf32, #tpu.memory_space<vmem>>, %arg11: memref<512x256xbf16, #tpu.memory_space<vmem>>, %arg12: memref<1x256xf32, #tpu.memory_space<vmem>>, %arg13: memref<256x9xbf16, #tpu.memory_space<vmem>>, %arg14: memref<1x9xf32, #tpu.memory_space<vmem>>, %arg15: memref<1x1x9xf32, #tpu.memory_space<vmem>>, %arg16: memref<1x1024xf32, #tpu.memory_space<vmem>>) attributes {dimension_semantics = [#tpu.dimension_semantics<parallel>, #tpu.dimension_semantics<arbitrary>], iteration_bounds = array<i64: 2, 1>, scalar_prefetch = 0 : i64, scratch_operands = 1 : i64, tpu.core_type = #tpu.core_type<tc>, window_params = [{transform_indices = @transform_0, window_bounds = array<i64: 1, 16, 3>}, {pipeline_mode = #tpu.pipeline_mode<synchronous>, transform_indices = @transform_1, window_bounds = array<i64: 1, 3, 64>}, {pipeline_mode = #tpu.pipeline_mode<synchronous>, transform_indices = @transform_2, window_bounds = array<i64: 1, 64>}, {pipeline_mode = #tpu.pipeline_mode<synchronous>, transform_indices = @transform_3, window_bounds = array<i64: 64, 128>}, {pipeline_mode = #tpu.pipeline_mode<synchronous>, transform_indices = @transform_4, window_bounds = array<i64: 1, 128>}, {pipeline_mode = #tpu.pipeline_mode<synchronous>, transform_indices = @transform_5, window_bounds = array<i64: 128, 1024>}, {pipeline_mode = #tpu.pipeline_mode<synchronous>, transform_indices = @transform_6, window_bounds = array<i64: 1, 1024>}, {pipeline_mode = #tpu.pipeline_mode<synchronous>, transform_indices = @transform_7, window_bounds = array<i64: 1024, 512>}, {pipeline_mode = #tpu.pipeline_mode<synchronous>, transform_indices = @transform_8, window_bounds = array<i64: 1, 512>}, {pipeline_mode = #tpu.pipeline_mode<synchronous>, transform_indices = @transform_9, window_bounds = array<i64: 512, 256>}, {pipeline_mode = #tpu.pipeline_mode<synchronous>, transform_indices = @transform_10, window_bounds = array<i64: 1, 256>}, {pipeline_mode = #tpu.pipeline_mode<synchronous>, transform_indices = @transform_11, window_bounds = array<i64: 256, 9>}, {pipeline_mode = #tpu.pipeline_mode<synchronous>, transform_indices = @transform_12, window_bounds = array<i64: 1, 9>}, {transform_indices = @transform_13, window_bounds = array<i64: 1, 1, 9>}]} {
    %c0 = arith.constant 0 : index
    %c0_0 = arith.constant 0 : index
    %c0_1 = arith.constant 0 : index
    %0 = vector.load %arg2[%c0, %c0_0, %c0_1] : memref<1x16x3xf32, #tpu.memory_space<vmem>>, vector<1x16x3xf32>
    %1 = vector.shape_cast %0 : vector<1x16x3xf32> to vector<16x3xf32>
    %c0_2 = arith.constant 0 : index
    %c0_3 = arith.constant 0 : index
    %c0_4 = arith.constant 0 : index
    %2 = vector.load %arg3[%c0_2, %c0_3, %c0_4] : memref<1x3x64xf32, #tpu.memory_space<vmem>>, vector<1x3x64xf32>
    %3 = vector.shape_cast %2 : vector<1x3x64xf32> to vector<3x64xf32>
    %4 = vector.extract_strided_slice %1 {offsets = [0, 0], sizes = [16, 1], strides = [1, 1]} : vector<16x3xf32> to vector<16x1xf32>
    %5 = vector.extract_strided_slice %3 {offsets = [0, 0], sizes = [1, 64], strides = [1, 1]} : vector<3x64xf32> to vector<1x64xf32>
    %6 = vector.broadcast %4 : vector<16x1xf32> to vector<16x64xf32>
    %7 = vector.broadcast %5 : vector<1x64xf32> to vector<16x64xf32>
    %8 = arith.mulf %6, %7 : vector<16x64xf32>
    %9 = vector.extract_strided_slice %1 {offsets = [0, 1], sizes = [16, 1], strides = [1, 1]} : vector<16x3xf32> to vector<16x1xf32>
    %10 = vector.extract_strided_slice %3 {offsets = [1, 0], sizes = [1, 64], strides = [1, 1]} : vector<3x64xf32> to vector<1x64xf32>
    %11 = vector.broadcast %9 : vector<16x1xf32> to vector<16x64xf32>
    %12 = vector.broadcast %10 : vector<1x64xf32> to vector<16x64xf32>
    %13 = arith.mulf %11, %12 : vector<16x64xf32>
    %14 = arith.addf %8, %13 : vector<16x64xf32>
    %15 = vector.extract_strided_slice %1 {offsets = [0, 2], sizes = [16, 1], strides = [1, 1]} : vector<16x3xf32> to vector<16x1xf32>
    %16 = vector.extract_strided_slice %3 {offsets = [2, 0], sizes = [1, 64], strides = [1, 1]} : vector<3x64xf32> to vector<1x64xf32>
    %17 = vector.broadcast %15 : vector<16x1xf32> to vector<16x64xf32>
    %18 = vector.broadcast %16 : vector<1x64xf32> to vector<16x64xf32>
    %19 = arith.mulf %17, %18 : vector<16x64xf32>
    %20 = arith.addf %14, %19 : vector<16x64xf32>
    %c0_5 = arith.constant 0 : index
    %c0_6 = arith.constant 0 : index
    %21 = vector.load %arg4[%c0_5, %c0_6] : memref<1x64xf32, #tpu.memory_space<vmem>>, vector<1x64xf32>
    %22 = vector.broadcast %21 : vector<1x64xf32> to vector<16x64xf32>
    %23 = arith.addf %20, %22 : vector<16x64xf32>
    %cst = arith.constant 0.000000e+00 : f32
    %24 = vector.broadcast %cst : f32 to vector<16x64xf32>
    %25 = arith.maximumf %23, %24 : vector<16x64xf32>
    %26 = arith.truncf %25 : vector<16x64xf32> to vector<16x64xbf16>
    %c0_7 = arith.constant 0 : index
    %c0_8 = arith.constant 0 : index
    %27 = vector.load %arg5[%c0_7, %c0_8] : memref<64x128xbf16, #tpu.memory_space<vmem>>, vector<64x128xbf16>
    %cst_9 = arith.constant dense<0.000000e+00> : vector<16x128xf32>
    %28 = tpu.matmul %26, %27, %cst_9 {dimension_numbers = #tpu.dot_dimension_numbers<[1], [0], [0], [1], [0, 0, 1, 1], [], []>} : vector<16x64xbf16>, vector<64x128xbf16>, vector<16x128xf32> -> vector<16x128xf32>
    %c0_10 = arith.constant 0 : index
    %c0_11 = arith.constant 0 : index
    %29 = vector.load %arg6[%c0_10, %c0_11] : memref<1x128xf32, #tpu.memory_space<vmem>>, vector<1x128xf32>
    %30 = vector.broadcast %29 : vector<1x128xf32> to vector<16x128xf32>
    %31 = arith.addf %28, %30 : vector<16x128xf32>
    %cst_12 = arith.constant 0.000000e+00 : f32
    %32 = vector.broadcast %cst_12 : f32 to vector<16x128xf32>
    %33 = arith.maximumf %31, %32 : vector<16x128xf32>
    %34 = arith.truncf %33 : vector<16x128xf32> to vector<16x128xbf16>
    %c0_13 = arith.constant 0 : index
    %c0_14 = arith.constant 0 : index
    %35 = vector.load %arg7[%c0_13, %c0_14] : memref<128x1024xbf16, #tpu.memory_space<vmem>>, vector<128x1024xbf16>
    %cst_15 = arith.constant dense<0.000000e+00> : vector<16x1024xf32>
    %36 = tpu.matmul %34, %35, %cst_15 {dimension_numbers = #tpu.dot_dimension_numbers<[1], [0], [0], [1], [0, 0, 1, 1], [], []>} : vector<16x128xbf16>, vector<128x1024xbf16>, vector<16x1024xf32> -> vector<16x1024xf32>
    %c0_16 = arith.constant 0 : index
    %c0_17 = arith.constant 0 : index
    %37 = vector.load %arg8[%c0_16, %c0_17] : memref<1x1024xf32, #tpu.memory_space<vmem>>, vector<1x1024xf32>
    %38 = vector.broadcast %37 : vector<1x1024xf32> to vector<16x1024xf32>
    %39 = arith.addf %36, %38 : vector<16x1024xf32>
    %cst_18 = arith.constant 0.000000e+00 : f32
    %40 = vector.broadcast %cst_18 : f32 to vector<16x1024xf32>
    %41 = arith.maximumf %39, %40 : vector<16x1024xf32>
    %cst_19 = arith.constant dense<0xFF800000> : vector<1024xf32>
    %42 = vector.multi_reduction <maximumf>, %41, %cst_19 [0] : vector<16x1024xf32> to vector<1024xf32>
    %43 = vector.shape_cast %42 : vector<1024xf32> to vector<1x1024xf32>
    %c0_i32 = arith.constant 0 : i32
    %44 = arith.cmpi eq, %arg1, %c0_i32 : i32
    %45 = arith.extui %44 : i1 to i32
    %c0_i32_20 = arith.constant 0 : i32
    %46 = arith.cmpi ne, %45, %c0_i32_20 : i32
    scf.if %46 {
      %c0_25 = arith.constant 0 : index
      %c0_26 = arith.constant 0 : index
      %53 = vector.load %arg16[%c0_25, %c0_26] : memref<1x1024xf32, #tpu.memory_space<vmem>>, vector<1x1024xf32>
      tpu.vector_store %arg16[%c0_25, %c0_26], %43 {strides = array<i32>} : memref<1x1024xf32, #tpu.memory_space<vmem>>, vector<1x1024xf32>,
    } else {
    }
    %c0_i32_21 = arith.constant 0 : i32
    %47 = arith.cmpi sgt, %arg1, %c0_i32_21 : i32
    %48 = arith.extui %47 : i1 to i32
    %c0_i32_22 = arith.constant 0 : i32
    %49 = arith.cmpi ne, %48, %c0_i32_22 : i32
    scf.if %49 {
      %c0_25 = arith.constant 0 : index
      %c0_26 = arith.constant 0 : index
      %53 = vector.load %arg16[%c0_25, %c0_26] : memref<1x1024xf32, #tpu.memory_space<vmem>>, vector<1x1024xf32>
      %54 = arith.maximumf %53, %43 : vector<1x1024xf32>
      %c0_27 = arith.constant 0 : index
      %c0_28 = arith.constant 0 : index
      %55 = vector.load %arg16[%c0_27, %c0_28] : memref<1x1024xf32, #tpu.memory_space<vmem>>, vector<1x1024xf32>
      tpu.vector_store %arg16[%c0_27, %c0_28], %54 {strides = array<i32>} : memref<1x1024xf32, #tpu.memory_space<vmem>>, vector<1x1024xf32>,
    } else {
    }
    %c0_i32_23 = arith.constant 0 : i32
    %50 = arith.cmpi eq, %arg1, %c0_i32_23 : i32
    %51 = arith.extui %50 : i1 to i32
    %c0_i32_24 = arith.constant 0 : i32
    %52 = arith.cmpi ne, %51, %c0_i32_24 : i32
    scf.if %52 {
      %c0_25 = arith.constant 0 : index
      %c0_26 = arith.constant 0 : index
      %53 = vector.load %arg16[%c0_25, %c0_26] : memref<1x1024xf32, #tpu.memory_space<vmem>>, vector<1x1024xf32>
      %54 = arith.truncf %53 : vector<1x1024xf32> to vector<1x1024xbf16>
      %c0_27 = arith.constant 0 : index
      %c0_28 = arith.constant 0 : index
      %55 = vector.load %arg9[%c0_27, %c0_28] : memref<1024x512xbf16, #tpu.memory_space<vmem>>, vector<1024x512xbf16>
      %cst_29 = arith.constant dense<0.000000e+00> : vector<1x512xf32>
      %56 = tpu.matmul %54, %55, %cst_29 {dimension_numbers = #tpu.dot_dimension_numbers<[1], [0], [0], [1], [0, 0, 1, 1], [], []>} : vector<1x1024xbf16>, vector<1024x512xbf16>, vector<1x512xf32> -> vector<1x512xf32>
      %c0_30 = arith.constant 0 : index
      %c0_31 = arith.constant 0 : index
      %57 = vector.load %arg10[%c0_30, %c0_31] : memref<1x512xf32, #tpu.memory_space<vmem>>, vector<1x512xf32>
      %58 = arith.addf %56, %57 : vector<1x512xf32>
      %cst_32 = arith.constant 0.000000e+00 : f32
      %59 = vector.broadcast %cst_32 : f32 to vector<1x512xf32>
      %60 = arith.maximumf %58, %59 : vector<1x512xf32>
      %61 = arith.truncf %60 : vector<1x512xf32> to vector<1x512xbf16>
      %c0_33 = arith.constant 0 : index
      %c0_34 = arith.constant 0 : index
      %62 = vector.load %arg11[%c0_33, %c0_34] : memref<512x256xbf16, #tpu.memory_space<vmem>>, vector<512x256xbf16>
      %cst_35 = arith.constant dense<0.000000e+00> : vector<1x256xf32>
      %63 = tpu.matmul %61, %62, %cst_35 {dimension_numbers = #tpu.dot_dimension_numbers<[1], [0], [0], [1], [0, 0, 1, 1], [], []>} : vector<1x512xbf16>, vector<512x256xbf16>, vector<1x256xf32> -> vector<1x256xf32>
      %c0_36 = arith.constant 0 : index
      %c0_37 = arith.constant 0 : index
      %64 = vector.load %arg12[%c0_36, %c0_37] : memref<1x256xf32, #tpu.memory_space<vmem>>, vector<1x256xf32>
      %65 = arith.addf %63, %64 : vector<1x256xf32>
      %cst_38 = arith.constant 0.000000e+00 : f32
      %66 = vector.broadcast %cst_38 : f32 to vector<1x256xf32>
      %67 = arith.maximumf %65, %66 : vector<1x256xf32>
      %68 = arith.truncf %67 : vector<1x256xf32> to vector<1x256xbf16>
      %c0_39 = arith.constant 0 : index
      %c0_40 = arith.constant 0 : index
      %69 = vector.load %arg13[%c0_39, %c0_40] : memref<256x9xbf16, #tpu.memory_space<vmem>>, vector<256x9xbf16>
      %cst_41 = arith.constant dense<0.000000e+00> : vector<1x9xf32>
      %70 = tpu.matmul %68, %69, %cst_41 {dimension_numbers = #tpu.dot_dimension_numbers<[1], [0], [0], [1], [0, 0, 1, 1], [], []>} : vector<1x256xbf16>, vector<256x9xbf16>, vector<1x9xf32> -> vector<1x9xf32>
      %c0_42 = arith.constant 0 : index
      %c0_43 = arith.constant 0 : index
      %71 = vector.load %arg14[%c0_42, %c0_43] : memref<1x9xf32, #tpu.memory_space<vmem>>, vector<1x9xf32>
      %72 = arith.addf %70, %71 : vector<1x9xf32>
      %73 = vector.shape_cast %72 : vector<1x9xf32> to vector<1x1x9xf32>
      %c0_44 = arith.constant 0 : index
      %c0_45 = arith.constant 0 : index
      %c0_46 = arith.constant 0 : index
      %74 = vector.load %arg15[%c0_44, %c0_45, %c0_46] : memref<1x1x9xf32, #tpu.memory_space<vmem>>, vector<1x1x9xf32>
      tpu.vector_store %arg15[%c0_44, %c0_45, %c0_46], %73 {strides = array<i32>} : memref<1x1x9xf32, #tpu.memory_space<vmem>>, vector<1x1x9xf32>,
    } else {
    }
    return
  }
  func.func @transform_0(%arg0: i32, %arg1: i32) -> (i32, i32, i32) {
    %c0_i32 = arith.constant 0 : i32
    %c0_i32_0 = arith.constant 0 : i32
    return %arg0, %arg1, %c0_i32 : i32, i32, i32
  }
  func.func @transform_1(%arg0: i32, %arg1: i32) -> (i32, i32, i32) {
    %c0_i32 = arith.constant 0 : i32
    %c0_i32_0 = arith.constant 0 : i32
    %c0_i32_1 = arith.constant 0 : i32
    %c0_i32_2 = arith.constant 0 : i32
    return %c0_i32, %c0_i32_0, %c0_i32_1 : i32, i32, i32
  }
  func.func @transform_2(%arg0: i32, %arg1: i32) -> (i32, i32) {
    %c0_i32 = arith.constant 0 : i32
    %c0_i32_0 = arith.constant 0 : i32
    %c0_i32_1 = arith.constant 0 : i32
    return %c0_i32, %c0_i32_0 : i32, i32
  }
  func.func @transform_3(%arg0: i32, %arg1: i32) -> (i32, i32) {
    %c0_i32 = arith.constant 0 : i32
    %c0_i32_0 = arith.constant 0 : i32
    %c0_i32_1 = arith.constant 0 : i32
    return %c0_i32, %c0_i32_0 : i32, i32
  }
  func.func @transform_4(%arg0: i32, %arg1: i32) -> (i32, i32) {
    %c0_i32 = arith.constant 0 : i32
    %c0_i32_0 = arith.constant 0 : i32
    %c0_i32_1 = arith.constant 0 : i32
    return %c0_i32, %c0_i32_0 : i32, i32
  }
  func.func @transform_5(%arg0: i32, %arg1: i32) -> (i32, i32) {
    %c0_i32 = arith.constant 0 : i32
    %c0_i32_0 = arith.constant 0 : i32
    %c0_i32_1 = arith.constant 0 : i32
    return %c0_i32, %c0_i32_0 : i32, i32
  }
  func.func @transform_6(%arg0: i32, %arg1: i32) -> (i32, i32) {
    %c0_i32 = arith.constant 0 : i32
    %c0_i32_0 = arith.constant 0 : i32
    %c0_i32_1 = arith.constant 0 : i32
    return %c0_i32, %c0_i32_0 : i32, i32
  }
  func.func @transform_7(%arg0: i32, %arg1: i32) -> (i32, i32) {
    %c0_i32 = arith.constant 0 : i32
    %c0_i32_0 = arith.constant 0 : i32
    %c0_i32_1 = arith.constant 0 : i32
    return %c0_i32, %c0_i32_0 : i32, i32
  }
  func.func @transform_8(%arg0: i32, %arg1: i32) -> (i32, i32) {
    %c0_i32 = arith.constant 0 : i32
    %c0_i32_0 = arith.constant 0 : i32
    %c0_i32_1 = arith.constant 0 : i32
    return %c0_i32, %c0_i32_0 : i32, i32
  }
  func.func @transform_9(%arg0: i32, %arg1: i32) -> (i32, i32) {
    %c0_i32 = arith.constant 0 : i32
    %c0_i32_0 = arith.constant 0 : i32
    %c0_i32_1 = arith.constant 0 : i32
    return %c0_i32, %c0_i32_0 : i32, i32
  }
  func.func @transform_10(%arg0: i32, %arg1: i32) -> (i32, i32) {
    %c0_i32 = arith.constant 0 : i32
    %c0_i32_0 = arith.constant 0 : i32
    %c0_i32_1 = arith.constant 0 : i32
    return %c0_i32, %c0_i32_0 : i32, i32
  }
  func.func @transform_11(%arg0: i32, %arg1: i32) -> (i32, i32) {
    %c0_i32 = arith.constant 0 : i32
    %c0_i32_0 = arith.constant 0 : i32
    %c0_i32_1 = arith.constant 0 : i32
    return %c0_i32, %c0_i32_0 : i32, i32
  }
  func.func @transform_12(%arg0: i32, %arg1: i32) -> (i32, i32) {
    %c0_i32 = arith.constant 0 : i32
    %c0_i32_0 = arith.constant 0 : i32
    %c0_i32_1 = arith.constant 0 : i32
    return %c0_i32, %c0_i32_0 : i32, i32
  }
  func.func @transform_13(%arg0: i32, %arg1: i32) -> (i32, i32, i32) {
    %c0_i32 = arith.constant 0 : i32
    %c0_i32_0 = arith.constant 0 : i32
    %c0_i32_1 = arith.constant 0 : i32
    return %arg0, %c0_i32, %c0_i32_0 : i32, i32, i32
  }
}

module attributes {stable_mosaic.version = 11 : i64} {
  func.func @_point_encoder_kernel(%arg0: i32, %arg1: i32, %arg2: memref<1x16x3xf32, #tpu.memory_space<vmem>>, %arg3: memref<1x3x64xf32, #tpu.memory_space<vmem>>, %arg4: memref<1x64xf32, #tpu.memory_space<vmem>>, %arg5: memref<64x128xbf16, #tpu.memory_space<vmem>>, %arg6: memref<1x128xf32, #tpu.memory_space<vmem>>, %arg7: memref<128x1024xbf16, #tpu.memory_space<vmem>>, %arg8: memref<1x1024xf32, #tpu.memory_space<vmem>>, %arg9: memref<1024x32xbf16, #tpu.memory_space<vmem>>, %arg10: memref<1x32xf32, #tpu.memory_space<vmem>>, %arg11: memref<1x1x32xf32, #tpu.memory_space<vmem>>, %arg12: memref<1x1024xf32, #tpu.memory_space<vmem>>) attributes {dimension_semantics = [#tpu.dimension_semantics<parallel>, #tpu.dimension_semantics<arbitrary>], iteration_bounds = array<i64: 2, 1>, scalar_prefetch = 0 : i64, scratch_operands = 1 : i64, tpu.core_type = #tpu.core_type<tc>, window_params = [{transform_indices = @transform_0, window_bounds = array<i64: 1, 16, 3>}, {transform_indices = @transform_1, window_bounds = array<i64: 1, 3, 64>}, {pipeline_mode = #tpu.pipeline_mode<synchronous>, transform_indices = @transform_2, window_bounds = array<i64: 1, 64>}, {pipeline_mode = #tpu.pipeline_mode<synchronous>, transform_indices = @transform_3, window_bounds = array<i64: 64, 128>}, {pipeline_mode = #tpu.pipeline_mode<synchronous>, transform_indices = @transform_4, window_bounds = array<i64: 1, 128>}, {pipeline_mode = #tpu.pipeline_mode<synchronous>, transform_indices = @transform_5, window_bounds = array<i64: 128, 1024>}, {pipeline_mode = #tpu.pipeline_mode<synchronous>, transform_indices = @transform_6, window_bounds = array<i64: 1, 1024>}, {pipeline_mode = #tpu.pipeline_mode<synchronous>, transform_indices = @transform_7, window_bounds = array<i64: 1024, 32>}, {pipeline_mode = #tpu.pipeline_mode<synchronous>, transform_indices = @transform_8, window_bounds = array<i64: 1, 32>}, {transform_indices = @transform_9, window_bounds = array<i64: 1, 1, 32>}]} {
    %c0 = arith.constant 0 : index
    %c0_0 = arith.constant 0 : index
    %c0_1 = arith.constant 0 : index
    %0 = vector.load %arg2[%c0, %c0_0, %c0_1] : memref<1x16x3xf32, #tpu.memory_space<vmem>>, vector<1x16x3xf32>
    %1 = vector.shape_cast %0 : vector<1x16x3xf32> to vector<16x3xf32>
    %c0_2 = arith.constant 0 : index
    %c0_3 = arith.constant 0 : index
    %c0_4 = arith.constant 0 : index
    %2 = vector.load %arg3[%c0_2, %c0_3, %c0_4] : memref<1x3x64xf32, #tpu.memory_space<vmem>>, vector<1x3x64xf32>
    %3 = vector.shape_cast %2 : vector<1x3x64xf32> to vector<3x64xf32>
    %4 = vector.extract_strided_slice %1 {offsets = [0, 0], sizes = [16, 1], strides = [1, 1]} : vector<16x3xf32> to vector<16x1xf32>
    %5 = vector.extract_strided_slice %3 {offsets = [0, 0], sizes = [1, 64], strides = [1, 1]} : vector<3x64xf32> to vector<1x64xf32>
    %6 = vector.broadcast %4 : vector<16x1xf32> to vector<16x64xf32>
    %7 = vector.broadcast %5 : vector<1x64xf32> to vector<16x64xf32>
    %8 = arith.mulf %6, %7 : vector<16x64xf32>
    %9 = vector.extract_strided_slice %1 {offsets = [0, 1], sizes = [16, 1], strides = [1, 1]} : vector<16x3xf32> to vector<16x1xf32>
    %10 = vector.extract_strided_slice %3 {offsets = [1, 0], sizes = [1, 64], strides = [1, 1]} : vector<3x64xf32> to vector<1x64xf32>
    %11 = vector.broadcast %9 : vector<16x1xf32> to vector<16x64xf32>
    %12 = vector.broadcast %10 : vector<1x64xf32> to vector<16x64xf32>
    %13 = arith.mulf %11, %12 : vector<16x64xf32>
    %14 = arith.addf %8, %13 : vector<16x64xf32>
    %15 = vector.extract_strided_slice %1 {offsets = [0, 2], sizes = [16, 1], strides = [1, 1]} : vector<16x3xf32> to vector<16x1xf32>
    %16 = vector.extract_strided_slice %3 {offsets = [2, 0], sizes = [1, 64], strides = [1, 1]} : vector<3x64xf32> to vector<1x64xf32>
    %17 = vector.broadcast %15 : vector<16x1xf32> to vector<16x64xf32>
    %18 = vector.broadcast %16 : vector<1x64xf32> to vector<16x64xf32>
    %19 = arith.mulf %17, %18 : vector<16x64xf32>
    %20 = arith.addf %14, %19 : vector<16x64xf32>
    %c0_5 = arith.constant 0 : index
    %c0_6 = arith.constant 0 : index
    %21 = vector.load %arg4[%c0_5, %c0_6] : memref<1x64xf32, #tpu.memory_space<vmem>>, vector<1x64xf32>
    %22 = vector.broadcast %21 : vector<1x64xf32> to vector<16x64xf32>
    %23 = arith.addf %20, %22 : vector<16x64xf32>
    %cst = arith.constant 0.000000e+00 : f32
    %24 = vector.broadcast %cst : f32 to vector<16x64xf32>
    %25 = arith.maximumf %23, %24 : vector<16x64xf32>
    %26 = arith.truncf %25 : vector<16x64xf32> to vector<16x64xbf16>
    %c0_7 = arith.constant 0 : index
    %c0_8 = arith.constant 0 : index
    %27 = vector.load %arg5[%c0_7, %c0_8] : memref<64x128xbf16, #tpu.memory_space<vmem>>, vector<64x128xbf16>
    %cst_9 = arith.constant dense<0.000000e+00> : vector<16x128xf32>
    %28 = tpu.matmul %26, %27, %cst_9 {dimension_numbers = #tpu.dot_dimension_numbers<[1], [0], [0], [1], [0, 0, 1, 1], [], []>} : vector<16x64xbf16>, vector<64x128xbf16>, vector<16x128xf32> -> vector<16x128xf32>
    %c0_10 = arith.constant 0 : index
    %c0_11 = arith.constant 0 : index
    %29 = vector.load %arg6[%c0_10, %c0_11] : memref<1x128xf32, #tpu.memory_space<vmem>>, vector<1x128xf32>
    %30 = vector.broadcast %29 : vector<1x128xf32> to vector<16x128xf32>
    %31 = arith.addf %28, %30 : vector<16x128xf32>
    %cst_12 = arith.constant 0.000000e+00 : f32
    %32 = vector.broadcast %cst_12 : f32 to vector<16x128xf32>
    %33 = arith.maximumf %31, %32 : vector<16x128xf32>
    %34 = arith.truncf %33 : vector<16x128xf32> to vector<16x128xbf16>
    %c0_13 = arith.constant 0 : index
    %c0_14 = arith.constant 0 : index
    %35 = vector.load %arg7[%c0_13, %c0_14] : memref<128x1024xbf16, #tpu.memory_space<vmem>>, vector<128x1024xbf16>
    %cst_15 = arith.constant dense<0.000000e+00> : vector<16x1024xf32>
    %36 = tpu.matmul %34, %35, %cst_15 {dimension_numbers = #tpu.dot_dimension_numbers<[1], [0], [0], [1], [0, 0, 1, 1], [], []>} : vector<16x128xbf16>, vector<128x1024xbf16>, vector<16x1024xf32> -> vector<16x1024xf32>
    %c0_16 = arith.constant 0 : index
    %c0_17 = arith.constant 0 : index
    %37 = vector.load %arg8[%c0_16, %c0_17] : memref<1x1024xf32, #tpu.memory_space<vmem>>, vector<1x1024xf32>
    %38 = vector.broadcast %37 : vector<1x1024xf32> to vector<16x1024xf32>
    %39 = arith.addf %36, %38 : vector<16x1024xf32>
    %cst_18 = arith.constant dense<0xFF800000> : vector<1024xf32>
    %40 = vector.multi_reduction <maximumf>, %39, %cst_18 [0] : vector<16x1024xf32> to vector<1024xf32>
    %41 = vector.shape_cast %40 : vector<1024xf32> to vector<1x1024xf32>
    %c0_i32 = arith.constant 0 : i32
    %42 = arith.cmpi eq, %arg1, %c0_i32 : i32
    %43 = arith.extui %42 : i1 to i32
    %c0_i32_19 = arith.constant 0 : i32
    %44 = arith.cmpi ne, %43, %c0_i32_19 : i32
    scf.if %44 {
      %c0_24 = arith.constant 0 : index
      %c0_25 = arith.constant 0 : index
      %51 = vector.load %arg12[%c0_24, %c0_25] : memref<1x1024xf32, #tpu.memory_space<vmem>>, vector<1x1024xf32>
      tpu.vector_store %arg12[%c0_24, %c0_25], %41 {strides = array<i32>} : memref<1x1024xf32, #tpu.memory_space<vmem>>, vector<1x1024xf32>,
    } else {
    }
    %c0_i32_20 = arith.constant 0 : i32
    %45 = arith.cmpi sgt, %arg1, %c0_i32_20 : i32
    %46 = arith.extui %45 : i1 to i32
    %c0_i32_21 = arith.constant 0 : i32
    %47 = arith.cmpi ne, %46, %c0_i32_21 : i32
    scf.if %47 {
      %c0_24 = arith.constant 0 : index
      %c0_25 = arith.constant 0 : index
      %51 = vector.load %arg12[%c0_24, %c0_25] : memref<1x1024xf32, #tpu.memory_space<vmem>>, vector<1x1024xf32>
      %52 = arith.maximumf %51, %41 : vector<1x1024xf32>
      %c0_26 = arith.constant 0 : index
      %c0_27 = arith.constant 0 : index
      %53 = vector.load %arg12[%c0_26, %c0_27] : memref<1x1024xf32, #tpu.memory_space<vmem>>, vector<1x1024xf32>
      tpu.vector_store %arg12[%c0_26, %c0_27], %52 {strides = array<i32>} : memref<1x1024xf32, #tpu.memory_space<vmem>>, vector<1x1024xf32>,
    } else {
    }
    %c0_i32_22 = arith.constant 0 : i32
    %48 = arith.cmpi eq, %arg1, %c0_i32_22 : i32
    %49 = arith.extui %48 : i1 to i32
    %c0_i32_23 = arith.constant 0 : i32
    %50 = arith.cmpi ne, %49, %c0_i32_23 : i32
    scf.if %50 {
      %c0_24 = arith.constant 0 : index
      %c0_25 = arith.constant 0 : index
      %51 = vector.load %arg12[%c0_24, %c0_25] : memref<1x1024xf32, #tpu.memory_space<vmem>>, vector<1x1024xf32>
      %52 = arith.truncf %51 : vector<1x1024xf32> to vector<1x1024xbf16>
      %c0_26 = arith.constant 0 : index
      %c0_27 = arith.constant 0 : index
      %53 = vector.load %arg9[%c0_26, %c0_27] : memref<1024x32xbf16, #tpu.memory_space<vmem>>, vector<1024x32xbf16>
      %cst_28 = arith.constant dense<0.000000e+00> : vector<1x32xf32>
      %54 = tpu.matmul %52, %53, %cst_28 {dimension_numbers = #tpu.dot_dimension_numbers<[1], [0], [0], [1], [0, 0, 1, 1], [], []>} : vector<1x1024xbf16>, vector<1024x32xbf16>, vector<1x32xf32> -> vector<1x32xf32>
      %c0_29 = arith.constant 0 : index
      %c0_30 = arith.constant 0 : index
      %55 = vector.load %arg10[%c0_29, %c0_30] : memref<1x32xf32, #tpu.memory_space<vmem>>, vector<1x32xf32>
      %56 = arith.addf %54, %55 : vector<1x32xf32>
      %cst_31 = arith.constant 0.000000e+00 : f32
      %57 = vector.broadcast %cst_31 : f32 to vector<1x32xf32>
      %58 = arith.maximumf %56, %57 : vector<1x32xf32>
      %59 = vector.shape_cast %58 : vector<1x32xf32> to vector<1x1x32xf32>
      %c0_32 = arith.constant 0 : index
      %c0_33 = arith.constant 0 : index
      %c0_34 = arith.constant 0 : index
      %60 = vector.load %arg11[%c0_32, %c0_33, %c0_34] : memref<1x1x32xf32, #tpu.memory_space<vmem>>, vector<1x1x32xf32>
      tpu.vector_store %arg11[%c0_32, %c0_33, %c0_34], %59 {strides = array<i32>} : memref<1x1x32xf32, #tpu.memory_space<vmem>>, vector<1x1x32xf32>,
    } else {
    }
    return
  }
  func.func @transform_0(%arg0: i32, %arg1: i32) -> (i32, i32, i32) {
    %c0_i32 = arith.constant 0 : i32
    %c0_i32_0 = arith.constant 0 : i32
    return %arg0, %arg1, %c0_i32 : i32, i32, i32
  }
  func.func @transform_1(%arg0: i32, %arg1: i32) -> (i32, i32, i32) {
    %c0_i32 = arith.constant 0 : i32
    %c0_i32_0 = arith.constant 0 : i32
    %c0_i32_1 = arith.constant 0 : i32
    return %arg0, %c0_i32, %c0_i32_0 : i32, i32, i32
  }
  func.func @transform_2(%arg0: i32, %arg1: i32) -> (i32, i32) {
    %c0_i32 = arith.constant 0 : i32
    %c0_i32_0 = arith.constant 0 : i32
    %c0_i32_1 = arith.constant 0 : i32
    return %c0_i32, %c0_i32_0 : i32, i32
  }
  func.func @transform_3(%arg0: i32, %arg1: i32) -> (i32, i32) {
    %c0_i32 = arith.constant 0 : i32
    %c0_i32_0 = arith.constant 0 : i32
    %c0_i32_1 = arith.constant 0 : i32
    return %c0_i32, %c0_i32_0 : i32, i32
  }
  func.func @transform_4(%arg0: i32, %arg1: i32) -> (i32, i32) {
    %c0_i32 = arith.constant 0 : i32
    %c0_i32_0 = arith.constant 0 : i32
    %c0_i32_1 = arith.constant 0 : i32
    return %c0_i32, %c0_i32_0 : i32, i32
  }
  func.func @transform_5(%arg0: i32, %arg1: i32) -> (i32, i32) {
    %c0_i32 = arith.constant 0 : i32
    %c0_i32_0 = arith.constant 0 : i32
    %c0_i32_1 = arith.constant 0 : i32
    return %c0_i32, %c0_i32_0 : i32, i32
  }
  func.func @transform_6(%arg0: i32, %arg1: i32) -> (i32, i32) {
    %c0_i32 = arith.constant 0 : i32
    %c0_i32_0 = arith.constant 0 : i32
    %c0_i32_1 = arith.constant 0 : i32
    return %c0_i32, %c0_i32_0 : i32, i32
  }
  func.func @transform_7(%arg0: i32, %arg1: i32) -> (i32, i32) {
    %c0_i32 = arith.constant 0 : i32
    %c0_i32_0 = arith.constant 0 : i32
    %c0_i32_1 = arith.constant 0 : i32
    return %c0_i32, %c0_i32_0 : i32, i32
  }
  func.func @transform_8(%arg0: i32, %arg1: i32) -> (i32, i32) {
    %c0_i32 = arith.constant 0 : i32
    %c0_i32_0 = arith.constant 0 : i32
    %c0_i32_1 = arith.constant 0 : i32
    return %c0_i32, %c0_i32_0 : i32, i32
  }
  func.func @transform_9(%arg0: i32, %arg1: i32) -> (i32, i32, i32) {
    %c0_i32 = arith.constant 0 : i32
    %c0_i32_0 = arith.constant 0 : i32
    %c0_i32_1 = arith.constant 0 : i32
    return %arg0, %c0_i32, %c0_i32_0 : i32, i32, i32
  }
}

</mosaic_0001>

<bundles_post_ra>
// kernel: pointnetfeat.3
= control target key start
LH: loop header
LB: loop body
LE: loop exit
PB: predicated region body
PF: predicated region fallthrough
CT: control target
= control target key end

     0   :  { %s3243_s0 = inlined_call_operand.vmem [shape: f32[2,16,3], index: 0, kind: input, shape index: {}]   ;;  %s3244_s1 = inlined_call_operand.vmem [shape: f32[2,3,64], index: 1, kind: input, shape index: {}]   ;;  %s3245_s2 = inlined_call_operand.vmem [shape: f32[1,64], index: 2, kind: input, shape index: {}]   ;;  %s3246_s3 = inlined_call_operand.vmem [shape: bf16[64,128], index: 3, kind: input, shape index: {}]   ;;  %s3247_s4 = inlined_call_operand.vmem [shape: f32[1,128], index: 4, kind: input, shape index: {}]   ;;  %s3248_s5 = inlined_call_operand.vmem [shape: bf16[128,1024], index: 5, kind: input, shape index: {}]   ;;  %s3249_s6 = inlined_call_operand.vmem [shape: f32[1,1024], index: 6, kind: input, shape index: {}]   ;;  %s3250_s7 = inlined_call_operand.vmem [shape: bf16[1024,32], index: 7, kind: input, shape index: {}]   ;;  %s3251_s8 = inlined_call_operand.vmem [shape: f32[1,32], index: 8, kind: input, shape index: {}]   ;;  %s3252_s9 = inlined_call_operand.hbm [shape: f32[2,1,32], index: 9, kind: output, shape index: {}]  }
   0x1   :  { %3253 = sst [smem:[#allocation6_spill]] %s3243_s0 }
   0x2   :  { %14 = vsyncpa [#allocation4], 0 }
   0x3   :  { %16 = vsyncpa [#allocation4 + $0x1], 0  ;;  %s2651_s30 = smov 0   ;;  %s2653_s10 = smov 0  }
   0x4   :  { %s2655_s11 = smov 0   ;;  %s2657_s12 = smov 0  }
   0x5   :  { %s2659_s13 = smov 0   ;;  %s2661_s14 = smov 0  }
   0x6 LB: > { %s2131_s15 = sadd.s32 4294967295, %s2592_s14   ;;  %s2132_s16 = sadd.s32 4294967294, %s2592_s14   ;;  %s2592_s14 = sphi %s2661_s14, %s22_s14   ;;  %s2588_s13 = sphi %s2659_s13, %s3261_s13   ;;  %s2584_s12 = sphi %s2657_s12, %s3260_s12   ;;  %s2580_s11 = sphi %s2655_s11, %s3259_s11   ;;  %s2576_s10 = sphi %s2653_s10, %s3258_s10   ;;  %s2572_s30 = sphi %s2651_s30, %s3257_s30  }
   0x7   : > { %s34_s17 = sadd.s32 1, %s2588_s13  ;;  %s242_s18 = sadd.s32 1, %s2580_s11 }
   0x8   : > { %p36_p0 = scmp.ge.s32.totalorder %s34_s17, 2  ;;  %p252_p1 = scmp.ne.s32.totalorder %s2580_s11, %s2576_s10 }
   0x9   : > { %p253_p2 = scmp.eq.s32.totalorder %s2131_s15, 1  ;;  %p258_p3 = scmp.ne.s32.totalorder %s2576_s10, %s2572_s30 }
   0xa   : > { %s3263_s17 = smov (%p36_p0, %s34_s17), 0  ;;  %p259_p5 = scmp.eq.s32.totalorder %s2132_s16, 1 }
   0xb   : > { %p2691_p4 = por %p253_p2, %p252_p1  ;;  %s239_s20 = ssub.s32 %s2588_s13, %s3263_s17 }
   0xc   : > { %p2135_p6 = scmp.ge.s32.totalorder %s2592_s14, 1  ;;  %p240_p7 = scmp.eq.s32.totalorder %s239_s20, 0 }
   0xd   : > { %p2698_p8 = por %p259_p5, %p258_p3  ;;  %p318_p9 = scmp.lt.s32.totalorder %s2592_s14, 3 }
   0xe   : > { %s2704_s22 = scalar_select %p240_p7, %s2580_s11, %s242_s18  }
   0xf   : > { %p319_p10 = pnand %p2135_p6, %p318_p9 }
  0x10   : > { %p362_p11 = scmp.lt.s32.totalorder (!%p319_p10), %s2584_s12, 1  ;;  %s3256_s0 = sld [smem:[#allocation6_spill]] (!%p319_p10) }
  0x11   : > { %322 = sbr.rel (%p319_p10) target bundleno = 883 (0x373), region = 56  ;;  %s359_s18 = sand.u32 (!%p319_p10), 1, %s2576_s10  }
  0x12   : > { %s2274_s20 = sshll.u32 (!%p319_p10), %s2584_s12, 4  ;;  %s2038_s28 = scalar_lea.sflag (!%p319_p10), [#allocation4], %s359_s18 }
  0x13   : > { %s2600_s15 = smov (!%p319_p10), [#allocation3]  }
  0x14   : > { %s2520_s16 = sshll.u32 (!%p319_p10), %s2600_s15, 4  ;;  %s2521_s16 = int_to_ptr.vmem [resolvable:$false] %s2520_s16 }
  0x16   : > { %v2594_v0 = vmov 1   ;;  %v2595_v1 = vmov 0   ;;  %s2709_s23 = scalar_select %p362_p11, %s2584_s12, 1  ;;  %v2448_v2 = vld [vmem:[%s3246_s3 + $0x18] sm:$0xff]   ;;  %v2596_v4 = vmov 0.0   ;;  %v2449_v6 = vld [vmem:[%s3246_s3 + $0x10] sm:$0xff]   ;;  %v389_v38 = vlaneseq }
  0x17   : > { %2445 = vset.pattern.permute.xlu1 %v2594_v0  ;;  %2444 = vset.pattern.permute.xlu0 %v2595_v1  ;;  %v2450_v7 = vld [vmem:[%s3246_s3 + $0x8] sm:$0xff]   ;;  %v2597_v8 = vmov 2   ;;  %v2451_v9 = vld [vmem:[%s3246_s3] sm:$0xff]   ;;  %vm2598_vm0 = vmmov 0   ;;  %vm478_vm1 = vcmask 523264   ;;  %vm2035_vm2 = vcmask 253952  }
  0x18   : > { %984 = vmatprep.mubr.bf16.mxu1 %v2595_v1  ;;  %s2277_s24 = sshll.u32 %s2709_s23, 4  ;;  %2371 = vmatprep.subr.bf16.mxu0 %v2596_v4  ;;  %v582_v10 = vld [vmem:[%s3248_s5 + $0x1c0] sm:$0xff]  ;;  %v2737_v12 = vld [vmem:[%s3248_s5 + $0x1c8] sm:$0xff]  ;;  %v2779_v39 = vshrl.u32 %v389_v38, 7  ;;  %s2522_s12 = scalar_lea.vmem %s2521_s16, 32 }
  0x19   : > { %s369_s27 = scalar_lea.vmem %s3256_s0, %s2277_s24  ;;  %2372 = vmatpush3.bf16.msra.mxu0 %v2448_v2  ;;  %2379 = vmatprep.mubr.msk.bf16.mxu0 %vm2598_vm0, %v2596_v4  ;;  %v586_v11 = vld [vmem:[%s3248_s5 + $0x1e0] sm:$0xff]  ;;  %v2742_v14 = vld [vmem:[%s3248_s5 + $0x1e8] sm:$0xff]  ;;  %s2138_s24 = sshll.u32 %s2709_s23, 2 }
  0x1a   : > { %v376_v3 = vld [vmem:[%s369_s27] sm:$0xff]  ;;  %v377_v5 = vld [vmem:[%s369_s27 + $0x8] sm:$0xff]  ;;  %2373 = vmatprep.subr.bf16.mxu0 %v2596_v4  ;;  %v2203_v13 = vcombine.high %v582_v10, %v586_v11  ;;  %v2202_v15 = vcombine.low %v582_v10, %v586_v11  ;;  %v2204_v18 = vcombine.low %v2737_v12, %v2742_v14  ;;  %v2205_v19 = vcombine.high %v2737_v12, %v2742_v14  ;;  %s374_s27 = scalar_lea.vmem %s3244_s1, %s2138_s24  ;;  %s360_s24 = scalar_lea.vmem [#allocation3], %s359_s18 }
  0x1b   : > { %396 = vperm.xlu1 %2445, %v376_v3   ;;  %381 = vperm.xlu0 %2444, %v376_v3   ;;  %v574_v16 = vld [vmem:[%s3248_s5 + $0x180] sm:$0xff]  ;;  %v2785_v40 = vsub.s32 1, %v2779_v39  ;;  %v2788_v41 = vsub.s32 0, %v2779_v39  ;;  %v2791_v45 = vsub.s32 2, %v2779_v39  ;;  %v571_v10 = vld [vmem:[%s3248_s5 + $0x168] sm:$0xff]  ;;  %s2050_s25 = sshll.u32 %s360_s24, 4  ;;  %s2048_s23 = scalar_lea.hbm %s3252_s9, %s2274_s20  ;;  %s2051_s25 = int_to_ptr.vmem [resolvable:$true] %s2050_s25 }
  0x1c   : > { %v578_v17 = vld [vmem:[%s3248_s5 + $0x1a0] sm:$0xff]  ;;  %952 = vmatprep.subr.bf16.mxu1 %v2203_v13  ;;  %v551_v12 = vld [vmem:[%s3248_s5 + $0xc8] sm:$0xff]  ;;  %s2516_s29 = scalar_lea.vmem %s2051_s25, 16  ;;  %p2523_p1 = scmp.lt.s32.totalorder %s2051_s25, %s2521_s16 }
  0x1d   : > { %2374 = vmatpush3.bf16.msra.mxu0 %v2449_v6  ;;  %v2195_v20 = vcombine.high %v574_v16, %v578_v17  ;;  %953 = vmatpush1.bf16.msra.mxu1 %v2202_v15  ;;  %v2194_v21 = vcombine.low %v574_v16, %v578_v17  ;;  %v566_v22 = vld [vmem:[%s3248_s5 + $0x140] sm:$0xff]  ;;  %v559_v15 = vld [vmem:[%s3248_s5 + $0x108] sm:$0xff]  ;;  %p2517_p12 = scmp.ne.s32.totalorder %s2051_s25, %s2516_s29  ;;  %p2524_p2 = scmp.lt.s32.totalorder %s2522_s12, %s2516_s29 }
  0x1e   : > { %2375 = vmatprep.subr.bf16.mxu0 %v2596_v4  ;;  %v570_v23 = vld [vmem:[%s3248_s5 + $0x160] sm:$0xff]  ;;  %v563_v16 = vld [vmem:[%s3248_s5 + $0x128] sm:$0xff] }
  0x1f   : > { %400 = vperm.xlu1 %2445, %v377_v5   ;;  %386 = vperm.xlu0 %2444, %v377_v5   ;;  %v2187_v24 = vcombine.high %v566_v22, %v570_v23  ;;  %v2186_v25 = vcombine.low %v566_v22, %v570_v23  ;;  %v558_v26 = vld [vmem:[%s3248_s5 + $0x100] sm:$0xff]  ;;  %v555_v14 = vld [vmem:[%s3248_s5 + $0xe8] sm:$0xff]  ;;  %p2518_p13 = pnand %p2517_p12, %p2691_p4  ;;  %p2525_p3 = por %p2524_p2, %p2523_p1 }
  0x20   : > { %954 = vmatprep.subr.bf16.mxu1 %v2195_v20  ;;  %v562_v27 = vld [vmem:[%s3248_s5 + $0x120] sm:$0xff]  ;;  %v2173_v20 = vcombine.high %v551_v12, %v555_v14  ;;  %v547_v22 = vld [vmem:[%s3248_s5 + $0xa8] sm:$0xff]  ;;  %v2172_v23 = vcombine.low %v551_v12, %v555_v14  ;;  %v561_v12 = vld [vmem:[%s3248_s5 + $0x118] sm:$0xff] }
  0x21   : > { %2376 = vmatpush3.bf16.msra.mxu0 %v2450_v7  ;;  %955 = vmatpush1.bf16.msra.mxu1 %v2194_v21  ;;  %v2179_v28 = vcombine.high %v558_v26, %v562_v27  ;;  %v2178_v29 = vcombine.low %v558_v26, %v562_v27  ;;  %v550_v30 = vld [vmem:[%s3248_s5 + $0xc0] sm:$0xff]  ;;  %v543_v21 = vld [vmem:[%s3248_s5 + $0x88] sm:$0xff]  ;;  %v565_v14 = vld [vmem:[%s3248_s5 + $0x138] sm:$0xff]  ;;  %p2519_p0 = pneg %p2518_p13 }
  0x22   : > { %2377 = vmatprep.subr.bf16.mxu0 %v2596_v4  ;;  %956 = vmatprep.subr.bf16.mxu1 %v2187_v24  ;;  %v554_v31 = vld [vmem:[%s3248_s5 + $0xe0] sm:$0xff]  ;;  %v579_v4 = vld [vmem:[%s3248_s5 + $0x1a8] sm:$0xff]  ;;  %v2165_v24 = vcombine.high %v543_v21, %v547_v22 }
  0x23   : > { %2447 = vset.pattern.permute.xlu1 %v2597_v8  ;;  %2446 = vset.pattern.permute.xlu0 %v2597_v8  ;;  %v2171_v32 = vcombine.high %v550_v30, %v554_v31  ;;  %v2170_v33 = vcombine.low %v550_v30, %v554_v31  ;;  %v542_v34 = vld [vmem:[%s3248_s5 + $0x80] sm:$0xff]  ;;  %v539_v30 = vld [vmem:[%s3248_s5 + $0x68] sm:$0xff]  ;;  %p2526_p5 = pnand %p2525_p3, %p2519_p0 }
  0x24   : > { %416 = vperm.xlu1 %2447, %v377_v5   ;;  %412 = vperm.xlu0 %2446, %v376_v3   ;;  %v546_v35 = vld [vmem:[%s3248_s5 + $0xa0] sm:$0xff]  ;;  %v575_v3 = vld [vmem:[%s3248_s5 + $0x188] sm:$0xff] }
  0x25   : > { %2378 = vmatpush3.bf16.msra.mxu0 %v2451_v9  ;;  %957 = vmatpush1.bf16.msra.mxu1 %v2186_v25  ;;  %v2163_v36 = vcombine.high %v542_v34, %v546_v35  ;;  %v2162_v37 = vcombine.low %v542_v34, %v546_v35  ;;  %v378_v42 = vld [vmem:[%s374_s27] sm:$0x7]  ;;  %v2197_v8 = vcombine.high %v575_v3, %v579_v4  ;;  %v567_v9 = vld [vmem:[%s3248_s5 + $0x148] sm:$0xff] }
  0x26   : > { %995 = vmatprep.subr.bf16.mxu0 %v2205_v19  ;;  %958 = vmatprep.subr.bf16.mxu1 %v2179_v28  ;;  %v406_v46 = vrot.slane %v378_v42, %v2785_v40  ;;  %v392_v47 = vrot.slane %v378_v42, %v2788_v41  ;;  %v422_v50 = vrot.slane %v378_v42, %v2791_v45  ;;  %v2139_v61 = vld [vmem:[%s3245_s2] ss:$0 sm:$0xff]  ;;  %v535_v28 = vld [vmem:[%s3248_s5 + $0x48] sm:$0xff] }
  0x27   : > { %v2196_v11 = vcombine.low %v575_v3, %v579_v4  ;;  %v2189_v13 = vcombine.high %v567_v9, %v571_v10  ;;  %v2188_v17 = vcombine.low %v567_v9, %v571_v10  ;;  %v2181_v19 = vcombine.high %v559_v15, %v563_v16  ;;  %v534_v26 = vld [vmem:[%s3248_s5 + $0x40] sm:$0xff]  ;;  %v531_v38 = vld [vmem:[%s3248_s5 + $0x28] sm:$0xff]  ;;  %v569_v9 = vld [vmem:[%s3248_s5 + $0x158] sm:$0xff] }
  0x28   : > { %v2164_v25 = vcombine.low %v543_v21, %v547_v22  ;;  %v538_v27 = vld [vmem:[%s3248_s5 + $0x60] sm:$0xff]  ;;  %v2156_v31 = vcombine.low %v535_v28, %v539_v30  ;;  %v573_v10 = vld [vmem:[%s3248_s5 + $0x178] sm:$0xff]  ;;  %v2185_v22 = vcombine.high %v561_v12, %v565_v14 }
  0x29   : > { %959 = vmatpush1.bf16.msra.mxu1 %v2178_v29  ;;  %v2155_v29 = vcombine.high %v534_v26, %v538_v27  ;;  %v526_v34 = vld [vmem:[%s3248_s5] sm:$0xff] }
  0x2a   : > { %960 = vmatprep.subr.bf16.mxu1 %v2171_v32  ;;  %v2157_v32 = vcombine.high %v535_v28, %v539_v30  ;;  %v530_v35 = vld [vmem:[%s3248_s5 + $0x20] sm:$0xff]  ;;  %v544_v30 = vld [vmem:[%s3248_s5 + $0x90] sm:$0xff] }
  0x2d   : > { %961 = vmatpush1.bf16.msra.mxu1 %v2170_v33  ;;  %v2154_v33 = vcombine.low %v534_v26, %v538_v27  ;;  %v2184_v27 = vcombine.low %v561_v12, %v565_v14  ;;  %v2472_v12 = vld [vmem:[%s3250_s7 + $0x50] sm:$0xff]  }
  0x2e   : > { %962 = vmatprep.subr.bf16.mxu1 %v2163_v36  ;;  %v527_v36 = vld [vmem:[%s3248_s5 + $0x8] sm:$0xff]  ;;  %v2473_v14 = vld [vmem:[%s3250_s7 + $0xd0] sm:$0xff]  }
  0x2f   : > { %v2148_v42 = vcombine.low %v527_v36, %v531_v38 }
  0x31   : > { %963 = vmatpush1.bf16.msra.mxu1 %v2162_v37  ;;  %v2147_v37 = vcombine.high %v526_v34, %v530_v35 }
  0x32   : > { %964 = vmatprep.subr.bf16.mxu1 %v2155_v29 }
  0x35   : > { %965 = vmatpush1.bf16.msra.mxu1 %v2154_v33  ;;  %v549_v33 = vld [vmem:[%s3248_s5 + $0xb8] sm:$0xff] }
  0x36   : > { %966 = vmatprep.subr.bf16.mxu1 %v2147_v37 }
  0x96   : > { %v397_v43 = vpop.permute.xlu1 %396  ;;  %v382_v44 = vpop.permute.xlu0 %381 }
  0x97   : > { %v407_v51 = vmul.f32 %v406_v46, %v397_v43  ;;  %v393_v52 = vmul.f32 %v392_v47, %v382_v44  ;;  %v2149_v43 = vcombine.high %v527_v36, %v531_v38  ;;  %v2146_v44 = vcombine.low %v526_v34, %v530_v35  ;;  %v536_v38 = vld [vmem:[%s3248_s5 + $0x50] sm:$0xff] }
  0x99   : > { %v409_v57 = vadd.f32 %v407_v51, %v393_v52  ;;  %967 = vmatpush1.bf16.msra.mxu1 %v2146_v44  ;;  %v541_v44 = vld [vmem:[%s3248_s5 + $0x78] sm:$0xff] }
  0x9a   : > { %v401_v48 = vpop.permute.xlu1 %400  ;;  %v387_v49 = vpop.permute.xlu0 %386 }
  0x9b   : > { %v408_v53 = vmul.f32 %v406_v46, %v401_v48  ;;  %v394_v54 = vmul.f32 %v392_v47, %v387_v49  ;;  %v584_v46 = vld [vmem:[%s3248_s5 + $0x1d0] sm:$0xff]  ;;  %v585_v48 = vld [vmem:[%s3248_s5 + $0x1d8] sm:$0xff] }
  0x9c   : > { %v588_v47 = vld [vmem:[%s3248_s5 + $0x1f0] sm:$0xff] }
  0x9d   : > { %v410_v58 = vadd.f32 %v408_v53, %v394_v54  ;;  %v2207_v49 = vcombine.high %v584_v46, %v588_v47  ;;  %v2206_v51 = vcombine.low %v584_v46, %v588_v47  ;;  %v2140_v54 = vld [vmem:[%s3247_s4] ss:$0 sm:$0xff] }
  0x9f   : > { %v417_v55 = vpop.permute.xlu1 %416  ;;  %v413_v56 = vpop.permute.xlu0 %412  ;;  %1038 = vmatprep.subr.bf16.mxu1 %v2207_v49 }
  0xa0   : > { %v424_v59 = vmul.f32 %v422_v50, %v417_v55  ;;  %v423_v60 = vmul.f32 %v422_v50, %v413_v56  ;;  %v589_v50 = vld [vmem:[%s3248_s5 + $0x1f8] sm:$0xff] }
  0xa1   : > { %v2208_v52 = vcombine.low %v585_v48, %v589_v50  ;;  %v2209_v53 = vcombine.high %v585_v48, %v589_v50  ;;  %v528_v50 = vld [vmem:[%s3248_s5 + $0x10] sm:$0xff] }
  0xa2   : > { %v426_v62 = vadd.f32 %v424_v59, %v410_v58  ;;  %v425_v63 = vadd.f32 %v423_v60, %v409_v57  ;;  %v576_v60 = vld [vmem:[%s3248_s5 + $0x190] sm:$0xff] }
  0xa4   : > { %v435_v0 = vadd.f32 %v2139_v61, %v426_v62  ;;  %v434_v2 = vadd.f32 %v2139_v61, %v425_v63  ;;  %v580_v62 = vld [vmem:[%s3248_s5 + $0x1b0] sm:$0xff]  ;;  %v577_v63 = vld [vmem:[%s3248_s5 + $0x198] sm:$0xff] }
  0xa6   : > { %v437_v5 = vmax.f32 %v435_v0, 0.0  ;;  %v436_v6 = vmax.f32 %v434_v2, 0.0  ;;  %v581_v0 = vld [vmem:[%s3248_s5 + $0x1b8] sm:$0xff] }
  0xa8   : > { %v438_v7 = vpack.c.bf16 %v437_v5, %v436_v6  ;;  %v2199_v5 = vcombine.high %v576_v60, %v580_v62  ;;  %v2201_v6 = vcombine.high %v577_v63, %v581_v0 }
  0xaa   : > { %2380 = vmatmul.mubr.msk.bf16.vlgmr.msra.gmra.mxu0 %vm478_vm1, %v438_v7  ;;  %v568_v7 = vld [vmem:[%s3248_s5 + $0x150] sm:$0xff] }
  0xab   : > { %996 = vmatpush1.bf16.msra.mxu0 %v2204_v18  ;;  %1027 = vmatprep.mubr.bf16.mxu0 %v2595_v1  ;;  %v2180_v18 = vcombine.low %v559_v15, %v563_v16  ;;  %v2193_v16 = vcombine.high %v569_v9, %v573_v10 }
  0xac   : > { %997 = vmatprep.subr.bf16.mxu0 %v2197_v8  ;;  %v572_v8 = vld [vmem:[%s3248_s5 + $0x170] sm:$0xff] }
  0xad   : > { %v2191_v15 = vcombine.high %v568_v7, %v572_v8 }
  0xaf   : > { %998 = vmatpush1.bf16.msra.mxu0 %v2196_v11  ;;  %v2198_v11 = vcombine.low %v576_v60, %v580_v62  ;;  %v2452_v60 = vld [vmem:[%s3250_s7 + $0x78] sm:$0xff]  }
  0xb0   : > { %999 = vmatprep.subr.bf16.mxu0 %v2189_v13  ;;  %v2200_v13 = vcombine.low %v577_v63, %v581_v0  ;;  %v2454_v62 = vld [vmem:[%s3250_s7 + $0x38] sm:$0xff]   ;;  %v2456_v0 = vld [vmem:[%s3250_s7 + $0x70] sm:$0xff]  }
  0xb1   : > { %v2455_v63 = vld [vmem:[%s3250_s7 + $0xb8] sm:$0xff]  }
  0xb3   : > { %1000 = vmatpush1.bf16.msra.mxu0 %v2188_v17  ;;  %v560_v17 = vld [vmem:[%s3248_s5 + $0x110] sm:$0xff] }
  0xb4   : > { %1001 = vmatprep.subr.bf16.mxu0 %v2181_v19  ;;  %v564_v19 = vld [vmem:[%s3248_s5 + $0x130] sm:$0xff] }
  0xb5   : > { %v2183_v21 = vcombine.high %v560_v17, %v564_v19  ;;  %v2182_v26 = vcombine.low %v560_v17, %v564_v19  ;;  %v2470_v17 = vld [vmem:[%s3250_s7 + $0x18] sm:$0xff]  }
  0xb6   : > { %v2471_v19 = vld [vmem:[%s3250_s7 + $0x98] sm:$0xff]  }
  0xb7   : > { %1002 = vmatpush1.bf16.msra.mxu0 %v2180_v18  ;;  %v2190_v18 = vcombine.low %v568_v7, %v572_v8  ;;  %v2462_v7 = vld [vmem:[%s3250_s7 + $0x28] sm:$0xff]  }
  0xb8   : > { %1003 = vmatprep.subr.bf16.mxu0 %v2173_v20  ;;  %v2192_v20 = vcombine.low %v569_v9, %v573_v10  ;;  %v2463_v8 = vld [vmem:[%s3250_s7 + $0xa8] sm:$0xff]   ;;  %v2464_v9 = vld [vmem:[%s3250_s7 + $0x60] sm:$0xff]  }
  0xb9   : > { %v2465_v10 = vld [vmem:[%s3250_s7 + $0xe0] sm:$0xff]  }
  0xbb   : > { %1004 = vmatpush1.bf16.msra.mxu0 %v2172_v23  ;;  %v552_v23 = vld [vmem:[%s3248_s5 + $0xd0] sm:$0xff] }
  0xbc   : > { %1005 = vmatprep.subr.bf16.mxu0 %v2165_v24  ;;  %v556_v24 = vld [vmem:[%s3248_s5 + $0xf0] sm:$0xff] }
  0xbd   : > { %v2175_v28 = vcombine.high %v552_v23, %v556_v24  ;;  %v2174_v34 = vcombine.low %v552_v23, %v556_v24  ;;  %v2478_v23 = vld [vmem:[%s3250_s7 + $0x8] sm:$0xff]  }
  0xbe   : > { %v2479_v24 = vld [vmem:[%s3250_s7 + $0x88] sm:$0xff]  }
  0xbf   : > { %1006 = vmatpush1.bf16.msra.mxu0 %v2164_v25  ;;  %v557_v25 = vld [vmem:[%s3248_s5 + $0xf8] sm:$0xff] }
  0xc0   : > { %1007 = vmatprep.subr.bf16.mxu0 %v2157_v32  ;;  %v545_v32 = vld [vmem:[%s3248_s5 + $0x98] sm:$0xff] }
  0xc1   : > { %v2169_v37 = vcombine.high %v545_v32, %v549_v33  ;;  %v2168_v47 = vcombine.low %v545_v32, %v549_v33 }
  0xc3   : > { %1008 = vmatpush1.bf16.msra.mxu0 %v2156_v31  ;;  %v548_v31 = vld [vmem:[%s3248_s5 + $0xb0] sm:$0xff] }
  0xc4   : > { %1009 = vmatprep.subr.bf16.mxu0 %v2149_v43  ;;  %v2167_v36 = vcombine.high %v544_v30, %v548_v31  ;;  %v537_v43 = vld [vmem:[%s3248_s5 + $0x58] sm:$0xff]  ;;  %v2166_v46 = vcombine.low %v544_v30, %v548_v31 }
  0xc5   : > { %v2161_v49 = vcombine.high %v537_v43, %v541_v44 }
  0xc7   : > { %1010 = vmatpush1.bf16.msra.mxu0 %v2148_v42  ;;  %v540_v42 = vld [vmem:[%s3248_s5 + $0x70] sm:$0xff] }
  0xc8   : > { %1081 = vmatprep.subr.bf16.mxu0 %v2209_v53  ;;  %v2159_v48 = vcombine.high %v536_v38, %v540_v42  ;;  %v533_v53 = vld [vmem:[%s3248_s5 + $0x38] sm:$0xff] }
 0x16a   : > { %v516_v55 = vpop.f32.mrf.mxu0 }
 0x16b   : > { %v517_v57 = vadd.f32 %v2140_v54, %v516_v55  ;;  %v2160_v55 = vcombine.low %v537_v43, %v541_v44 }
 0x16c   : > { %v2381_v56 = vpop.f32.mrf.mxu0 }
 0x16d   : > { %v523_v2 = vmax.f32 %v517_v57, 0.0 }
 0x16e   : > { %v519_v58 = vpop.f32.mrf.mxu0 }
 0x16f   : > { %v520_v59 = vadd.f32 %v2140_v54, %v519_v58  ;;  %v2158_v54 = vcombine.low %v536_v38, %v540_v42 }
 0x170   : > { %v2382_v61 = vpop.f32.mrf.mxu0 }
 0x171   : > { %v524_v3 = vmax.f32 %v520_v59, 0.0  ;;  %v2453_v61 = vld [vmem:[%s3250_s7 + $0xf8] sm:$0xff]  }
 0x173   : > { %v2884_v4 = vpack.c.bf16 %v524_v3, %v523_v2  ;;  %v2457_v2 = vld [vmem:[%s3250_s7 + $0xf0] sm:$0xff]  }
 0x174   : > { %v2458_v3 = vld [vmem:[%s3250_s7 + $0x30] sm:$0xff]  }
 0x175   : > { %985 = vmatmul.mubr.bf16.vlgmr.msra.gmra.mxu1 %v2884_v4  ;;  %1028 = vmatmul.mubr.bf16.vlgmr.msra.gmra.mxu0 %v2884_v4 }
 0x176   : > { %1039 = vmatpush1.bf16.msra.mxu1 %v2206_v51  ;;  %1082 = vmatpush1.bf16.msra.mxu0 %v2208_v52  ;;  %v532_v51 = vld [vmem:[%s3248_s5 + $0x30] sm:$0xff]  ;;  %v529_v52 = vld [vmem:[%s3248_s5 + $0x18] sm:$0xff] }
 0x177   : > { %1040 = vmatprep.subr.bf16.mxu1 %v2199_v5  ;;  %1083 = vmatprep.subr.bf16.mxu0 %v2201_v6  ;;  %v2151_v56 = vcombine.high %v528_v50, %v532_v51  ;;  %v2153_v57 = vcombine.high %v529_v52, %v533_v53  ;;  %v2150_v58 = vcombine.low %v528_v50, %v532_v51  ;;  %v2460_v5 = vld [vmem:[%s3250_s7 + $0x68] sm:$0xff]  }
 0x178   : > { %1070 = vmatprep.mubr.bf16.mxu1 %v2595_v1  ;;  %1113 = vmatprep.mubr.bf16.mxu0 %v2595_v1  ;;  %v553_v1 = vld [vmem:[%s3248_s5 + $0xd8] sm:$0xff]  ;;  %v2152_v59 = vcombine.low %v529_v52, %v533_v53  ;;  %v2461_v6 = vld [vmem:[%s3250_s7 + $0xe8] sm:$0xff]  }
 0x179   : > { %v2177_v29 = vcombine.high %v553_v1, %v557_v25  ;;  %v2176_v35 = vcombine.low %v553_v1, %v557_v25  ;;  %v2480_v1 = vld [vmem:[%s3250_s7 + $0x40] sm:$0xff]  }
 0x17a   : > { %1041 = vmatpush1.bf16.msra.mxu1 %v2198_v11  ;;  %1084 = vmatpush1.bf16.msra.mxu0 %v2200_v13  ;;  %v2466_v11 = vld [vmem:[%s3250_s7 + $0x20] sm:$0xff]  }
 0x17b   : > { %1042 = vmatprep.subr.bf16.mxu1 %v2191_v15  ;;  %1085 = vmatprep.subr.bf16.mxu0 %v2193_v16  ;;  %v2467_v13 = vld [vmem:[%s3250_s7 + $0xa0] sm:$0xff]   ;;  %v2468_v15 = vld [vmem:[%s3250_s7 + $0x58] sm:$0xff]  }
 0x17c   : > { %v2469_v16 = vld [vmem:[%s3250_s7 + $0xd8] sm:$0xff]   ;;  %v2481_v25 = vld [vmem:[%s3250_s7 + $0xc0] sm:$0xff]  }
 0x17e   : > { %1043 = vmatpush1.bf16.msra.mxu1 %v2190_v18  ;;  %1086 = vmatpush1.bf16.msra.mxu0 %v2192_v20  ;;  %v2474_v18 = vld [vmem:[%s3250_s7 + $0x10] sm:$0xff]  }
 0x17f   : > { %1044 = vmatprep.subr.bf16.mxu1 %v2183_v21  ;;  %1087 = vmatprep.subr.bf16.mxu0 %v2185_v22  ;;  %v2475_v20 = vld [vmem:[%s3250_s7 + $0x90] sm:$0xff]   ;;  %v2476_v21 = vld [vmem:[%s3250_s7 + $0x48] sm:$0xff]  }
 0x180   : > { %v2477_v22 = vld [vmem:[%s3250_s7 + $0xc8] sm:$0xff]  }
 0x182   : > { %1045 = vmatpush1.bf16.msra.mxu1 %v2182_v26  ;;  %1088 = vmatpush1.bf16.msra.mxu0 %v2184_v27  ;;  %v2482_v26 = vld [vmem:[%s3250_s7] sm:$0xff]  }
 0x183   : > { %1046 = vmatprep.subr.bf16.mxu1 %v2175_v28  ;;  %1089 = vmatprep.subr.bf16.mxu0 %v2177_v29  ;;  %v2483_v27 = vld [vmem:[%s3250_s7 + $0x80] sm:$0xff]   ;;  %v2484_v28 = vld [vmem:[%s3250_s7 + $0x178] sm:$0xff]  }
 0x184   : > { %v2485_v29 = vld [vmem:[%s3250_s7 + $0x1f8] sm:$0xff]  }
 0x186   : > { %1047 = vmatpush1.bf16.msra.mxu1 %v2174_v34  ;;  %1090 = vmatpush1.bf16.msra.mxu0 %v2176_v35 }
 0x187   : > { %1048 = vmatprep.subr.bf16.mxu1 %v2167_v36  ;;  %1091 = vmatprep.subr.bf16.mxu0 %v2169_v37  ;;  %v606_v36 = vsub.s32 3, %v2779_v39  ;;  %v590_v37 = vld [vmem:[%s3249_s6] sm:$0xff] }
 0x188   : > { %v599_v43 = vrot.slane %v590_v37, %v2785_v40 }
 0x189   : > { %v607_v44 = vrot.slane %v590_v37, %v606_v36 }
 0x18a   : > { %1049 = vmatpush1.bf16.msra.mxu1 %v2166_v46  ;;  %1092 = vmatpush1.bf16.msra.mxu0 %v2168_v47  ;;  %v595_v46 = vrot.slane %v590_v37, %v2788_v41  ;;  %v603_v47 = vrot.slane %v590_v37, %v2791_v45 }
 0x18b   : > { %1050 = vmatprep.subr.bf16.mxu1 %v2159_v48  ;;  %1093 = vmatprep.subr.bf16.mxu0 %v2161_v49 }
 0x18e   : > { %1051 = vmatpush1.bf16.msra.mxu1 %v2158_v54  ;;  %1094 = vmatpush1.bf16.msra.mxu0 %v2160_v55 }
 0x18f   : > { %1052 = vmatprep.subr.bf16.mxu1 %v2151_v56  ;;  %1095 = vmatprep.subr.bf16.mxu0 %v2153_v57 }
 0x192   : > { %1053 = vmatpush1.bf16.msra.mxu1 %v2150_v58  ;;  %1096 = vmatpush1.bf16.msra.mxu0 %v2152_v59 }
 0x193   : > { %2283 = vmatprep.subr.bf16.mxu1 %v2452_v60  ;;  %2305 = vmatprep.subr.bf16.mxu0 %v2453_v61 }
 0x195   : > { %1071 = vmatmul.mubr.bf16.vlgmr.msra.gmra.mxu1 %v2884_v4  ;;  %1114 = vmatmul.mubr.bf16.vlgmr.msra.gmra.mxu0 %v2884_v4  ;;  %v2459_v4 = vld [vmem:[%s3250_s7 + $0xb0] sm:$0xff]  }
 0x196   : > { %2284 = vmatpush3.bf16.msra.mxu1 %v2454_v62  ;;  %2306 = vmatpush3.bf16.msra.mxu0 %v2455_v63 }
 0x197   : > { %2285 = vmatprep.subr.bf16.mxu1 %v2456_v0  ;;  %2307 = vmatprep.subr.bf16.mxu0 %v2457_v2 }
 0x19a   : > { %2286 = vmatpush3.bf16.msra.mxu1 %v2458_v3  ;;  %2308 = vmatpush3.bf16.msra.mxu0 %v2459_v4  ;;  %v610_v3 = vsub.s32 4, %v2779_v39  ;;  %v618_v4 = vsub.s32 6, %v2779_v39 }
 0x19b   : > { %2287 = vmatprep.subr.bf16.mxu1 %v2460_v5  ;;  %2309 = vmatprep.subr.bf16.mxu0 %v2461_v6 }
 0x19e   : > { %2288 = vmatpush3.bf16.msra.mxu1 %v2462_v7  ;;  %2310 = vmatpush3.bf16.msra.mxu0 %v2463_v8  ;;  %v614_v7 = vsub.s32 5, %v2779_v39  ;;  %v622_v8 = vsub.s32 7, %v2779_v39 }
 0x19f   : > { %2289 = vmatprep.subr.bf16.mxu1 %v2464_v9  ;;  %2311 = vmatprep.subr.bf16.mxu0 %v2465_v10 }
 0x1a2   : > { %2290 = vmatpush3.bf16.msra.mxu1 %v2466_v11  ;;  %2312 = vmatpush3.bf16.msra.mxu0 %v2467_v13 }
 0x1a3   : > { %2291 = vmatprep.subr.bf16.mxu1 %v2468_v15  ;;  %2313 = vmatprep.subr.bf16.mxu0 %v2469_v16  ;;  %v611_v15 = vrot.slane %v590_v37, %v610_v3  ;;  %v619_v16 = vrot.slane %v590_v37, %v618_v4 }
 0x1a6   : > { %2292 = vmatpush3.bf16.msra.mxu1 %v2470_v17  ;;  %2314 = vmatpush3.bf16.msra.mxu0 %v2471_v19 }
 0x1a7   : > { %2293 = vmatprep.subr.bf16.mxu1 %v2472_v12  ;;  %2315 = vmatprep.subr.bf16.mxu0 %v2473_v14  ;;  %v615_v12 = vrot.slane %v590_v37, %v614_v7 }
 0x1aa   : > { %2294 = vmatpush3.bf16.msra.mxu1 %v2474_v18  ;;  %2316 = vmatpush3.bf16.msra.mxu0 %v2475_v20  ;;  %v623_v18 = vrot.slane %v590_v37, %v622_v8 }
 0x1ab   : > { %2295 = vmatprep.subr.bf16.mxu1 %v2476_v21  ;;  %2317 = vmatprep.subr.bf16.mxu0 %v2477_v22 }
 0x1ae   : > { %2296 = vmatpush3.bf16.msra.mxu1 %v2478_v23  ;;  %2318 = vmatpush3.bf16.msra.mxu0 %v2479_v24 }
 0x1af   : > { %2297 = vmatprep.subr.bf16.mxu1 %v2480_v1  ;;  %2319 = vmatprep.subr.bf16.mxu0 %v2481_v25 }
 0x1b2   : > { %2298 = vmatpush3.bf16.msra.mxu1 %v2482_v26  ;;  %2320 = vmatpush3.bf16.msra.mxu0 %v2483_v27 }
 0x1b3   : > { %2327 = vmatprep.subr.bf16.mxu1 %v2484_v28  ;;  %2349 = vmatprep.subr.bf16.mxu0 %v2485_v29 }
 0x235   : > { %v986_v30 = vpop.f32.mrf.mxu1  ;;  %v1029_v31 = vpop.f32.mrf.mxu0 }
 0x236   : > { %v987_v54 = vadd.f32 %v986_v30, %v595_v46  ;;  %v1030_v55 = vadd.f32 %v1029_v31, %v603_v47 }
 0x237   : > { %v988_v32 = vpop.f32.mrf.mxu1  ;;  %v1031_v33 = vpop.f32.mrf.mxu0 }
 0x238   : > { %v989_v50 = vadd.f32 %v988_v32, %v599_v43  ;;  %v1032_v51 = vadd.f32 %v1031_v33, %v607_v44 }
 0x239   : > { %v990_v34 = vpop.f32.mrf.mxu1  ;;  %v1033_v35 = vpop.f32.mrf.mxu0 }
 0x23a   : > { %v991_v52 = vadd.f32 %v990_v34, %v595_v46  ;;  %v1034_v53 = vadd.f32 %v1033_v35, %v603_v47 }
 0x23b   : > { %v992_v38 = vpop.f32.mrf.mxu1  ;;  %v1035_v42 = vpop.f32.mrf.mxu0 }
 0x23c   : > { %v993_v48 = vadd.f32 %v992_v38, %v599_v43  ;;  %v1036_v49 = vadd.f32 %v1035_v42, %v607_v44  ;;  %v1124_v58 = vmax.f32 %v987_v54, %v991_v52  ;;  %v1138_v59 = vmax.f32 %v1030_v55, %v1034_v53 }
 0x23d   : > { %v2599_v43 = vmov 1966171168  }
 0x23e   : > { %v1131_v56 = vmax.f32 %v989_v50, %v993_v48  ;;  %v1145_v57 = vmax.f32 %v1032_v51, %v1036_v49  ;;  %v1125_v62 = vrot.slane %v1124_v58, 4  ;;  %v1139_v63 = vrot.slane %v1138_v59, 4 }
 0x23f   : > { %v1197_v44 = vunpack.c.l.s4 %v2599_v43 }
 0x240   : > { %v1132_v60 = vrot.slane %v1131_v56, 4  ;;  %v1146_v61 = vrot.slane %v1145_v57, 4  ;;  %v1126_v5 = vmax.f32 %v1124_v58, %v1125_v62  ;;  %v1140_v6 = vmax.f32 %v1138_v59, %v1139_v63 }
 0x241   : > { %v1198_v58 = vunpack.c.0.s8 %v1197_v44 }
 0x242   : > { %v1133_v0 = vmax.f32 %v1131_v56, %v1132_v60  ;;  %v1147_v2 = vmax.f32 %v1145_v57, %v1146_v61  ;;  %v1127_v17 = vrot.slane %v1126_v5, 2  ;;  %v1141_v19 = vrot.slane %v1140_v6, 2 }
 0x244   : > { %v1134_v9 = vrot.slane %v1133_v0, 2  ;;  %v1148_v10 = vrot.slane %v1147_v2, 2  ;;  %v1128_v28 = vmax.f32 %v1126_v5, %v1127_v17  ;;  %v1142_v29 = vmax.f32 %v1140_v6, %v1141_v19 }
 0x246   : > { %v1135_v21 = vmax.f32 %v1133_v0, %v1134_v9  ;;  %v1149_v22 = vmax.f32 %v1147_v2, %v1148_v10  ;;  %v1129_v51 = vrot.slane %v1128_v28, 1  ;;  %v1143_v52 = vrot.slane %v1142_v29, 1 }
 0x248   : > { %v1136_v37 = vrot.slane %v1135_v21, 1  ;;  %v1150_v46 = vrot.slane %v1149_v22, 1  ;;  %v1130_v0 = vmax.f32 %v1128_v28, %v1129_v51  ;;  %v1144_v2 = vmax.f32 %v1142_v29, %v1143_v52  ;;  %v2492_v51 = vld [vmem:[%s3250_s7 + $0x168] sm:$0xff]  }
 0x249   : > { %v2493_v52 = vld [vmem:[%s3250_s7 + $0x1e8] sm:$0xff]  }
 0x24a   : > { %v1137_v57 = vmax.f32 %v1135_v21, %v1136_v37  ;;  %v1151_v59 = vmax.f32 %v1149_v22, %v1150_v46 }
 0x255   : > { %v1072_v11 = vpop.f32.mrf.mxu1  ;;  %v1115_v13 = vpop.f32.mrf.mxu0 }
 0x256   : > { %v1073_v1 = vadd.f32 %v1072_v11, %v611_v15  ;;  %v1116_v25 = vadd.f32 %v1115_v13, %v619_v16  ;;  %v1192_v11 = vcombine.low %v1130_v0, %v1137_v57  ;;  %v1201_v13 = vsub.s32 %v1198_v58, %v2779_v39  ;;  %v2498_v57 = vld [vmem:[%s3250_s7 + $0x120] sm:$0xff]   ;;  %v2505_v0 = vld [vmem:[%s3250_s7 + $0x1d0] sm:$0xff]  }
 0x257   : > { %v1074_v14 = vpop.f32.mrf.mxu1  ;;  %v1117_v20 = vpop.f32.mrf.mxu0  ;;  %v2499_v58 = vld [vmem:[%s3250_s7 + $0x1a0] sm:$0xff]  }
 0x258   : > { %v1075_v30 = vadd.f32 %v1074_v14, %v615_v12  ;;  %v1118_v31 = vadd.f32 %v1117_v20, %v623_v18  ;;  %v1202_v20 = vrot.slane %v1192_v11, %v1201_v13  ;;  %v2511_v11 = vld [vmem:[%s3250_s7 + $0x188] sm:$0xff]   ;;  %v1489_v39 = vld [vmem:[%s3251_s8] sm:$0x1] }
 0x259   : > { %v1076_v23 = vpop.f32.mrf.mxu1  ;;  %v1119_v24 = vpop.f32.mrf.mxu0 }
 0x25a   : > { %v1077_v26 = vadd.f32 %v1076_v23, %v611_v15  ;;  %v1120_v27 = vadd.f32 %v1119_v24, %v619_v16  ;;  %v1193_v15 = vcombine.low %v1144_v2, %v1151_v59  ;;  %v2500_v59 = vld [vmem:[%s3250_s7 + $0x158] sm:$0xff]   ;;  %v2506_v2 = vld [vmem:[%s3250_s7 + $0x110] sm:$0xff]  }
 0x25b   : > { %v1078_v32 = vpop.f32.mrf.mxu1  ;;  %v1121_v33 = vpop.f32.mrf.mxu0 }
 0x25c   : > { %v1152_v34 = vmax.f32 %v1073_v1, %v1077_v26  ;;  %v1166_v35 = vmax.f32 %v1116_v25, %v1120_v27  ;;  %v1079_v38 = vadd.f32 %v1078_v32, %v615_v12  ;;  %v1122_v42 = vadd.f32 %v1121_v33, %v623_v18 }
 0x25d   : > { %v1209_v21 = vrot.slane %v1193_v15, %v1201_v13  ;;  %v2513_v15 = vld [vmem:[%s3250_s7 + $0x1c0] sm:$0xff]  }
 0x25e   : > { %v1153_v47 = vrot.slane %v1152_v34, 4  ;;  %v1167_v48 = vrot.slane %v1166_v35, 4  ;;  %v1159_v49 = vmax.f32 %v1075_v30, %v1079_v38  ;;  %v1173_v50 = vmax.f32 %v1118_v31, %v1122_v42 }
 0x25f   : > { %v1224_v27 = vcombine.low %v1202_v20, %v1209_v21 }
 0x260   : > { %v1154_v53 = vmax.f32 %v1152_v34, %v1153_v47  ;;  %v1168_v54 = vmax.f32 %v1166_v35, %v1167_v48  ;;  %v1160_v55 = vrot.slane %v1159_v49, 4  ;;  %v1174_v56 = vrot.slane %v1173_v50, 4 }
 0x261   : > { %v1232_v31 = vrot.slane %v1224_v27, %v1201_v13 }
 0x262   : > { %v1155_v60 = vrot.slane %v1154_v53, 2  ;;  %v1169_v61 = vrot.slane %v1168_v54, 2  ;;  %v1161_v62 = vmax.f32 %v1159_v49, %v1160_v55  ;;  %v1175_v63 = vmax.f32 %v1173_v50, %v1174_v56  ;;  %v2490_v49 = vld [vmem:[%s3250_s7 + $0x130] sm:$0xff]   ;;  %v2496_v55 = vld [vmem:[%s3250_s7 + $0x160] sm:$0xff]  }
 0x263   : > { %v2491_v50 = vld [vmem:[%s3250_s7 + $0x1b0] sm:$0xff]   ;;  %v2497_v56 = vld [vmem:[%s3250_s7 + $0x1e0] sm:$0xff]  }
 0x264   : > { %v1156_v5 = vmax.f32 %v1154_v53, %v1155_v60  ;;  %v1170_v6 = vmax.f32 %v1168_v54, %v1169_v61  ;;  %v1162_v9 = vrot.slane %v1161_v62, 2  ;;  %v1176_v10 = vrot.slane %v1175_v63, 2  ;;  %v2494_v53 = vld [vmem:[%s3250_s7 + $0x128] sm:$0xff]   ;;  %v2501_v60 = vld [vmem:[%s3250_s7 + $0x1d8] sm:$0xff]  }
 0x265   : > { %v2495_v54 = vld [vmem:[%s3250_s7 + $0x1a8] sm:$0xff]   ;;  %v2502_v61 = vld [vmem:[%s3250_s7 + $0x118] sm:$0xff]  }
 0x266   : > { %v1157_v16 = vrot.slane %v1156_v5, 1  ;;  %v1171_v17 = vrot.slane %v1170_v6, 1  ;;  %v1163_v19 = vmax.f32 %v1161_v62, %v1162_v9  ;;  %v1177_v12 = vmax.f32 %v1175_v63, %v1176_v10  ;;  %v2503_v62 = vld [vmem:[%s3250_s7 + $0x198] sm:$0xff]   ;;  %v2504_v63 = vld [vmem:[%s3250_s7 + $0x150] sm:$0xff]   ;;  %v2509_v9 = vld [vmem:[%s3250_s7 + $0x1c8] sm:$0xff]  }
 0x267   : > { %v2510_v10 = vld [vmem:[%s3250_s7 + $0x108] sm:$0xff]  }
 0x268   : > { %v1164_v14 = vrot.slane %v1163_v19, 1  ;;  %v1178_v18 = vrot.slane %v1177_v12, 1  ;;  %v1158_v22 = vmax.f32 %v1156_v5, %v1157_v16  ;;  %v1172_v23 = vmax.f32 %v1170_v6, %v1171_v17  ;;  %v2507_v5 = vld [vmem:[%s3250_s7 + $0x190] sm:$0xff]   ;;  %v2508_v6 = vld [vmem:[%s3250_s7 + $0x148] sm:$0xff]   ;;  %v2514_v16 = vld [vmem:[%s3250_s7 + $0x100] sm:$0xff]  }
 0x269   : > { %v2515_v17 = vld [vmem:[%s3250_s7 + $0x180] sm:$0xff]  }
 0x26a   : > { %v1165_v24 = vmax.f32 %v1163_v19, %v1164_v14  ;;  %v1179_v1 = vmax.f32 %v1177_v12, %v1178_v18 }
 0x26c   : > { %v1194_v25 = vcombine.low %v1158_v22, %v1165_v24  ;;  %v1195_v26 = vcombine.low %v1172_v23, %v1179_v1 }
 0x26e   : > { %v1216_v28 = vrot.slane %v1194_v25, %v1201_v13  ;;  %v1223_v29 = vrot.slane %v1195_v26, %v1201_v13 }
 0x270   : > { %v1225_v30 = vcombine.low %v1216_v28, %v1223_v29 }
 0x272   : > { %v1239_v32 = vrot.slane %v1225_v30, %v1201_v13  ;;  %v2512_v13 = vld [vmem:[%s3250_s7 + $0x140] sm:$0xff]  }
 0x274   : > { %v3088_v33 = vcombine.low %v1232_v31, %v1239_v32 }
 0x276   : > { %v1320_v34 = vrot.slane %v3088_v33, %v2785_v40  ;;  %v1328_v35 = vrot.slane %v3088_v33, %v606_v36  ;;  %v1316_v38 = vrot.slane %v3088_v33, %v2788_v41  ;;  %v1324_v42 = vrot.slane %v3088_v33, %v2791_v45  ;;  %v2486_v36 = vld [vmem:[%s3250_s7 + $0x138] sm:$0xff]   ;;  %v2488_v45 = vld [vmem:[%s3250_s7 + $0x170] sm:$0xff]  }
 0x277   : > { %v1336_v37 = vrot.slane %v3088_v33, %v614_v7  ;;  %v1344_v43 = vrot.slane %v3088_v33, %v622_v8  ;;  %v2487_v41 = vld [vmem:[%s3250_s7 + $0x1b8] sm:$0xff]   ;;  %v2489_v7 = vld [vmem:[%s3250_s7 + $0x1f0] sm:$0xff]   ;;  %v1332_v19 = vrot.slane %v3088_v33, %v610_v3  ;;  %v1340_v12 = vrot.slane %v3088_v33, %v618_v4 }
 0x278   : > { %v1354_v44 = vpack.c.bf16 %v1320_v34, %v1320_v34  ;;  %v1356_v40 = vpack.c.bf16 %v1328_v35, %v1328_v35  ;;  %v1353_v46 = vpack.c.bf16 %v1316_v38, %v1316_v38  ;;  %v1355_v47 = vpack.c.bf16 %v1324_v42, %v1324_v42 }
 0x279   : > { %v1358_v8 = vpack.c.bf16 %v1336_v37, %v1336_v37  ;;  %v1360_v48 = vpack.c.bf16 %v1344_v43, %v1344_v43  ;;  %v1357_v14 = vpack.c.bf16 %v1332_v19, %v1332_v19  ;;  %v1359_v18 = vpack.c.bf16 %v1340_v12, %v1340_v12 }
 0x27a   : > { %1906 = vmatprep.mubr.bf16.mxu1 %v1354_v44  ;;  %1946 = vmatprep.mubr.bf16.mxu0 %v1356_v40 }
 0x27b   : > { %1907 = vmatmul.mubr.bf16.vlgmr.msra.gmra.mxu1 %v1353_v46  ;;  %1947 = vmatmul.mubr.bf16.vlgmr.msra.gmra.mxu0 %v1355_v47 }
 0x27c   : > { %2328 = vmatpush3.bf16.msra.mxu1 %v2486_v36  ;;  %2350 = vmatpush3.bf16.msra.mxu0 %v2487_v41 }
 0x27d   : > { %1986 = vmatprep.mubr.bf16.mxu1 %v1358_v8  ;;  %2026 = vmatprep.mubr.bf16.mxu0 %v1360_v48 }
 0x27e   : > { %2329 = vmatprep.subr.bf16.mxu1 %v2488_v45  ;;  %2351 = vmatprep.subr.bf16.mxu0 %v2489_v7 }
 0x280   : > { %2330 = vmatpush3.bf16.msra.mxu1 %v2490_v49  ;;  %2352 = vmatpush3.bf16.msra.mxu0 %v2491_v50 }
 0x281   : > { %2331 = vmatprep.subr.bf16.mxu1 %v2492_v51  ;;  %2353 = vmatprep.subr.bf16.mxu0 %v2493_v52 }
 0x284   : > { %2332 = vmatpush3.bf16.msra.mxu1 %v2494_v53  ;;  %2354 = vmatpush3.bf16.msra.mxu0 %v2495_v54 }
 0x285   : > { %2333 = vmatprep.subr.bf16.mxu1 %v2496_v55  ;;  %2355 = vmatprep.subr.bf16.mxu0 %v2497_v56 }
 0x288   : > { %2334 = vmatpush3.bf16.msra.mxu1 %v2498_v57  ;;  %2356 = vmatpush3.bf16.msra.mxu0 %v2499_v58 }
 0x289   : > { %2335 = vmatprep.subr.bf16.mxu1 %v2500_v59  ;;  %2357 = vmatprep.subr.bf16.mxu0 %v2501_v60 }
 0x28c   : > { %2336 = vmatpush3.bf16.msra.mxu1 %v2502_v61  ;;  %2358 = vmatpush3.bf16.msra.mxu0 %v2503_v62 }
 0x28d   : > { %2337 = vmatprep.subr.bf16.mxu1 %v2504_v63  ;;  %2359 = vmatprep.subr.bf16.mxu0 %v2505_v0 }
 0x290   : > { %2338 = vmatpush3.bf16.msra.mxu1 %v2506_v2  ;;  %2360 = vmatpush3.bf16.msra.mxu0 %v2507_v5 }
 0x291   : > { %2339 = vmatprep.subr.bf16.mxu1 %v2508_v6  ;;  %2361 = vmatprep.subr.bf16.mxu0 %v2509_v9 }
 0x294   : > { %2340 = vmatpush3.bf16.msra.mxu1 %v2510_v10  ;;  %2362 = vmatpush3.bf16.msra.mxu0 %v2511_v11 }
 0x295   : > { %2341 = vmatprep.subr.bf16.mxu1 %v2512_v13  ;;  %2363 = vmatprep.subr.bf16.mxu0 %v2513_v15 }
 0x298   : > { %2342 = vmatpush3.bf16.msra.mxu1 %v2514_v16  ;;  %2364 = vmatpush3.bf16.msra.mxu0 %v2515_v17 }
 0x29b   : > { %1987 = vmatmul.mubr.bf16.vlgmr.msra.gmra.mxu1 %v1357_v14  ;;  %2027 = vmatmul.mubr.bf16.vlgmr.msra.gmra.mxu0 %v1359_v18 }
 0x33b   : > { %v2299_v20 = vpop.f32.mrf.mxu1  ;;  %v2321_v21 = vpop.f32.mrf.mxu0 }
 0x33d   : > { %v2300_v22 = vpop.f32.mrf.mxu1  ;;  %v2322_v23 = vpop.f32.mrf.mxu0 }
 0x33e   : > { %v2301_v3 = vadd.f32 %v2300_v22, %v2299_v20  ;;  %v2323_v29 = vadd.f32 %v2322_v23, %v2321_v21 }
 0x33f   : > { %v2302_v24 = vpop.f32.mrf.mxu1  ;;  %v2324_v1 = vpop.f32.mrf.mxu0 }
 0x340   : > { %v1909_v4 = vadd.f32 %v2301_v3, %v1489_v39 }
 0x341   : > { %v2303_v25 = vpop.f32.mrf.mxu1  ;;  %v2325_v26 = vpop.f32.mrf.mxu0 }
 0x342   : > { %v1949_v32 = vadd.f32 %v2323_v29, %v1909_v4 }
 0x35b   : > { %v2343_v27 = vpop.f32.mrf.mxu1  ;;  %v2365_v28 = vpop.f32.mrf.mxu0 }
 0x35d   : > { %v2344_v30 = vpop.f32.mrf.mxu1  ;;  %v2366_v31 = vpop.f32.mrf.mxu0 }
 0x35e   : > { %v2345_v33 = vadd.f32 %v2344_v30, %v2343_v27  ;;  %v2367_v42 = vadd.f32 %v2366_v31, %v2365_v28 }
 0x35f   : > { %v2346_v34 = vpop.f32.mrf.mxu1  ;;  %v2368_v35 = vpop.f32.mrf.mxu0 }
 0x360   : > { %v1989_v38 = vadd.f32 %v2345_v33, %v1949_v32 }
 0x361   : > { %v2347_v37 = vpop.f32.mrf.mxu1  ;;  %v2369_v43 = vpop.f32.mrf.mxu0 }
 0x362   : > { %v2029_v44 = vadd.f32 %v2367_v42, %v1989_v38 }
 0x364   : > { %v2034_v40 = vmax.f32 %v2029_v44, 0.0 }
 0x366   : > { %2036 = vst.msk [vmem:[%s360_s24] sm:$0x1] %vm2035_vm2, %v2034_v40 }
 0x367   : > { %2529 = shalt.err (!%p2526_p5)
}
 0x368   : > { %s2530_s0 = scalar_lea.hbm %s2048_s23, 16  ;;  %s2534_s24 = scalar_lea.hbm %s3252_s9, 32 }
 0x369   : > { %p2531_p6 = scmp.ne.s32.totalorder %s2048_s23, %s2530_s0  ;;  %p2535_p10 = scmp.lt.s32.totalorder %s2048_s23, %s3252_s9 }
 0x36a   : > { %p2536_p11 = scmp.lt.s32.totalorder %s2534_s24, %s2530_s0 }
 0x36b   : > { %p2532_p7 = pnand %p2531_p6, %p2691_p4 }
 0x36c   : > { %p2537_p12 = por %p2536_p11, %p2535_p10 }
 0x36d   : > { %p2533_p9 = pneg %p2532_p7 }
 0x36f   : > { %p2538_p13 = pnand %p2537_p12, %p2533_p9 }
 0x371   : > { %2541 = shalt.err (!%p2538_p13)
}
 0x372   : > { %2383 = dma.vmem_to_hbm [thread:$0]  (%p2691_p4), %s2051_s25, 16, %s2048_s23, %s2038_s28  }
 0x373 PF: > { %p2389_p0 = scmp.ge.s32.totalorder %s2592_s14, 2  ;;  %s2062_s29 = sand.u32 1, %s2572_s30  }
 0x374   : > { %s2063_s15 = scalar_lea.sflag [#allocation4], %s2062_s29 }
 0x375   : > { %p2386_p1 = pnand %p2389_p0, %p2698_p8 }
 0x377   : > { %p2387_p2 = pneg %p2386_p1 }
 0x379   : > { %2567 = dma.done.wait (%p2387_p2), %s2063_s15, 16  }
 0x37a   : > { %2569 = vsyncadd (%p2387_p2), %s2063_s15, 4294967280  ;;  %s22_s14 = sadd.s32 1, %s2592_s14   ;;  %s3257_s30 = smov %s2576_s10 }
 0x37b   : > { %p19_p3 = scmp.ge.s32.totalorder %s22_s14, 4   ;;  %s3258_s10 = smov %s2580_s11 }
 0x37c   : > { %s3259_s11 = smov %s2704_s22  ;;  %s3260_s12 = smov %s2588_s13 }
 0x37d   : > { %s3261_s13 = smov %s3263_s17  ;;  %21 = sbr.rel (!%p19_p3) target bundleno = 6 (0x6), region = 106 }
 0x382   :  { %2067 = vsyncpa [#allocation4], 1 }
 0x383   :  { %2069 = vsyncpa [#allocation4 + $0x1], 1 }

// kernel: pointnetfeat.2
= control target key start
LH: loop header
LB: loop body
LE: loop exit
PB: predicated region body
PF: predicated region fallthrough
CT: control target
= control target key end

     0   :  { %s5165_s25 = smov 0   ;;  %s5167_s26 = smov 0   ;;  %s6569_s0 = inlined_call_operand.vmem [shape: f32[2,16,3], index: 0, kind: input, shape index: {}]   ;;  %s6570_s1 = inlined_call_operand.vmem [shape: f32[1,3,64], index: 1, kind: input, shape index: {}]   ;;  %s6571_s2 = inlined_call_operand.vmem [shape: f32[1,64], index: 2, kind: input, shape index: {}]   ;;  %s6572_s3 = inlined_call_operand.vmem [shape: bf16[64,128], index: 3, kind: input, shape index: {}]   ;;  %s6573_s4 = inlined_call_operand.vmem [shape: f32[1,128], index: 4, kind: input, shape index: {}]   ;;  %s6574_s5 = inlined_call_operand.vmem [shape: bf16[128,1024], index: 5, kind: input, shape index: {}]   ;;  %s6575_s6 = inlined_call_operand.vmem [shape: f32[1,1024], index: 6, kind: input, shape index: {}]   ;;  %s6576_s7 = inlined_call_operand.vmem [shape: bf16[1024,512], index: 7, kind: input, shape index: {}]   ;;  %s6577_s8 = inlined_call_operand.vmem [shape: f32[1,512], index: 8, kind: input, shape index: {}]   ;;  %s6578_s9 = inlined_call_operand.vmem [shape: bf16[512,256], index: 9, kind: input, shape index: {}]   ;;  %s6579_s10 = inlined_call_operand.vmem [shape: f32[1,256], index: 10, kind: input, shape index: {}]   ;;  %s6580_s11 = inlined_call_operand.vmem [shape: bf16[256,9], index: 11, kind: input, shape index: {}]   ;;  %s6581_s12 = inlined_call_operand.vmem [shape: f32[1,9], index: 12, kind: input, shape index: {}]   ;;  %s6582_s13 = inlined_call_operand.vmem [shape: f32[2,1,9], index: 13, kind: output, shape index: {}]  }
   0x1   :  { %s5169_s27 = smov 0  }
   0x2 LB: > { %s35_s28 = sadd.s32 1, %s5083_s26  ;;  %p4079_p0 = scmp.ge.s32.totalorder %s5087_s27, 1  ;;  %s5087_s27 = sphi %s5169_s27, %s23_s27   ;;  %s5083_s26 = sphi %s5167_s26, %s6584_s26   ;;  %s5079_s25 = sphi %s5165_s25, %s6583_s25  }
   0x3   : > { %p37_p1 = scmp.ge.s32.totalorder %s35_s28, 2  ;;  %p406_p2 = scmp.lt.s32.totalorder %s5087_s27, 3 }
   0x5   : > { %s6586_s28 = smov (%p37_p1, %s35_s28), 0  ;;  %p407_p3 = pnand %p4079_p0, %p406_p2 }
   0x6   : > { %p453_p4 = scmp.lt.s32.totalorder (!%p407_p3), %s5079_s25, 1 }
   0x7   : > { %410 = sbr.rel (%p407_p3) target bundleno = 1424 (0x590), region = 72 }
   0xc   : > { %v5089_v0 = vmov 1   ;;  %v5090_v1 = vmov 0   ;;  %s6588_s25 = smov (!%p453_p4, %s5079_s25), 1  ;;  %v4565_v2 = vld [vmem:[%s6572_s3 + $0x18] sm:$0xff]   ;;  %v5091_v5 = vmov 0.0   ;;  %v4566_v6 = vld [vmem:[%s6572_s3 + $0x10] sm:$0xff]   ;;  %v479_v38 = vlaneseq }
   0xd   : > { %4562 = vset.pattern.permute.xlu1 %v5089_v0  ;;  %4561 = vset.pattern.permute.xlu0 %v5090_v1  ;;  %s4491_s29 = sshll.u32 %s6588_s25, 4  ;;  %v4567_v7 = vld [vmem:[%s6572_s3 + $0x8] sm:$0xff]   ;;  %v5092_v8 = vmov 2   ;;  %v4568_v9 = vld [vmem:[%s6572_s3] sm:$0xff]   ;;  %vm5093_vm0 = vmmov 0   ;;  %vm568_vm1 = vcmask 523264   ;;  %s464_s21 = scalar_lea.vmem %s6582_s13, %s6588_s25 }
   0xe   : > { %1074 = vmatprep.mubr.bf16.mxu1 %v5090_v1  ;;  %s460_s15 = scalar_lea.vmem %s6569_s0, %s4491_s29  ;;  %4519 = vmatprep.subr.bf16.mxu0 %v5091_v5  ;;  %v672_v10 = vld [vmem:[%s6574_s5 + $0x1c0] sm:$0xff]  ;;  %v5212_v12 = vld [vmem:[%s6574_s5 + $0x1c8] sm:$0xff]  ;;  %v5253_v39 = vshrl.u32 %v479_v38, 7  ;;  %vm4012_vm2 = vcmask 65536  }
   0xf   : > { %v466_v3 = vld [vmem:[%s460_s15] sm:$0xff]  ;;  %v467_v4 = vld [vmem:[%s460_s15 + $0x8] sm:$0xff]  ;;  %4520 = vmatpush3.bf16.msra.mxu0 %v4565_v2  ;;  %4527 = vmatprep.mubr.msk.bf16.mxu0 %vm5093_vm0, %v5091_v5 }
  0x10   : > { %486 = vperm.xlu1 %4562, %v466_v3   ;;  %471 = vperm.xlu0 %4561, %v466_v3   ;;  %v676_v11 = vld [vmem:[%s6574_s5 + $0x1e0] sm:$0xff]  ;;  %v5217_v14 = vld [vmem:[%s6574_s5 + $0x1e8] sm:$0xff]  ;;  %v5256_v40 = vsub.s32 1, %v5253_v39  ;;  %v5259_v41 = vsub.s32 0, %v5253_v39  ;;  %v5262_v42 = vsub.s32 2, %v5253_v39 }
  0x11   : > { %4521 = vmatprep.subr.bf16.mxu0 %v5091_v5  ;;  %v4146_v13 = vcombine.high %v672_v10, %v676_v11  ;;  %v4145_v15 = vcombine.low %v672_v10, %v676_v11  ;;  %v664_v16 = vld [vmem:[%s6574_s5 + $0x180] sm:$0xff]  ;;  %v4147_v18 = vcombine.low %v5212_v12, %v5217_v14  ;;  %v4148_v19 = vcombine.high %v5212_v12, %v5217_v14  ;;  %v661_v10 = vld [vmem:[%s6574_s5 + $0x168] sm:$0xff] }
  0x12   : > { %v668_v17 = vld [vmem:[%s6574_s5 + $0x1a0] sm:$0xff]  ;;  %v641_v12 = vld [vmem:[%s6574_s5 + $0xc8] sm:$0xff] }
  0x13   : > { %4522 = vmatpush3.bf16.msra.mxu0 %v4566_v6  ;;  %v4138_v20 = vcombine.high %v664_v16, %v668_v17  ;;  %1042 = vmatprep.subr.bf16.mxu1 %v4146_v13  ;;  %v4137_v21 = vcombine.low %v664_v16, %v668_v17  ;;  %v656_v22 = vld [vmem:[%s6574_s5 + $0x140] sm:$0xff]  ;;  %v653_v16 = vld [vmem:[%s6574_s5 + $0x128] sm:$0xff] }
  0x14   : > { %490 = vperm.xlu1 %4562, %v467_v4   ;;  %476 = vperm.xlu0 %4561, %v467_v4   ;;  %v660_v23 = vld [vmem:[%s6574_s5 + $0x160] sm:$0xff]  ;;  %v645_v14 = vld [vmem:[%s6574_s5 + $0xe8] sm:$0xff] }
  0x15   : > { %4523 = vmatprep.subr.bf16.mxu0 %v5091_v5  ;;  %1043 = vmatpush1.bf16.msra.mxu1 %v4145_v15  ;;  %v4130_v24 = vcombine.high %v656_v22, %v660_v23  ;;  %v4129_v25 = vcombine.low %v656_v22, %v660_v23  ;;  %v648_v26 = vld [vmem:[%s6574_s5 + $0x100] sm:$0xff]  ;;  %v649_v15 = vld [vmem:[%s6574_s5 + $0x108] sm:$0xff]  ;;  %v4115_v23 = vcombine.low %v641_v12, %v645_v14 }
  0x16   : > { %1044 = vmatprep.subr.bf16.mxu1 %v4138_v20  ;;  %v652_v27 = vld [vmem:[%s6574_s5 + $0x120] sm:$0xff]  ;;  %v4116_v20 = vcombine.high %v641_v12, %v645_v14  ;;  %v637_v22 = vld [vmem:[%s6574_s5 + $0xa8] sm:$0xff]  ;;  %v651_v12 = vld [vmem:[%s6574_s5 + $0x118] sm:$0xff] }
  0x17   : > { %4524 = vmatpush3.bf16.msra.mxu0 %v4567_v7  ;;  %v4122_v28 = vcombine.high %v648_v26, %v652_v27  ;;  %v4121_v29 = vcombine.low %v648_v26, %v652_v27  ;;  %v640_v30 = vld [vmem:[%s6574_s5 + $0xc0] sm:$0xff]  ;;  %v621_v38 = vld [vmem:[%s6574_s5 + $0x28] sm:$0xff]  ;;  %v655_v14 = vld [vmem:[%s6574_s5 + $0x138] sm:$0xff] }
  0x18   : > { %4564 = vset.pattern.permute.xlu1 %v5092_v8  ;;  %4563 = vset.pattern.permute.xlu0 %v5092_v8  ;;  %v644_v31 = vld [vmem:[%s6574_s5 + $0xe0] sm:$0xff] }
  0x19   : > { %506 = vperm.xlu1 %4564, %v467_v4   ;;  %502 = vperm.xlu0 %4563, %v466_v3   ;;  %v4114_v32 = vcombine.high %v640_v30, %v644_v31  ;;  %v4113_v33 = vcombine.low %v640_v30, %v644_v31  ;;  %v632_v34 = vld [vmem:[%s6574_s5 + $0x80] sm:$0xff]  ;;  %v665_v3 = vld [vmem:[%s6574_s5 + $0x188] sm:$0xff] }
  0x1a   : > { %4525 = vmatprep.subr.bf16.mxu0 %v5091_v5  ;;  %1045 = vmatpush1.bf16.msra.mxu1 %v4137_v21  ;;  %v636_v35 = vld [vmem:[%s6574_s5 + $0xa0] sm:$0xff]  ;;  %v669_v4 = vld [vmem:[%s6574_s5 + $0x1a8] sm:$0xff] }
  0x1b   : > { %4526 = vmatpush3.bf16.msra.mxu0 %v4568_v9  ;;  %1046 = vmatprep.subr.bf16.mxu1 %v4130_v24  ;;  %v4106_v36 = vcombine.high %v632_v34, %v636_v35  ;;  %v4105_v37 = vcombine.low %v632_v34, %v636_v35  ;;  %v468_v43 = vld [vmem:[%s6570_s1] sm:$0x7]  ;;  %v4140_v8 = vcombine.high %v665_v3, %v669_v4  ;;  %v657_v9 = vld [vmem:[%s6574_s5 + $0x148] sm:$0xff] }
  0x1c   : > { %1085 = vmatprep.subr.bf16.mxu0 %v4148_v19  ;;  %v496_v46 = vrot.slane %v468_v43, %v5256_v40  ;;  %v482_v47 = vrot.slane %v468_v43, %v5259_v41  ;;  %v512_v50 = vrot.slane %v468_v43, %v5262_v42  ;;  %v4082_v61 = vld [vmem:[%s6571_s2] ss:$0 sm:$0xff]  ;;  %v4139_v11 = vcombine.low %v665_v3, %v669_v4  ;;  %v633_v21 = vld [vmem:[%s6574_s5 + $0x88] sm:$0xff] }
  0x1d   : > { %v4132_v13 = vcombine.high %v657_v9, %v661_v10  ;;  %v4131_v17 = vcombine.low %v657_v9, %v661_v10  ;;  %v4124_v19 = vcombine.high %v649_v15, %v653_v16  ;;  %v4108_v24 = vcombine.high %v633_v21, %v637_v22  ;;  %v624_v26 = vld [vmem:[%s6574_s5 + $0x40] sm:$0xff]  ;;  %v629_v30 = vld [vmem:[%s6574_s5 + $0x68] sm:$0xff]  ;;  %v659_v9 = vld [vmem:[%s6574_s5 + $0x158] sm:$0xff] }
  0x1e   : > { %1047 = vmatpush1.bf16.msra.mxu1 %v4129_v25  ;;  %v4107_v25 = vcombine.low %v633_v21, %v637_v22  ;;  %v628_v27 = vld [vmem:[%s6574_s5 + $0x60] sm:$0xff]  ;;  %v663_v10 = vld [vmem:[%s6574_s5 + $0x178] sm:$0xff]  ;;  %v4128_v22 = vcombine.high %v651_v12, %v655_v14 }
  0x1f   : > { %1048 = vmatprep.subr.bf16.mxu1 %v4122_v28  ;;  %v625_v28 = vld [vmem:[%s6574_s5 + $0x48] sm:$0xff]  ;;  %v616_v34 = vld [vmem:[%s6574_s5] sm:$0xff] }
  0x20   : > { %v4099_v31 = vcombine.low %v625_v28, %v629_v30  ;;  %v620_v35 = vld [vmem:[%s6574_s5 + $0x20] sm:$0xff] }
  0x22   : > { %1049 = vmatpush1.bf16.msra.mxu1 %v4121_v29  ;;  %v4098_v29 = vcombine.high %v624_v26, %v628_v27 }
  0x23   : > { %1050 = vmatprep.subr.bf16.mxu1 %v4114_v32  ;;  %v4100_v32 = vcombine.high %v625_v28, %v629_v30  ;;  %v634_v30 = vld [vmem:[%s6574_s5 + $0x90] sm:$0xff] }
  0x26   : > { %1051 = vmatpush1.bf16.msra.mxu1 %v4113_v33  ;;  %v4097_v33 = vcombine.low %v624_v26, %v628_v27  ;;  %v4127_v27 = vcombine.low %v651_v12, %v655_v14  ;;  %v4601_v12 = vld [vmem:[%s6576_s7 + $0x44] ss:$16 sps:$4 sm:$0xff]  }
  0x27   : > { %1052 = vmatprep.subr.bf16.mxu1 %v4106_v36  ;;  %v617_v36 = vld [vmem:[%s6574_s5 + $0x8] sm:$0xff]  ;;  %v4604_v14 = vld [vmem:[%s6576_s7 + $0x244] ss:$16 sps:$4 sm:$0xff]  }
  0x28   : > { %v4091_v43 = vcombine.low %v617_v36, %v621_v38 }
  0x2a   : > { %1053 = vmatpush1.bf16.msra.mxu1 %v4105_v37  ;;  %v4090_v37 = vcombine.high %v616_v34, %v620_v35 }
  0x2b   : > { %1054 = vmatprep.subr.bf16.mxu1 %v4098_v29 }
  0x2e   : > { %1055 = vmatpush1.bf16.msra.mxu1 %v4097_v33  ;;  %v639_v33 = vld [vmem:[%s6574_s5 + $0xb8] sm:$0xff] }
  0x2f   : > { %1056 = vmatprep.subr.bf16.mxu1 %v4090_v37 }
  0x8b   : > { %v487_v44 = vpop.permute.xlu1 %486  ;;  %v472_v45 = vpop.permute.xlu0 %471 }
  0x8c   : > { %v497_v51 = vmul.f32 %v496_v46, %v487_v44  ;;  %v483_v52 = vmul.f32 %v482_v47, %v472_v45  ;;  %v4092_v44 = vcombine.high %v617_v36, %v621_v38  ;;  %v4089_v45 = vcombine.low %v616_v34, %v620_v35  ;;  %v626_v38 = vld [vmem:[%s6574_s5 + $0x50] sm:$0xff] }
  0x8e   : > { %v499_v57 = vadd.f32 %v497_v51, %v483_v52  ;;  %1057 = vmatpush1.bf16.msra.mxu1 %v4089_v45  ;;  %v631_v45 = vld [vmem:[%s6574_s5 + $0x78] sm:$0xff] }
  0x8f   : > { %v491_v48 = vpop.permute.xlu1 %490  ;;  %v477_v49 = vpop.permute.xlu0 %476 }
  0x90   : > { %v498_v53 = vmul.f32 %v496_v46, %v491_v48  ;;  %v484_v54 = vmul.f32 %v482_v47, %v477_v49  ;;  %v674_v46 = vld [vmem:[%s6574_s5 + $0x1d0] sm:$0xff]  ;;  %v675_v48 = vld [vmem:[%s6574_s5 + $0x1d8] sm:$0xff] }
  0x91   : > { %v678_v47 = vld [vmem:[%s6574_s5 + $0x1f0] sm:$0xff] }
  0x92   : > { %v500_v58 = vadd.f32 %v498_v53, %v484_v54  ;;  %v4150_v49 = vcombine.high %v674_v46, %v678_v47  ;;  %v4149_v51 = vcombine.low %v674_v46, %v678_v47  ;;  %v4083_v54 = vld [vmem:[%s6573_s4] ss:$0 sm:$0xff] }
  0x94   : > { %v507_v55 = vpop.permute.xlu1 %506  ;;  %v503_v56 = vpop.permute.xlu0 %502  ;;  %1128 = vmatprep.subr.bf16.mxu1 %v4150_v49 }
  0x95   : > { %v514_v59 = vmul.f32 %v512_v50, %v507_v55  ;;  %v513_v60 = vmul.f32 %v512_v50, %v503_v56  ;;  %v679_v50 = vld [vmem:[%s6574_s5 + $0x1f8] sm:$0xff] }
  0x96   : > { %v4151_v52 = vcombine.low %v675_v48, %v679_v50  ;;  %v4152_v53 = vcombine.high %v675_v48, %v679_v50  ;;  %v618_v50 = vld [vmem:[%s6574_s5 + $0x10] sm:$0xff] }
  0x97   : > { %v516_v62 = vadd.f32 %v514_v59, %v500_v58  ;;  %v515_v63 = vadd.f32 %v513_v60, %v499_v57  ;;  %v666_v60 = vld [vmem:[%s6574_s5 + $0x190] sm:$0xff] }
  0x99   : > { %v525_v0 = vadd.f32 %v4082_v61, %v516_v62  ;;  %v524_v2 = vadd.f32 %v4082_v61, %v515_v63  ;;  %v670_v62 = vld [vmem:[%s6574_s5 + $0x1b0] sm:$0xff]  ;;  %v667_v63 = vld [vmem:[%s6574_s5 + $0x198] sm:$0xff] }
  0x9b   : > { %v527_v5 = vmax.f32 %v525_v0, 0.0  ;;  %v526_v6 = vmax.f32 %v524_v2, 0.0  ;;  %v671_v0 = vld [vmem:[%s6574_s5 + $0x1b8] sm:$0xff] }
  0x9d   : > { %v528_v7 = vpack.c.bf16 %v527_v5, %v526_v6  ;;  %v4142_v5 = vcombine.high %v666_v60, %v670_v62  ;;  %v4144_v6 = vcombine.high %v667_v63, %v671_v0 }
  0x9f   : > { %4528 = vmatmul.mubr.msk.bf16.vlgmr.msra.gmra.mxu0 %vm568_vm1, %v528_v7  ;;  %v658_v7 = vld [vmem:[%s6574_s5 + $0x150] sm:$0xff] }
  0xa0   : > { %1086 = vmatpush1.bf16.msra.mxu0 %v4147_v18  ;;  %1117 = vmatprep.mubr.bf16.mxu0 %v5090_v1  ;;  %v4123_v18 = vcombine.low %v649_v15, %v653_v16  ;;  %v4136_v16 = vcombine.high %v659_v9, %v663_v10 }
  0xa1   : > { %1087 = vmatprep.subr.bf16.mxu0 %v4140_v8  ;;  %v662_v8 = vld [vmem:[%s6574_s5 + $0x170] sm:$0xff] }
  0xa2   : > { %v4134_v15 = vcombine.high %v658_v7, %v662_v8 }
  0xa4   : > { %1088 = vmatpush1.bf16.msra.mxu0 %v4139_v11  ;;  %v4141_v11 = vcombine.low %v666_v60, %v670_v62  ;;  %v4571_v60 = vld [vmem:[%s6576_s7 + $0xe4] ss:$16 sps:$4 sm:$0xff]   ;;  %v4569_v62 = vld [vmem:[%s6576_s7 + $0xe0] ss:$16 sps:$4 sm:$0xff]  }
  0xa5   : > { %1089 = vmatprep.subr.bf16.mxu0 %v4132_v13  ;;  %v4143_v13 = vcombine.low %v667_v63, %v671_v0  ;;  %v4572_v63 = vld [vmem:[%s6576_s7 + $0x2e0] ss:$16 sps:$4 sm:$0xff]   ;;  %v4577_v0 = vld [vmem:[%s6576_s7 + $0xc4] ss:$16 sps:$4 sm:$0xff]  }
  0xa8   : > { %1090 = vmatpush1.bf16.msra.mxu0 %v4131_v17  ;;  %v650_v17 = vld [vmem:[%s6574_s5 + $0x110] sm:$0xff] }
  0xa9   : > { %1091 = vmatprep.subr.bf16.mxu0 %v4124_v19  ;;  %v654_v19 = vld [vmem:[%s6574_s5 + $0x130] sm:$0xff] }
  0xaa   : > { %v4126_v21 = vcombine.high %v650_v17, %v654_v19  ;;  %v4125_v26 = vcombine.low %v650_v17, %v654_v19  ;;  %v4593_v17 = vld [vmem:[%s6576_s7 + $0x60] ss:$16 sps:$4 sm:$0xff]  }
  0xab   : > { %v4596_v19 = vld [vmem:[%s6576_s7 + $0x260] ss:$16 sps:$4 sm:$0xff]  }
  0xac   : > { %1092 = vmatpush1.bf16.msra.mxu0 %v4123_v18  ;;  %v4133_v18 = vcombine.low %v658_v7, %v662_v8  ;;  %v4581_v7 = vld [vmem:[%s6576_s7 + $0xa0] ss:$16 sps:$4 sm:$0xff]  }
  0xad   : > { %1093 = vmatprep.subr.bf16.mxu0 %v4116_v20  ;;  %v4135_v20 = vcombine.low %v659_v9, %v663_v10  ;;  %v4584_v8 = vld [vmem:[%s6576_s7 + $0x2a0] ss:$16 sps:$4 sm:$0xff]   ;;  %v4589_v9 = vld [vmem:[%s6576_s7 + $0x84] ss:$16 sps:$4 sm:$0xff]  }
  0xae   : > { %v4592_v10 = vld [vmem:[%s6576_s7 + $0x284] ss:$16 sps:$4 sm:$0xff]  }
  0xb0   : > { %1094 = vmatpush1.bf16.msra.mxu0 %v4115_v23  ;;  %v642_v23 = vld [vmem:[%s6574_s5 + $0xd0] sm:$0xff] }
  0xb1   : > { %1095 = vmatprep.subr.bf16.mxu0 %v4108_v24  ;;  %v646_v24 = vld [vmem:[%s6574_s5 + $0xf0] sm:$0xff] }
  0xb2   : > { %v4118_v28 = vcombine.high %v642_v23, %v646_v24  ;;  %v4117_v34 = vcombine.low %v642_v23, %v646_v24  ;;  %v4605_v23 = vld [vmem:[%s6576_s7 + $0x20] ss:$16 sps:$4 sm:$0xff]  }
  0xb3   : > { %v4608_v24 = vld [vmem:[%s6576_s7 + $0x220] ss:$16 sps:$4 sm:$0xff]  }
  0xb4   : > { %1096 = vmatpush1.bf16.msra.mxu0 %v4107_v25  ;;  %v647_v25 = vld [vmem:[%s6574_s5 + $0xf8] sm:$0xff] }
  0xb5   : > { %1097 = vmatprep.subr.bf16.mxu0 %v4100_v32  ;;  %v635_v32 = vld [vmem:[%s6574_s5 + $0x98] sm:$0xff] }
  0xb6   : > { %v4112_v37 = vcombine.high %v635_v32, %v639_v33  ;;  %v4111_v47 = vcombine.low %v635_v32, %v639_v33  ;;  %v4625_v32 = vld [vmem:[%s6576_s7 + $0x1c4] ss:$16 sps:$4 sm:$0xff]  }
  0xb7   : > { %v4628_v33 = vld [vmem:[%s6576_s7 + $0x3c4] ss:$16 sps:$4 sm:$0xff]  }
  0xb8   : > { %1098 = vmatpush1.bf16.msra.mxu0 %v4099_v31  ;;  %v638_v31 = vld [vmem:[%s6574_s5 + $0xb0] sm:$0xff] }
  0xb9   : > { %1099 = vmatprep.subr.bf16.mxu0 %v4092_v44  ;;  %v4110_v36 = vcombine.high %v634_v30, %v638_v31  ;;  %v627_v44 = vld [vmem:[%s6574_s5 + $0x58] sm:$0xff]  ;;  %v4109_v46 = vcombine.low %v634_v30, %v638_v31  ;;  %v4617_v30 = vld [vmem:[%s6576_s7 + $0x1e0] ss:$16 sps:$4 sm:$0xff]  }
  0xba   : > { %v4104_v49 = vcombine.high %v627_v44, %v631_v45  ;;  %v4620_v31 = vld [vmem:[%s6576_s7 + $0x3e0] ss:$16 sps:$4 sm:$0xff]  }
  0xbc   : > { %1100 = vmatpush1.bf16.msra.mxu0 %v4091_v43  ;;  %v630_v43 = vld [vmem:[%s6574_s5 + $0x70] sm:$0xff] }
  0xbd   : > { %1171 = vmatprep.subr.bf16.mxu0 %v4152_v53  ;;  %v4102_v48 = vcombine.high %v626_v38, %v630_v43  ;;  %v623_v53 = vld [vmem:[%s6574_s5 + $0x38] sm:$0xff] }
 0x15f   : > { %v606_v55 = vpop.f32.mrf.mxu0 }
 0x160   : > { %v607_v57 = vadd.f32 %v4083_v54, %v606_v55  ;;  %v4103_v55 = vcombine.low %v627_v44, %v631_v45  ;;  %v4637_v44 = vld [vmem:[%s6576_s7 + $0x184] ss:$16 sps:$4 sm:$0xff]  }
 0x161   : > { %v4529_v56 = vpop.f32.mrf.mxu0  ;;  %v4640_v45 = vld [vmem:[%s6576_s7 + $0x384] ss:$16 sps:$4 sm:$0xff]  }
 0x162   : > { %v613_v2 = vmax.f32 %v607_v57, 0.0 }
 0x163   : > { %v609_v58 = vpop.f32.mrf.mxu0 }
 0x164   : > { %v610_v59 = vadd.f32 %v4083_v54, %v609_v58  ;;  %v4101_v54 = vcombine.low %v626_v38, %v630_v43  ;;  %v4629_v38 = vld [vmem:[%s6576_s7 + $0x1a0] ss:$16 sps:$4 sm:$0xff]  }
 0x165   : > { %v4530_v61 = vpop.f32.mrf.mxu0  ;;  %v4632_v43 = vld [vmem:[%s6576_s7 + $0x3a0] ss:$16 sps:$4 sm:$0xff]  }
 0x166   : > { %v614_v3 = vmax.f32 %v610_v59, 0.0  ;;  %v4574_v61 = vld [vmem:[%s6576_s7 + $0x2e4] ss:$16 sps:$4 sm:$0xff]  }
 0x168   : > { %v5358_v4 = vpack.c.bf16 %v614_v3, %v613_v2  ;;  %v4580_v2 = vld [vmem:[%s6576_s7 + $0x2c4] ss:$16 sps:$4 sm:$0xff]   ;;  %v4575_v3 = vld [vmem:[%s6576_s7 + $0xc0] ss:$16 sps:$4 sm:$0xff]  }
 0x16a   : > { %1075 = vmatmul.mubr.bf16.vlgmr.msra.gmra.mxu1 %v5358_v4  ;;  %1118 = vmatmul.mubr.bf16.vlgmr.msra.gmra.mxu0 %v5358_v4 }
 0x16b   : > { %1129 = vmatpush1.bf16.msra.mxu1 %v4149_v51  ;;  %1172 = vmatpush1.bf16.msra.mxu0 %v4151_v52  ;;  %v622_v51 = vld [vmem:[%s6574_s5 + $0x30] sm:$0xff]  ;;  %v619_v52 = vld [vmem:[%s6574_s5 + $0x18] sm:$0xff] }
 0x16c   : > { %1130 = vmatprep.subr.bf16.mxu1 %v4142_v5  ;;  %1173 = vmatprep.subr.bf16.mxu0 %v4144_v6  ;;  %v4094_v56 = vcombine.high %v618_v50, %v622_v51  ;;  %v4096_v57 = vcombine.high %v619_v52, %v623_v53  ;;  %v4093_v58 = vcombine.low %v618_v50, %v622_v51  ;;  %v4583_v5 = vld [vmem:[%s6576_s7 + $0xa4] ss:$16 sps:$4 sm:$0xff]   ;;  %v4641_v50 = vld [vmem:[%s6576_s7 + $0x160] ss:$16 sps:$4 sm:$0xff]  }
 0x16d   : > { %1160 = vmatprep.mubr.bf16.mxu1 %v5090_v1  ;;  %1203 = vmatprep.mubr.bf16.mxu0 %v5090_v1  ;;  %v643_v1 = vld [vmem:[%s6574_s5 + $0xd8] sm:$0xff]  ;;  %v4095_v59 = vcombine.low %v619_v52, %v623_v53  ;;  %v4586_v6 = vld [vmem:[%s6576_s7 + $0x2a4] ss:$16 sps:$4 sm:$0xff]   ;;  %v4644_v51 = vld [vmem:[%s6576_s7 + $0x360] ss:$16 sps:$4 sm:$0xff]  }
 0x16e   : > { %v4120_v29 = vcombine.high %v643_v1, %v647_v25  ;;  %v4119_v35 = vcombine.low %v643_v1, %v647_v25  ;;  %v4613_v1 = vld [vmem:[%s6576_s7 + $0x4] ss:$16 sps:$4 sm:$0xff]  }
 0x16f   : > { %1131 = vmatpush1.bf16.msra.mxu1 %v4141_v11  ;;  %1174 = vmatpush1.bf16.msra.mxu0 %v4143_v13  ;;  %v4587_v11 = vld [vmem:[%s6576_s7 + $0x80] ss:$16 sps:$4 sm:$0xff]   ;;  %v4616_v25 = vld [vmem:[%s6576_s7 + $0x204] ss:$16 sps:$4 sm:$0xff]  }
 0x170   : > { %1132 = vmatprep.subr.bf16.mxu1 %v4134_v15  ;;  %1175 = vmatprep.subr.bf16.mxu0 %v4136_v16  ;;  %v4590_v13 = vld [vmem:[%s6576_s7 + $0x280] ss:$16 sps:$4 sm:$0xff]   ;;  %v4595_v15 = vld [vmem:[%s6576_s7 + $0x64] ss:$16 sps:$4 sm:$0xff]  }
 0x171   : > { %v4598_v16 = vld [vmem:[%s6576_s7 + $0x264] ss:$16 sps:$4 sm:$0xff]  }
 0x172   : > { %v4649_v52 = vld [vmem:[%s6576_s7 + $0x144] ss:$16 sps:$4 sm:$0xff]  }
 0x173   : > { %1133 = vmatpush1.bf16.msra.mxu1 %v4133_v18  ;;  %1176 = vmatpush1.bf16.msra.mxu0 %v4135_v20  ;;  %v4599_v18 = vld [vmem:[%s6576_s7 + $0x40] ss:$16 sps:$4 sm:$0xff]   ;;  %v4652_v53 = vld [vmem:[%s6576_s7 + $0x344] ss:$16 sps:$4 sm:$0xff]  }
 0x174   : > { %1134 = vmatprep.subr.bf16.mxu1 %v4126_v21  ;;  %1177 = vmatprep.subr.bf16.mxu0 %v4128_v22  ;;  %v4602_v20 = vld [vmem:[%s6576_s7 + $0x240] ss:$16 sps:$4 sm:$0xff]   ;;  %v4607_v21 = vld [vmem:[%s6576_s7 + $0x24] ss:$16 sps:$4 sm:$0xff]  }
 0x175   : > { %v4610_v22 = vld [vmem:[%s6576_s7 + $0x224] ss:$16 sps:$4 sm:$0xff]  }
 0x177   : > { %1135 = vmatpush1.bf16.msra.mxu1 %v4125_v26  ;;  %1178 = vmatpush1.bf16.msra.mxu0 %v4127_v27  ;;  %v4611_v26 = vld [vmem:[%s6576_s7] ss:$16 sps:$4 sm:$0xff]  }
 0x178   : > { %1136 = vmatprep.subr.bf16.mxu1 %v4118_v28  ;;  %1179 = vmatprep.subr.bf16.mxu0 %v4120_v29  ;;  %v4614_v27 = vld [vmem:[%s6576_s7 + $0x200] ss:$16 sps:$4 sm:$0xff]   ;;  %v4619_v28 = vld [vmem:[%s6576_s7 + $0x1e4] ss:$16 sps:$4 sm:$0xff]  }
 0x179   : > { %v4622_v29 = vld [vmem:[%s6576_s7 + $0x3e4] ss:$16 sps:$4 sm:$0xff]  }
 0x17b   : > { %1137 = vmatpush1.bf16.msra.mxu1 %v4117_v34  ;;  %1180 = vmatpush1.bf16.msra.mxu0 %v4119_v35  ;;  %v4623_v34 = vld [vmem:[%s6576_s7 + $0x1c0] ss:$16 sps:$4 sm:$0xff]  }
 0x17c   : > { %1138 = vmatprep.subr.bf16.mxu1 %v4110_v36  ;;  %1181 = vmatprep.subr.bf16.mxu0 %v4112_v37  ;;  %v4626_v35 = vld [vmem:[%s6576_s7 + $0x3c0] ss:$16 sps:$4 sm:$0xff]   ;;  %v4631_v36 = vld [vmem:[%s6576_s7 + $0x1a4] ss:$16 sps:$4 sm:$0xff]  }
 0x17d   : > { %v4634_v37 = vld [vmem:[%s6576_s7 + $0x3a4] ss:$16 sps:$4 sm:$0xff]  }
 0x17f   : > { %1139 = vmatpush1.bf16.msra.mxu1 %v4109_v46  ;;  %1182 = vmatpush1.bf16.msra.mxu0 %v4111_v47  ;;  %v4635_v46 = vld [vmem:[%s6576_s7 + $0x180] ss:$16 sps:$4 sm:$0xff]  }
 0x180   : > { %1140 = vmatprep.subr.bf16.mxu1 %v4102_v48  ;;  %1183 = vmatprep.subr.bf16.mxu0 %v4104_v49  ;;  %v4638_v47 = vld [vmem:[%s6576_s7 + $0x380] ss:$16 sps:$4 sm:$0xff]   ;;  %v4643_v48 = vld [vmem:[%s6576_s7 + $0x164] ss:$16 sps:$4 sm:$0xff]  }
 0x181   : > { %v4646_v49 = vld [vmem:[%s6576_s7 + $0x364] ss:$16 sps:$4 sm:$0xff]  }
 0x183   : > { %1141 = vmatpush1.bf16.msra.mxu1 %v4101_v54  ;;  %1184 = vmatpush1.bf16.msra.mxu0 %v4103_v55  ;;  %v4647_v54 = vld [vmem:[%s6576_s7 + $0x140] ss:$16 sps:$4 sm:$0xff]  }
 0x184   : > { %1142 = vmatprep.subr.bf16.mxu1 %v4094_v56  ;;  %1185 = vmatprep.subr.bf16.mxu0 %v4096_v57  ;;  %v4650_v55 = vld [vmem:[%s6576_s7 + $0x340] ss:$16 sps:$4 sm:$0xff]   ;;  %v4655_v56 = vld [vmem:[%s6576_s7 + $0x124] ss:$16 sps:$4 sm:$0xff]  }
 0x185   : > { %v4658_v57 = vld [vmem:[%s6576_s7 + $0x324] ss:$16 sps:$4 sm:$0xff]  }
 0x187   : > { %1143 = vmatpush1.bf16.msra.mxu1 %v4093_v58  ;;  %1186 = vmatpush1.bf16.msra.mxu0 %v4095_v59  ;;  %v4653_v58 = vld [vmem:[%s6576_s7 + $0x120] ss:$16 sps:$4 sm:$0xff]  }
 0x188   : > { %3025 = vmatprep.subr.bf16.mxu1 %v4571_v60  ;;  %3066 = vmatprep.subr.bf16.mxu0 %v4574_v61  ;;  %v4656_v59 = vld [vmem:[%s6576_s7 + $0x320] ss:$16 sps:$4 sm:$0xff]   ;;  %v4661_v61 = vld [vmem:[%s6576_s7 + $0x104] ss:$16 sps:$4 sm:$0xff]  }
 0x189   : > { %v4659_v60 = vld [vmem:[%s6576_s7 + $0x100] ss:$16 sps:$4 sm:$0xff]  }
 0x18a   : > { %1161 = vmatmul.mubr.bf16.vlgmr.msra.gmra.mxu1 %v5358_v4  ;;  %1204 = vmatmul.mubr.bf16.vlgmr.msra.gmra.mxu0 %v5358_v4  ;;  %v4578_v4 = vld [vmem:[%s6576_s7 + $0x2c0] ss:$16 sps:$4 sm:$0xff]  }
 0x18b   : > { %3026 = vmatpush1.bf16.msra.mxu1 %v4569_v62  ;;  %3067 = vmatpush1.bf16.msra.mxu0 %v4572_v63  ;;  %v4662_v62 = vld [vmem:[%s6576_s7 + $0x300] ss:$16 sps:$4 sm:$0xff]   ;;  %v4664_v63 = vld [vmem:[%s6576_s7 + $0x304] ss:$16 sps:$4 sm:$0xff]  }
 0x18c   : > { %3027 = vmatprep.subr.bf16.mxu1 %v4577_v0  ;;  %3068 = vmatprep.subr.bf16.mxu0 %v4580_v2  ;;  %v4667_v0 = vld [vmem:[%s6576_s7 + $0x4e4] ss:$16 sps:$4 sm:$0xff]  }
 0x18d   : > { %v4670_v2 = vld [vmem:[%s6576_s7 + $0x6e4] ss:$16 sps:$4 sm:$0xff]  }
 0x18f   : > { %3028 = vmatpush1.bf16.msra.mxu1 %v4575_v3  ;;  %3069 = vmatpush1.bf16.msra.mxu0 %v4578_v4 }
 0x190   : > { %3029 = vmatprep.subr.bf16.mxu1 %v4583_v5  ;;  %3070 = vmatprep.subr.bf16.mxu0 %v4586_v6 }
 0x193   : > { %3030 = vmatpush1.bf16.msra.mxu1 %v4581_v7  ;;  %3071 = vmatpush1.bf16.msra.mxu0 %v4584_v8 }
 0x194   : > { %3031 = vmatprep.subr.bf16.mxu1 %v4589_v9  ;;  %3072 = vmatprep.subr.bf16.mxu0 %v4592_v10  ;;  %v5637_v9 = vsub.s32 3, %v5253_v39  ;;  %v680_v10 = vld [vmem:[%s6575_s6] sm:$0xff] }
 0x197   : > { %3032 = vmatpush1.bf16.msra.mxu1 %v4587_v11  ;;  %3073 = vmatpush1.bf16.msra.mxu0 %v4590_v13 }
 0x198   : > { %3033 = vmatprep.subr.bf16.mxu1 %v4595_v15  ;;  %3074 = vmatprep.subr.bf16.mxu0 %v4598_v16  ;;  %v689_v15 = vrot.slane %v680_v10, %v5256_v40  ;;  %v697_v16 = vrot.slane %v680_v10, %v5637_v9 }
 0x19b   : > { %3034 = vmatpush1.bf16.msra.mxu1 %v4593_v17  ;;  %3075 = vmatpush1.bf16.msra.mxu0 %v4596_v19  ;;  %v685_v17 = vrot.slane %v680_v10, %v5259_v41  ;;  %v693_v19 = vrot.slane %v680_v10, %v5262_v42 }
 0x19c   : > { %3035 = vmatprep.subr.bf16.mxu1 %v4601_v12  ;;  %3076 = vmatprep.subr.bf16.mxu0 %v4604_v14 }
 0x19f   : > { %3036 = vmatpush1.bf16.msra.mxu1 %v4599_v18  ;;  %3077 = vmatpush1.bf16.msra.mxu0 %v4602_v20 }
 0x1a0   : > { %3037 = vmatprep.subr.bf16.mxu1 %v4607_v21  ;;  %3078 = vmatprep.subr.bf16.mxu0 %v4610_v22 }
 0x1a3   : > { %3038 = vmatpush1.bf16.msra.mxu1 %v4605_v23  ;;  %3079 = vmatpush1.bf16.msra.mxu0 %v4608_v24 }
 0x1a4   : > { %3039 = vmatprep.subr.bf16.mxu1 %v4613_v1  ;;  %3080 = vmatprep.subr.bf16.mxu0 %v4616_v25 }
 0x1a7   : > { %3040 = vmatpush1.bf16.msra.mxu1 %v4611_v26  ;;  %3081 = vmatpush1.bf16.msra.mxu0 %v4614_v27 }
 0x1a8   : > { %3041 = vmatprep.subr.bf16.mxu1 %v4619_v28  ;;  %3082 = vmatprep.subr.bf16.mxu0 %v4622_v29 }
 0x1ab   : > { %3042 = vmatpush2.bf16.msra.mxu1 %v4617_v30  ;;  %3083 = vmatpush2.bf16.msra.mxu0 %v4620_v31 }
 0x1ac   : > { %3043 = vmatprep.subr.bf16.mxu1 %v4625_v32  ;;  %3084 = vmatprep.subr.bf16.mxu0 %v4628_v33 }
 0x1af   : > { %3044 = vmatpush2.bf16.msra.mxu1 %v4623_v34  ;;  %3085 = vmatpush2.bf16.msra.mxu0 %v4626_v35 }
 0x1b0   : > { %3045 = vmatprep.subr.bf16.mxu1 %v4631_v36  ;;  %3086 = vmatprep.subr.bf16.mxu0 %v4634_v37 }
 0x1b3   : > { %3046 = vmatpush2.bf16.msra.mxu1 %v4629_v38  ;;  %3087 = vmatpush2.bf16.msra.mxu0 %v4632_v43  ;;  %v700_v38 = vsub.s32 4, %v5253_v39  ;;  %v708_v43 = vsub.s32 6, %v5253_v39 }
 0x1b4   : > { %3047 = vmatprep.subr.bf16.mxu1 %v4637_v44  ;;  %3088 = vmatprep.subr.bf16.mxu0 %v4640_v45 }
 0x1b7   : > { %3048 = vmatpush2.bf16.msra.mxu1 %v4635_v46  ;;  %3089 = vmatpush2.bf16.msra.mxu0 %v4638_v47  ;;  %v704_v46 = vsub.s32 5, %v5253_v39  ;;  %v712_v47 = vsub.s32 7, %v5253_v39 }
 0x1b8   : > { %3049 = vmatprep.subr.bf16.mxu1 %v4643_v48  ;;  %3090 = vmatprep.subr.bf16.mxu0 %v4646_v49 }
 0x1bb   : > { %3050 = vmatpush2.bf16.msra.mxu1 %v4641_v50  ;;  %3091 = vmatpush2.bf16.msra.mxu0 %v4644_v51  ;;  %v701_v50 = vrot.slane %v680_v10, %v700_v38  ;;  %v709_v51 = vrot.slane %v680_v10, %v708_v43 }
 0x1bc   : > { %3051 = vmatprep.subr.bf16.mxu1 %v4649_v52  ;;  %3092 = vmatprep.subr.bf16.mxu0 %v4652_v53 }
 0x1bf   : > { %3052 = vmatpush2.bf16.msra.mxu1 %v4647_v54  ;;  %3093 = vmatpush2.bf16.msra.mxu0 %v4650_v55 }
 0x1c0   : > { %3053 = vmatprep.subr.bf16.mxu1 %v4655_v56  ;;  %3094 = vmatprep.subr.bf16.mxu0 %v4658_v57  ;;  %v705_v56 = vrot.slane %v680_v10, %v704_v46  ;;  %v713_v57 = vrot.slane %v680_v10, %v712_v47 }
 0x1c3   : > { %3054 = vmatpush2.bf16.msra.mxu1 %v4653_v58  ;;  %3095 = vmatpush2.bf16.msra.mxu0 %v4656_v59 }
 0x1c4   : > { %3055 = vmatprep.subr.bf16.mxu1 %v4661_v61  ;;  %3096 = vmatprep.subr.bf16.mxu0 %v4664_v63 }
 0x1c7   : > { %3056 = vmatpush2.bf16.msra.mxu1 %v4659_v60  ;;  %3097 = vmatpush2.bf16.msra.mxu0 %v4662_v62 }
 0x1c8   : > { %3107 = vmatprep.subr.bf16.mxu1 %v4667_v0  ;;  %3148 = vmatprep.subr.bf16.mxu0 %v4670_v2 }
 0x22a   : > { %v1076_v3 = vpop.f32.mrf.mxu1  ;;  %v1119_v4 = vpop.f32.mrf.mxu0 }
 0x22b   : > { %v1077_v23 = vadd.f32 %v1076_v3, %v685_v17  ;;  %v1120_v24 = vadd.f32 %v1119_v4, %v693_v19 }
 0x22c   : > { %v1078_v5 = vpop.f32.mrf.mxu1  ;;  %v1121_v6 = vpop.f32.mrf.mxu0 }
 0x22d   : > { %v1079_v18 = vadd.f32 %v1078_v5, %v689_v15  ;;  %v1122_v20 = vadd.f32 %v1121_v6, %v697_v16  ;;  %v1214_v30 = vmax.f32 %v1077_v23, 0.0  ;;  %v1216_v31 = vmax.f32 %v1120_v24, 0.0 }
 0x22e   : > { %v1080_v7 = vpop.f32.mrf.mxu1  ;;  %v1123_v8 = vpop.f32.mrf.mxu0 }
 0x22f   : > { %v1081_v21 = vadd.f32 %v1080_v7, %v685_v17  ;;  %v1124_v22 = vadd.f32 %v1123_v8, %v693_v19  ;;  %v1215_v26 = vmax.f32 %v1079_v18, 0.0  ;;  %v1217_v27 = vmax.f32 %v1122_v20, 0.0 }
 0x230   : > { %v1082_v11 = vpop.f32.mrf.mxu1  ;;  %v1125_v13 = vpop.f32.mrf.mxu0 }
 0x231   : > { %v1083_v12 = vadd.f32 %v1082_v11, %v689_v15  ;;  %v1126_v14 = vadd.f32 %v1125_v13, %v697_v16  ;;  %v1222_v28 = vmax.f32 %v1081_v21, 0.0  ;;  %v1224_v29 = vmax.f32 %v1124_v22, 0.0 }
 0x233   : > { %v1223_v1 = vmax.f32 %v1083_v12, 0.0  ;;  %v1225_v25 = vmax.f32 %v1126_v14, 0.0  ;;  %v1230_v34 = vmax.f32 %v1214_v30, %v1222_v28  ;;  %v1244_v35 = vmax.f32 %v1216_v31, %v1224_v29 }
 0x234   : > { %v5094_v28 = vmov 1966171168  }
 0x235   : > { %v1237_v32 = vmax.f32 %v1215_v26, %v1223_v1  ;;  %v1251_v33 = vmax.f32 %v1217_v27, %v1225_v25  ;;  %v1231_v44 = vrot.slane %v1230_v34, 4  ;;  %v1245_v45 = vrot.slane %v1244_v35, 4 }
 0x236   : > { %v1303_v29 = vunpack.c.l.s4 %v5094_v28 }
 0x237   : > { %v1238_v36 = vrot.slane %v1237_v32, 4  ;;  %v1252_v37 = vrot.slane %v1251_v33, 4  ;;  %v1232_v52 = vmax.f32 %v1230_v34, %v1231_v44  ;;  %v1246_v53 = vmax.f32 %v1244_v35, %v1245_v45 }
 0x239   : > { %v1239_v48 = vmax.f32 %v1237_v32, %v1238_v36  ;;  %v1253_v49 = vmax.f32 %v1251_v33, %v1252_v37  ;;  %v1233_v0 = vrot.slane %v1232_v52, 2  ;;  %v1247_v2 = vrot.slane %v1246_v53, 2 }
 0x23b   : > { %v1240_v58 = vrot.slane %v1239_v48, 2  ;;  %v1254_v59 = vrot.slane %v1253_v49, 2  ;;  %v1234_v20 = vmax.f32 %v1232_v52, %v1233_v0  ;;  %v1248_v21 = vmax.f32 %v1246_v53, %v1247_v2 }
 0x23d   : > { %v1241_v11 = vmax.f32 %v1239_v48, %v1240_v58  ;;  %v1255_v13 = vmax.f32 %v1253_v49, %v1254_v59  ;;  %v1235_v35 = vrot.slane %v1234_v20, 1  ;;  %v1249_v36 = vrot.slane %v1248_v21, 1 }
 0x23f   : > { %v1242_v27 = vrot.slane %v1241_v11, 1  ;;  %v1256_v30 = vrot.slane %v1255_v13, 1 }
 0x241   : > { %v1243_v49 = vmax.f32 %v1241_v11, %v1242_v27 }
 0x24a   : > { %v1162_v54 = vpop.f32.mrf.mxu1  ;;  %v1205_v55 = vpop.f32.mrf.mxu0 }
 0x24b   : > { %v1163_v60 = vadd.f32 %v1162_v54, %v701_v50  ;;  %v1206_v61 = vadd.f32 %v1205_v55, %v709_v51 }
 0x24c   : > { %v1164_v62 = vpop.f32.mrf.mxu1  ;;  %v1207_v63 = vpop.f32.mrf.mxu0 }
 0x24d   : > { %v1165_v3 = vadd.f32 %v1164_v62, %v705_v56  ;;  %v1208_v4 = vadd.f32 %v1207_v63, %v713_v57  ;;  %v1218_v15 = vmax.f32 %v1163_v60, 0.0  ;;  %v1220_v16 = vmax.f32 %v1206_v61, 0.0 }
 0x24e   : > { %v1166_v5 = vpop.f32.mrf.mxu1  ;;  %v1209_v6 = vpop.f32.mrf.mxu0 }
 0x24f   : > { %v1167_v7 = vadd.f32 %v1166_v5, %v701_v50  ;;  %v1210_v8 = vadd.f32 %v1209_v6, %v709_v51  ;;  %v1219_v22 = vmax.f32 %v1165_v3, 0.0  ;;  %v1221_v23 = vmax.f32 %v1208_v4, 0.0 }
 0x250   : > { %v1168_v17 = vpop.f32.mrf.mxu1  ;;  %v1211_v10 = vpop.f32.mrf.mxu0  ;;  %v1304_v50 = vunpack.c.0.s8 %v1303_v29  ;;  %v1257_v51 = vmax.f32 %v1255_v13, %v1256_v30 }
 0x251   : > { %v1226_v19 = vmax.f32 %v1167_v7, 0.0  ;;  %v1228_v12 = vmax.f32 %v1210_v8, 0.0  ;;  %v1169_v14 = vadd.f32 %v1168_v17, %v705_v56  ;;  %v1212_v18 = vadd.f32 %v1211_v10, %v713_v57 }
 0x252   : > { %v1236_v56 = vmax.f32 %v1234_v20, %v1235_v35  ;;  %v1250_v57 = vmax.f32 %v1248_v21, %v1249_v36  ;;  %v1307_v63 = vsub.s32 %v1304_v50, %v5253_v39  ;;  %v4680_v50 = vld [vmem:[%s6576_s7 + $0x6a0] ss:$16 sps:$4 sm:$0xff]   ;;  %v4764_v39 = vld [vmem:[%s6576_s7 + $0x2e8] ss:$16 sps:$4 sm:$0xff]  }
 0x253   : > { %v1258_v24 = vmax.f32 %v1218_v15, %v1226_v19  ;;  %v1272_v1 = vmax.f32 %v1220_v16, %v1228_v12  ;;  %v1227_v25 = vmax.f32 %v1169_v14, 0.0  ;;  %v1229_v26 = vmax.f32 %v1212_v18, 0.0 }
 0x254   : > { %v1298_v62 = vcombine.low %v1236_v56, %v1243_v49  ;;  %v1299_v0 = vcombine.low %v1250_v57, %v1257_v51  ;;  %v4677_v49 = vld [vmem:[%s6576_s7 + $0x4a0] ss:$16 sps:$4 sm:$0xff]   ;;  %v4685_v51 = vld [vmem:[%s6576_s7 + $0x484] ss:$16 sps:$4 sm:$0xff]  }
 0x255   : > { %v1259_v31 = vrot.slane %v1258_v24, 4  ;;  %v1273_v32 = vrot.slane %v1272_v1, 4  ;;  %v1265_v33 = vmax.f32 %v1219_v22, %v1227_v25  ;;  %v1279_v34 = vmax.f32 %v1221_v23, %v1229_v26  ;;  %v4694_v56 = vld [vmem:[%s6576_s7 + $0x664] ss:$16 sps:$4 sm:$0xff]   ;;  %v4689_v57 = vld [vmem:[%s6576_s7 + $0x460] ss:$16 sps:$4 sm:$0xff]  }
 0x256   : > { %v1308_v8 = vrot.slane %v1298_v62, %v1307_v63  ;;  %v1315_v11 = vrot.slane %v1299_v0, %v1307_v63  ;;  %v4698_v62 = vld [vmem:[%s6576_s7 + $0x640] ss:$16 sps:$4 sm:$0xff]   ;;  %v4706_v0 = vld [vmem:[%s6576_s7 + $0x624] ss:$16 sps:$4 sm:$0xff]  }
 0x257   : > { %v1260_v37 = vmax.f32 %v1258_v24, %v1259_v31  ;;  %v1274_v44 = vmax.f32 %v1272_v1, %v1273_v32  ;;  %v1266_v45 = vrot.slane %v1265_v33, 4  ;;  %v1280_v48 = vrot.slane %v1279_v34, 4  ;;  %v4665_v31 = vld [vmem:[%s6576_s7 + $0x4e0] ss:$16 sps:$4 sm:$0xff]  }
 0x258   : > { %v1330_v12 = vcombine.low %v1308_v8, %v1315_v11  ;;  %v4668_v32 = vld [vmem:[%s6576_s7 + $0x6e0] ss:$16 sps:$4 sm:$0xff]   ;;  %v4715_v8 = vld [vmem:[%s6576_s7 + $0x5e4] ss:$16 sps:$4 sm:$0xff]  }
 0x259   : > { %v1261_v52 = vrot.slane %v1260_v37, 2  ;;  %v1275_v53 = vrot.slane %v1274_v44, 2  ;;  %v1267_v54 = vmax.f32 %v1265_v33, %v1266_v45  ;;  %v1281_v55 = vmax.f32 %v1279_v34, %v1280_v48  ;;  %v4679_v45 = vld [vmem:[%s6576_s7 + $0x4a4] ss:$16 sps:$4 sm:$0xff]  }
 0x25a   : > { %v1338_v21 = vrot.slane %v1330_v12, %v1307_v63  ;;  %v4682_v48 = vld [vmem:[%s6576_s7 + $0x6a4] ss:$16 sps:$4 sm:$0xff]  }
 0x25b   : > { %v1262_v58 = vmax.f32 %v1260_v37, %v1261_v52  ;;  %v1276_v59 = vmax.f32 %v1274_v44, %v1275_v53  ;;  %v1268_v60 = vrot.slane %v1267_v54, 2  ;;  %v1282_v61 = vrot.slane %v1281_v55, 2  ;;  %v4671_v37 = vld [vmem:[%s6576_s7 + $0x4c0] ss:$16 sps:$4 sm:$0xff]   ;;  %v4688_v52 = vld [vmem:[%s6576_s7 + $0x684] ss:$16 sps:$4 sm:$0xff]  }
 0x25c   : > { %v4674_v44 = vld [vmem:[%s6576_s7 + $0x6c0] ss:$16 sps:$4 sm:$0xff]   ;;  %v4718_v11 = vld [vmem:[%s6576_s7 + $0x7e4] ss:$16 sps:$4 sm:$0xff]  }
 0x25d   : > { %v1263_v2 = vrot.slane %v1262_v58, 1  ;;  %v1277_v3 = vrot.slane %v1276_v59, 1  ;;  %v1269_v4 = vmax.f32 %v1267_v54, %v1268_v60  ;;  %v1283_v5 = vmax.f32 %v1281_v55, %v1282_v61  ;;  %v4683_v53 = vld [vmem:[%s6576_s7 + $0x480] ss:$16 sps:$4 sm:$0xff]   ;;  %v4691_v55 = vld [vmem:[%s6576_s7 + $0x464] ss:$16 sps:$4 sm:$0xff]  }
 0x25e   : > { %v4686_v54 = vld [vmem:[%s6576_s7 + $0x680] ss:$16 sps:$4 sm:$0xff]   ;;  %v4700_v60 = vld [vmem:[%s6576_s7 + $0x644] ss:$16 sps:$4 sm:$0xff]  }
 0x25f   : > { %v1270_v6 = vrot.slane %v1269_v4, 1  ;;  %v1284_v7 = vrot.slane %v1283_v5, 1  ;;  %v1264_v13 = vmax.f32 %v1262_v58, %v1263_v2  ;;  %v1278_v15 = vmax.f32 %v1276_v59, %v1277_v3  ;;  %v4692_v58 = vld [vmem:[%s6576_s7 + $0x660] ss:$16 sps:$4 sm:$0xff]   ;;  %v4697_v59 = vld [vmem:[%s6576_s7 + $0x444] ss:$16 sps:$4 sm:$0xff]  }
 0x260   : > { %v4695_v61 = vld [vmem:[%s6576_s7 + $0x440] ss:$16 sps:$4 sm:$0xff]   ;;  %v4727_v12 = vld [vmem:[%s6576_s7 + $0x5a4] ss:$16 sps:$4 sm:$0xff]  }
 0x261   : > { %v1271_v16 = vmax.f32 %v1269_v4, %v1270_v6  ;;  %v1285_v17 = vmax.f32 %v1283_v5, %v1284_v7  ;;  %v4701_v2 = vld [vmem:[%s6576_s7 + $0x420] ss:$16 sps:$4 sm:$0xff]   ;;  %v4709_v4 = vld [vmem:[%s6576_s7 + $0x404] ss:$16 sps:$4 sm:$0xff]  }
 0x262   : > { %v4704_v3 = vld [vmem:[%s6576_s7 + $0x620] ss:$16 sps:$4 sm:$0xff]   ;;  %v4712_v5 = vld [vmem:[%s6576_s7 + $0x604] ss:$16 sps:$4 sm:$0xff]  }
 0x263   : > { %v1300_v10 = vcombine.low %v1264_v13, %v1271_v16  ;;  %v1301_v19 = vcombine.low %v1278_v15, %v1285_v17  ;;  %v4707_v6 = vld [vmem:[%s6576_s7 + $0x400] ss:$16 sps:$4 sm:$0xff]   ;;  %v4721_v16 = vld [vmem:[%s6576_s7 + $0x5c4] ss:$16 sps:$4 sm:$0xff]  }
 0x264   : > { %v4710_v7 = vld [vmem:[%s6576_s7 + $0x600] ss:$16 sps:$4 sm:$0xff]   ;;  %v4724_v17 = vld [vmem:[%s6576_s7 + $0x7c4] ss:$16 sps:$4 sm:$0xff]  }
 0x265   : > { %v1322_v14 = vrot.slane %v1300_v10, %v1307_v63  ;;  %v1329_v18 = vrot.slane %v1301_v19, %v1307_v63  ;;  %v4713_v13 = vld [vmem:[%s6576_s7 + $0x5e0] ss:$16 sps:$4 sm:$0xff]  }
 0x266   : > { %v4716_v15 = vld [vmem:[%s6576_s7 + $0x7e0] ss:$16 sps:$4 sm:$0xff]  }
 0x267   : > { %v1331_v20 = vcombine.low %v1322_v14, %v1329_v18  ;;  %v4719_v10 = vld [vmem:[%s6576_s7 + $0x5c0] ss:$16 sps:$4 sm:$0xff]   ;;  %v4730_v14 = vld [vmem:[%s6576_s7 + $0x7a4] ss:$16 sps:$4 sm:$0xff]  }
 0x268   : > { %v4722_v19 = vld [vmem:[%s6576_s7 + $0x7c0] ss:$16 sps:$4 sm:$0xff]  }
 0x269   : > { %v1345_v22 = vrot.slane %v1331_v20, %v1307_v63  ;;  %v4703_v63 = vld [vmem:[%s6576_s7 + $0x424] ss:$16 sps:$4 sm:$0xff]   ;;  %v4725_v18 = vld [vmem:[%s6576_s7 + $0x5a0] ss:$16 sps:$4 sm:$0xff]  }
 0x26a   : > { %v4728_v20 = vld [vmem:[%s6576_s7 + $0x7a0] ss:$16 sps:$4 sm:$0xff]  }
 0x26b   : > { %v5659_v23 = vcombine.low %v1338_v21, %v1345_v22  ;;  %v4733_v21 = vld [vmem:[%s6576_s7 + $0x584] ss:$16 sps:$4 sm:$0xff]  }
 0x26c   : > { %v4736_v22 = vld [vmem:[%s6576_s7 + $0x784] ss:$16 sps:$4 sm:$0xff]  }
 0x26d   : > { %v1426_v24 = vrot.slane %v5659_v23, %v5256_v40  ;;  %v1434_v1 = vrot.slane %v5659_v23, %v5637_v9  ;;  %v1422_v25 = vrot.slane %v5659_v23, %v5259_v41  ;;  %v1430_v26 = vrot.slane %v5659_v23, %v5262_v42 }
 0x26e   : > { %v1442_v27 = vrot.slane %v5659_v23, %v704_v46  ;;  %v1450_v28 = vrot.slane %v5659_v23, %v712_v47  ;;  %v4673_v46 = vld [vmem:[%s6576_s7 + $0x4c4] ss:$16 sps:$4 sm:$0xff]  }
 0x26f   : > { %v5675_v29 = vpack.c.bf16 %v1426_v24, %v1426_v24  ;;  %v5677_v30 = vpack.c.bf16 %v1434_v1, %v1434_v1  ;;  %v5685_v33 = vpack.c.bf16 %v1422_v25, %v1422_v25  ;;  %v5687_v34 = vpack.c.bf16 %v1430_v26, %v1430_v26  ;;  %v4676_v47 = vld [vmem:[%s6576_s7 + $0x6c4] ss:$16 sps:$4 sm:$0xff]   ;;  %v4731_v24 = vld [vmem:[%s6576_s7 + $0x580] ss:$16 sps:$4 sm:$0xff]  }
 0x270   : > { %v5699_v35 = vpack.c.bf16 %v1442_v27, %v1442_v27  ;;  %v5701_v36 = vpack.c.bf16 %v1450_v28, %v1450_v28  ;;  %v4734_v1 = vld [vmem:[%s6576_s7 + $0x780] ss:$16 sps:$4 sm:$0xff]   ;;  %v4739_v25 = vld [vmem:[%s6576_s7 + $0x564] ss:$16 sps:$4 sm:$0xff]  }
 0x271   : > { %3057 = vmatprep.mubr.bf16.mxu1 %v5675_v29  ;;  %3098 = vmatprep.mubr.bf16.mxu0 %v5677_v30  ;;  %v4742_v26 = vld [vmem:[%s6576_s7 + $0x764] ss:$16 sps:$4 sm:$0xff]   ;;  %v4737_v27 = vld [vmem:[%s6576_s7 + $0x560] ss:$16 sps:$4 sm:$0xff]  }
 0x272   : > { %3058 = vmatmul.mubr.bf16.vlgmr.msra.gmra.mxu1 %v5685_v33  ;;  %3099 = vmatmul.mubr.bf16.vlgmr.msra.gmra.mxu0 %v5687_v34  ;;  %v4740_v28 = vld [vmem:[%s6576_s7 + $0x760] ss:$16 sps:$4 sm:$0xff]  }
 0x273   : > { %3108 = vmatpush1.bf16.msra.mxu1 %v4665_v31  ;;  %3149 = vmatpush1.bf16.msra.mxu0 %v4668_v32  ;;  %v4745_v31 = vld [vmem:[%s6576_s7 + $0x544] ss:$16 sps:$4 sm:$0xff]  }
 0x274   : > { %3139 = vmatprep.mubr.bf16.mxu1 %v5699_v35  ;;  %3180 = vmatprep.mubr.bf16.mxu0 %v5701_v36  ;;  %v4748_v32 = vld [vmem:[%s6576_s7 + $0x744] ss:$16 sps:$4 sm:$0xff]  }
 0x275   : > { %3109 = vmatprep.subr.bf16.mxu1 %v4673_v46  ;;  %3150 = vmatprep.subr.bf16.mxu0 %v4676_v47  ;;  %v4743_v46 = vld [vmem:[%s6576_s7 + $0x540] ss:$16 sps:$4 sm:$0xff]  }
 0x276   : > { %v4746_v47 = vld [vmem:[%s6576_s7 + $0x740] ss:$16 sps:$4 sm:$0xff]  }
 0x277   : > { %3110 = vmatpush1.bf16.msra.mxu1 %v4671_v37  ;;  %3151 = vmatpush1.bf16.msra.mxu0 %v4674_v44  ;;  %v4751_v37 = vld [vmem:[%s6576_s7 + $0x524] ss:$16 sps:$4 sm:$0xff]  }
 0x278   : > { %3111 = vmatprep.subr.bf16.mxu1 %v4679_v45  ;;  %3152 = vmatprep.subr.bf16.mxu0 %v4682_v48  ;;  %v4754_v44 = vld [vmem:[%s6576_s7 + $0x724] ss:$16 sps:$4 sm:$0xff]   ;;  %v4749_v45 = vld [vmem:[%s6576_s7 + $0x520] ss:$16 sps:$4 sm:$0xff]  }
 0x279   : > { %v4752_v48 = vld [vmem:[%s6576_s7 + $0x720] ss:$16 sps:$4 sm:$0xff]  }
 0x27b   : > { %3112 = vmatpush1.bf16.msra.mxu1 %v4677_v49  ;;  %3153 = vmatpush1.bf16.msra.mxu0 %v4680_v50  ;;  %v4757_v49 = vld [vmem:[%s6576_s7 + $0x504] ss:$16 sps:$4 sm:$0xff]  }
 0x27c   : > { %3113 = vmatprep.subr.bf16.mxu1 %v4685_v51  ;;  %3154 = vmatprep.subr.bf16.mxu0 %v4688_v52  ;;  %v4760_v50 = vld [vmem:[%s6576_s7 + $0x704] ss:$16 sps:$4 sm:$0xff]   ;;  %v4755_v51 = vld [vmem:[%s6576_s7 + $0x500] ss:$16 sps:$4 sm:$0xff]  }
 0x27d   : > { %v4758_v52 = vld [vmem:[%s6576_s7 + $0x700] ss:$16 sps:$4 sm:$0xff]  }
 0x27f   : > { %3114 = vmatpush1.bf16.msra.mxu1 %v4683_v53  ;;  %3155 = vmatpush1.bf16.msra.mxu0 %v4686_v54  ;;  %v1438_v53 = vrot.slane %v5659_v23, %v700_v38  ;;  %v1446_v54 = vrot.slane %v5659_v23, %v708_v43  ;;  %v4769_v43 = vld [vmem:[%s6576_s7 + $0xcc] ss:$16 sps:$4 sm:$0xff]  }
 0x280   : > { %3115 = vmatprep.subr.bf16.mxu1 %v4691_v55  ;;  %3156 = vmatprep.subr.bf16.mxu0 %v4694_v56  ;;  %v4763_v55 = vld [vmem:[%s6576_s7 + $0xec] ss:$16 sps:$4 sm:$0xff]  }
 0x281   : > { %v4766_v56 = vld [vmem:[%s6576_s7 + $0x2ec] ss:$16 sps:$4 sm:$0xff]   ;;  %v5896_v38 = vpack.c.bf16 %v1446_v54, %v1446_v54 }
 0x282   : > { %v4772_v23 = vld [vmem:[%s6576_s7 + $0x2cc] ss:$16 sps:$4 sm:$0xff]  }
 0x283   : > { %3116 = vmatpush1.bf16.msra.mxu1 %v4689_v57  ;;  %3157 = vmatpush1.bf16.msra.mxu0 %v4692_v58  ;;  %v4761_v57 = vld [vmem:[%s6576_s7 + $0xe8] ss:$16 sps:$4 sm:$0xff]   ;;  %v5894_v58 = vpack.c.bf16 %v1438_v53, %v1438_v53  ;;  %v4841_v53 = vld [vmem:[%s6576_s7 + $0x14c] ss:$16 sps:$4 sm:$0xff]  }
 0x284   : > { %3117 = vmatprep.subr.bf16.mxu1 %v4697_v59  ;;  %3158 = vmatprep.subr.bf16.mxu0 %v4700_v60  ;;  %v4767_v59 = vld [vmem:[%s6576_s7 + $0xc8] ss:$16 sps:$4 sm:$0xff]   ;;  %v4844_v54 = vld [vmem:[%s6576_s7 + $0x34c] ss:$16 sps:$4 sm:$0xff]  }
 0x285   : > { %v4770_v60 = vld [vmem:[%s6576_s7 + $0x2c8] ss:$16 sps:$4 sm:$0xff]  }
 0x287   : > { %3118 = vmatpush1.bf16.msra.mxu1 %v4695_v61  ;;  %3159 = vmatpush1.bf16.msra.mxu0 %v4698_v62  ;;  %v4775_v61 = vld [vmem:[%s6576_s7 + $0xac] ss:$16 sps:$4 sm:$0xff]   ;;  %v4773_v62 = vld [vmem:[%s6576_s7 + $0xa8] ss:$16 sps:$4 sm:$0xff]  }
 0x288   : > { %3119 = vmatprep.subr.bf16.mxu1 %v4703_v63  ;;  %3160 = vmatprep.subr.bf16.mxu0 %v4706_v0  ;;  %v4781_v63 = vld [vmem:[%s6576_s7 + $0x8c] ss:$16 sps:$4 sm:$0xff]  }
 0x289   : > { %v4784_v0 = vld [vmem:[%s6576_s7 + $0x28c] ss:$16 sps:$4 sm:$0xff]  }
 0x28b   : > { %3120 = vmatpush1.bf16.msra.mxu1 %v4701_v2  ;;  %3161 = vmatpush1.bf16.msra.mxu0 %v4704_v3  ;;  %v4779_v2 = vld [vmem:[%s6576_s7 + $0x88] ss:$16 sps:$4 sm:$0xff]  }
 0x28c   : > { %3121 = vmatprep.subr.bf16.mxu1 %v4709_v4  ;;  %3162 = vmatprep.subr.bf16.mxu0 %v4712_v5  ;;  %v4782_v3 = vld [vmem:[%s6576_s7 + $0x288] ss:$16 sps:$4 sm:$0xff]   ;;  %v4787_v4 = vld [vmem:[%s6576_s7 + $0x6c] ss:$16 sps:$4 sm:$0xff]  }
 0x28d   : > { %v4790_v5 = vld [vmem:[%s6576_s7 + $0x26c] ss:$16 sps:$4 sm:$0xff]  }
 0x28f   : > { %3122 = vmatpush1.bf16.msra.mxu1 %v4707_v6  ;;  %3163 = vmatpush1.bf16.msra.mxu0 %v4710_v7  ;;  %v4785_v6 = vld [vmem:[%s6576_s7 + $0x68] ss:$16 sps:$4 sm:$0xff]  }
 0x290   : > { %3123 = vmatprep.subr.bf16.mxu1 %v4715_v8  ;;  %3164 = vmatprep.subr.bf16.mxu0 %v4718_v11  ;;  %v4788_v7 = vld [vmem:[%s6576_s7 + $0x268] ss:$16 sps:$4 sm:$0xff]   ;;  %v4793_v8 = vld [vmem:[%s6576_s7 + $0x4c] ss:$16 sps:$4 sm:$0xff]  }
 0x291   : > { %v4796_v11 = vld [vmem:[%s6576_s7 + $0x24c] ss:$16 sps:$4 sm:$0xff]  }
 0x293   : > { %3124 = vmatpush2.bf16.msra.mxu1 %v4713_v13  ;;  %3165 = vmatpush2.bf16.msra.mxu0 %v4716_v15  ;;  %v4791_v13 = vld [vmem:[%s6576_s7 + $0x48] ss:$16 sps:$4 sm:$0xff]  }
 0x294   : > { %3125 = vmatprep.subr.bf16.mxu1 %v4721_v16  ;;  %3166 = vmatprep.subr.bf16.mxu0 %v4724_v17  ;;  %v4794_v15 = vld [vmem:[%s6576_s7 + $0x248] ss:$16 sps:$4 sm:$0xff]   ;;  %v4799_v16 = vld [vmem:[%s6576_s7 + $0x2c] ss:$16 sps:$4 sm:$0xff]  }
 0x295   : > { %v4802_v17 = vld [vmem:[%s6576_s7 + $0x22c] ss:$16 sps:$4 sm:$0xff]  }
 0x297   : > { %3126 = vmatpush2.bf16.msra.mxu1 %v4719_v10  ;;  %3167 = vmatpush2.bf16.msra.mxu0 %v4722_v19  ;;  %v4797_v10 = vld [vmem:[%s6576_s7 + $0x28] ss:$16 sps:$4 sm:$0xff]  }
 0x298   : > { %3127 = vmatprep.subr.bf16.mxu1 %v4727_v12  ;;  %3168 = vmatprep.subr.bf16.mxu0 %v4730_v14  ;;  %v4800_v19 = vld [vmem:[%s6576_s7 + $0x228] ss:$16 sps:$4 sm:$0xff]   ;;  %v4805_v12 = vld [vmem:[%s6576_s7 + $0xc] ss:$16 sps:$4 sm:$0xff]  }
 0x299   : > { %v4808_v14 = vld [vmem:[%s6576_s7 + $0x20c] ss:$16 sps:$4 sm:$0xff]  }
 0x29b   : > { %3128 = vmatpush2.bf16.msra.mxu1 %v4725_v18  ;;  %3169 = vmatpush2.bf16.msra.mxu0 %v4728_v20  ;;  %v4803_v18 = vld [vmem:[%s6576_s7 + $0x8] ss:$16 sps:$4 sm:$0xff]  }
 0x29c   : > { %3129 = vmatprep.subr.bf16.mxu1 %v4733_v21  ;;  %3170 = vmatprep.subr.bf16.mxu0 %v4736_v22  ;;  %v4806_v20 = vld [vmem:[%s6576_s7 + $0x208] ss:$16 sps:$4 sm:$0xff]   ;;  %v4811_v21 = vld [vmem:[%s6576_s7 + $0x1ec] ss:$16 sps:$4 sm:$0xff]  }
 0x29d   : > { %v4814_v22 = vld [vmem:[%s6576_s7 + $0x3ec] ss:$16 sps:$4 sm:$0xff]  }
 0x29f   : > { %3130 = vmatpush2.bf16.msra.mxu1 %v4731_v24  ;;  %3171 = vmatpush2.bf16.msra.mxu0 %v4734_v1  ;;  %v4809_v24 = vld [vmem:[%s6576_s7 + $0x1e8] ss:$16 sps:$4 sm:$0xff]  }
 0x2a0   : > { %3131 = vmatprep.subr.bf16.mxu1 %v4739_v25  ;;  %3172 = vmatprep.subr.bf16.mxu0 %v4742_v26  ;;  %v4812_v1 = vld [vmem:[%s6576_s7 + $0x3e8] ss:$16 sps:$4 sm:$0xff]   ;;  %v4817_v25 = vld [vmem:[%s6576_s7 + $0x1cc] ss:$16 sps:$4 sm:$0xff]  }
 0x2a1   : > { %v4820_v26 = vld [vmem:[%s6576_s7 + $0x3cc] ss:$16 sps:$4 sm:$0xff]  }
 0x2a3   : > { %3132 = vmatpush2.bf16.msra.mxu1 %v4737_v27  ;;  %3173 = vmatpush2.bf16.msra.mxu0 %v4740_v28  ;;  %v4815_v27 = vld [vmem:[%s6576_s7 + $0x1c8] ss:$16 sps:$4 sm:$0xff]  }
 0x2a4   : > { %3133 = vmatprep.subr.bf16.mxu1 %v4745_v31  ;;  %3174 = vmatprep.subr.bf16.mxu0 %v4748_v32  ;;  %v4818_v28 = vld [vmem:[%s6576_s7 + $0x3c8] ss:$16 sps:$4 sm:$0xff]   ;;  %v4823_v31 = vld [vmem:[%s6576_s7 + $0x1ac] ss:$16 sps:$4 sm:$0xff]  }
 0x2a5   : > { %v4826_v32 = vld [vmem:[%s6576_s7 + $0x3ac] ss:$16 sps:$4 sm:$0xff]  }
 0x2a7   : > { %3134 = vmatpush2.bf16.msra.mxu1 %v4743_v46  ;;  %3175 = vmatpush2.bf16.msra.mxu0 %v4746_v47  ;;  %v4821_v46 = vld [vmem:[%s6576_s7 + $0x1a8] ss:$16 sps:$4 sm:$0xff]  }
 0x2a8   : > { %3135 = vmatprep.subr.bf16.mxu1 %v4751_v37  ;;  %3176 = vmatprep.subr.bf16.mxu0 %v4754_v44  ;;  %v4824_v47 = vld [vmem:[%s6576_s7 + $0x3a8] ss:$16 sps:$4 sm:$0xff]   ;;  %v4829_v37 = vld [vmem:[%s6576_s7 + $0x18c] ss:$16 sps:$4 sm:$0xff]  }
 0x2a9   : > { %v4832_v44 = vld [vmem:[%s6576_s7 + $0x38c] ss:$16 sps:$4 sm:$0xff]  }
 0x2ab   : > { %3136 = vmatpush2.bf16.msra.mxu1 %v4749_v45  ;;  %3177 = vmatpush2.bf16.msra.mxu0 %v4752_v48  ;;  %v4827_v45 = vld [vmem:[%s6576_s7 + $0x188] ss:$16 sps:$4 sm:$0xff]  }
 0x2ac   : > { %3137 = vmatprep.subr.bf16.mxu1 %v4757_v49  ;;  %3178 = vmatprep.subr.bf16.mxu0 %v4760_v50  ;;  %v4830_v48 = vld [vmem:[%s6576_s7 + $0x388] ss:$16 sps:$4 sm:$0xff]   ;;  %v4835_v49 = vld [vmem:[%s6576_s7 + $0x16c] ss:$16 sps:$4 sm:$0xff]  }
 0x2ad   : > { %v4838_v50 = vld [vmem:[%s6576_s7 + $0x36c] ss:$16 sps:$4 sm:$0xff]  }
 0x2af   : > { %3138 = vmatpush2.bf16.msra.mxu1 %v4755_v51  ;;  %3179 = vmatpush2.bf16.msra.mxu0 %v4758_v52  ;;  %v4833_v51 = vld [vmem:[%s6576_s7 + $0x168] ss:$16 sps:$4 sm:$0xff]  }
 0x2b0   : > { %3189 = vmatprep.subr.bf16.mxu1 %v4763_v55  ;;  %3230 = vmatprep.subr.bf16.mxu0 %v4766_v56  ;;  %v4836_v52 = vld [vmem:[%s6576_s7 + $0x368] ss:$16 sps:$4 sm:$0xff]  }
 0x2b1   : > { %v4839_v55 = vld [vmem:[%s6576_s7 + $0x148] ss:$16 sps:$4 sm:$0xff]  }
 0x2b2   : > { %3140 = vmatmul.mubr.bf16.vlgmr.msra.gmra.mxu1 %v5894_v58  ;;  %3181 = vmatmul.mubr.bf16.vlgmr.msra.gmra.mxu0 %v5896_v38  ;;  %v4842_v56 = vld [vmem:[%s6576_s7 + $0x348] ss:$16 sps:$4 sm:$0xff]  }
 0x2b3   : > { %3190 = vmatpush1.bf16.msra.mxu1 %v4761_v57  ;;  %3221 = vmatprep.mubr.bf16.mxu1 %v5675_v29  ;;  %v4778_v29 = vld [vmem:[%s6576_s7 + $0x2ac] ss:$16 sps:$4 sm:$0xff]  }
 0x2b4   : > { %3231 = vmatpush1.bf16.msra.mxu0 %v4764_v39  ;;  %3262 = vmatprep.mubr.bf16.mxu0 %v5677_v30  ;;  %v4776_v30 = vld [vmem:[%s6576_s7 + $0x2a8] ss:$16 sps:$4 sm:$0xff]   ;;  %v4847_v57 = vld [vmem:[%s6576_s7 + $0x12c] ss:$16 sps:$4 sm:$0xff]  }
 0x2b5   : > { %3191 = vmatprep.subr.bf16.mxu1 %v4769_v43  ;;  %3232 = vmatprep.subr.bf16.mxu0 %v4772_v23  ;;  %v4850_v39 = vld [vmem:[%s6576_s7 + $0x32c] ss:$16 sps:$4 sm:$0xff]   ;;  %v4845_v43 = vld [vmem:[%s6576_s7 + $0x128] ss:$16 sps:$4 sm:$0xff]  }
 0x2b6   : > { %v4848_v23 = vld [vmem:[%s6576_s7 + $0x328] ss:$16 sps:$4 sm:$0xff]  }
 0x2b7   : > { %3192 = vmatpush1.bf16.msra.mxu1 %v4767_v59  ;;  %v4853_v59 = vld [vmem:[%s6576_s7 + $0x10c] ss:$16 sps:$4 sm:$0xff]  }
 0x2b8   : > { %3233 = vmatpush1.bf16.msra.mxu0 %v4770_v60  ;;  %3193 = vmatprep.subr.bf16.mxu1 %v4775_v61  ;;  %v4856_v60 = vld [vmem:[%s6576_s7 + $0x30c] ss:$16 sps:$4 sm:$0xff]   ;;  %v4851_v61 = vld [vmem:[%s6576_s7 + $0x108] ss:$16 sps:$4 sm:$0xff]  }
 0x2b9   : > { %3234 = vmatprep.subr.bf16.mxu0 %v4778_v29  ;;  %v4854_v29 = vld [vmem:[%s6576_s7 + $0x308] ss:$16 sps:$4 sm:$0xff]  }
 0x2bb   : > { %3194 = vmatpush1.bf16.msra.mxu1 %v4773_v62  ;;  %v4859_v62 = vld [vmem:[%s6576_s7 + $0x4ec] ss:$16 sps:$4 sm:$0xff]  }
 0x2bc   : > { %3235 = vmatpush1.bf16.msra.mxu0 %v4776_v30  ;;  %3195 = vmatprep.subr.bf16.mxu1 %v4781_v63  ;;  %v4862_v30 = vld [vmem:[%s6576_s7 + $0x6ec] ss:$16 sps:$4 sm:$0xff]   ;;  %v4857_v63 = vld [vmem:[%s6576_s7 + $0x4e8] ss:$16 sps:$4 sm:$0xff]  }
 0x2bd   : > { %3236 = vmatprep.subr.bf16.mxu0 %v4784_v0  ;;  %v4860_v0 = vld [vmem:[%s6576_s7 + $0x6e8] ss:$16 sps:$4 sm:$0xff]  }
 0x2bf   : > { %3196 = vmatpush1.bf16.msra.mxu1 %v4779_v2  ;;  %v4865_v2 = vld [vmem:[%s6576_s7 + $0x4cc] ss:$16 sps:$4 sm:$0xff]  }
 0x2c0   : > { %3237 = vmatpush1.bf16.msra.mxu0 %v4782_v3  ;;  %3197 = vmatprep.subr.bf16.mxu1 %v4787_v4  ;;  %v4868_v3 = vld [vmem:[%s6576_s7 + $0x6cc] ss:$16 sps:$4 sm:$0xff]   ;;  %v4863_v4 = vld [vmem:[%s6576_s7 + $0x4c8] ss:$16 sps:$4 sm:$0xff]  }
 0x2c1   : > { %3238 = vmatprep.subr.bf16.mxu0 %v4790_v5  ;;  %v4866_v5 = vld [vmem:[%s6576_s7 + $0x6c8] ss:$16 sps:$4 sm:$0xff]  }
 0x2c3   : > { %3198 = vmatpush1.bf16.msra.mxu1 %v4785_v6  ;;  %v4872_v6 = vld [vmem:[%s6576_s7 + $0x6a8] ss:$16 sps:$4 sm:$0xff]  }
 0x2c4   : > { %3239 = vmatpush1.bf16.msra.mxu0 %v4788_v7  ;;  %3199 = vmatprep.subr.bf16.mxu1 %v4793_v8  ;;  %v4880_v7 = vld [vmem:[%s6576_s7 + $0x68c] ss:$16 sps:$4 sm:$0xff]   ;;  %v4875_v8 = vld [vmem:[%s6576_s7 + $0x488] ss:$16 sps:$4 sm:$0xff]  }
 0x2c5   : > { %3240 = vmatprep.subr.bf16.mxu0 %v4796_v11  ;;  %v4878_v11 = vld [vmem:[%s6576_s7 + $0x688] ss:$16 sps:$4 sm:$0xff]  }
 0x2c7   : > { %3200 = vmatpush1.bf16.msra.mxu1 %v4791_v13  ;;  %v4883_v13 = vld [vmem:[%s6576_s7 + $0x46c] ss:$16 sps:$4 sm:$0xff]  }
 0x2c8   : > { %3241 = vmatpush1.bf16.msra.mxu0 %v4794_v15  ;;  %3201 = vmatprep.subr.bf16.mxu1 %v4799_v16  ;;  %v4886_v15 = vld [vmem:[%s6576_s7 + $0x66c] ss:$16 sps:$4 sm:$0xff]   ;;  %v4881_v16 = vld [vmem:[%s6576_s7 + $0x468] ss:$16 sps:$4 sm:$0xff]  }
 0x2c9   : > { %3242 = vmatprep.subr.bf16.mxu0 %v4802_v17  ;;  %v4884_v17 = vld [vmem:[%s6576_s7 + $0x668] ss:$16 sps:$4 sm:$0xff]  }
 0x2cb   : > { %3202 = vmatpush1.bf16.msra.mxu1 %v4797_v10  ;;  %v4889_v10 = vld [vmem:[%s6576_s7 + $0x44c] ss:$16 sps:$4 sm:$0xff]  }
 0x2cc   : > { %3243 = vmatpush1.bf16.msra.mxu0 %v4800_v19  ;;  %3203 = vmatprep.subr.bf16.mxu1 %v4805_v12  ;;  %v4892_v19 = vld [vmem:[%s6576_s7 + $0x64c] ss:$16 sps:$4 sm:$0xff]   ;;  %v4887_v12 = vld [vmem:[%s6576_s7 + $0x448] ss:$16 sps:$4 sm:$0xff]  }
 0x2cd   : > { %3244 = vmatprep.subr.bf16.mxu0 %v4808_v14  ;;  %v4890_v14 = vld [vmem:[%s6576_s7 + $0x648] ss:$16 sps:$4 sm:$0xff]  }
 0x2cf   : > { %3204 = vmatpush1.bf16.msra.mxu1 %v4803_v18  ;;  %v4895_v18 = vld [vmem:[%s6576_s7 + $0x42c] ss:$16 sps:$4 sm:$0xff]  }
 0x2d0   : > { %3245 = vmatpush1.bf16.msra.mxu0 %v4806_v20  ;;  %3205 = vmatprep.subr.bf16.mxu1 %v4811_v21  ;;  %v4898_v20 = vld [vmem:[%s6576_s7 + $0x62c] ss:$16 sps:$4 sm:$0xff]   ;;  %v4893_v21 = vld [vmem:[%s6576_s7 + $0x428] ss:$16 sps:$4 sm:$0xff]  }
 0x2d1   : > { %3246 = vmatprep.subr.bf16.mxu0 %v4814_v22  ;;  %v4896_v22 = vld [vmem:[%s6576_s7 + $0x628] ss:$16 sps:$4 sm:$0xff]  }
 0x2d3   : > { %3206 = vmatpush2.bf16.msra.mxu1 %v4809_v24  ;;  %v4901_v24 = vld [vmem:[%s6576_s7 + $0x40c] ss:$16 sps:$4 sm:$0xff]  }
 0x2d4   : > { %3247 = vmatpush2.bf16.msra.mxu0 %v4812_v1  ;;  %3207 = vmatprep.subr.bf16.mxu1 %v4817_v25  ;;  %v4904_v1 = vld [vmem:[%s6576_s7 + $0x60c] ss:$16 sps:$4 sm:$0xff]   ;;  %v4899_v25 = vld [vmem:[%s6576_s7 + $0x408] ss:$16 sps:$4 sm:$0xff]  }
 0x2d5   : > { %3248 = vmatprep.subr.bf16.mxu0 %v4820_v26  ;;  %v4902_v26 = vld [vmem:[%s6576_s7 + $0x608] ss:$16 sps:$4 sm:$0xff]  }
 0x2d7   : > { %3208 = vmatpush2.bf16.msra.mxu1 %v4815_v27  ;;  %v4907_v27 = vld [vmem:[%s6576_s7 + $0x5ec] ss:$16 sps:$4 sm:$0xff]  }
 0x2d8   : > { %3249 = vmatpush2.bf16.msra.mxu0 %v4818_v28  ;;  %3209 = vmatprep.subr.bf16.mxu1 %v4823_v31  ;;  %v4910_v28 = vld [vmem:[%s6576_s7 + $0x7ec] ss:$16 sps:$4 sm:$0xff]   ;;  %v4905_v31 = vld [vmem:[%s6576_s7 + $0x5e8] ss:$16 sps:$4 sm:$0xff]  }
 0x2d9   : > { %3250 = vmatprep.subr.bf16.mxu0 %v4826_v32  ;;  %v4908_v32 = vld [vmem:[%s6576_s7 + $0x7e8] ss:$16 sps:$4 sm:$0xff]  }
 0x2db   : > { %3210 = vmatpush2.bf16.msra.mxu1 %v4821_v46  ;;  %v4913_v46 = vld [vmem:[%s6576_s7 + $0x5cc] ss:$16 sps:$4 sm:$0xff]  }
 0x2dc   : > { %3251 = vmatpush2.bf16.msra.mxu0 %v4824_v47  ;;  %3211 = vmatprep.subr.bf16.mxu1 %v4829_v37  ;;  %v4916_v47 = vld [vmem:[%s6576_s7 + $0x7cc] ss:$16 sps:$4 sm:$0xff]   ;;  %v4911_v37 = vld [vmem:[%s6576_s7 + $0x5c8] ss:$16 sps:$4 sm:$0xff]  }
 0x2dd   : > { %3252 = vmatprep.subr.bf16.mxu0 %v4832_v44  ;;  %v4914_v44 = vld [vmem:[%s6576_s7 + $0x7c8] ss:$16 sps:$4 sm:$0xff]  }
 0x2df   : > { %3212 = vmatpush2.bf16.msra.mxu1 %v4827_v45  ;;  %v4919_v45 = vld [vmem:[%s6576_s7 + $0x5ac] ss:$16 sps:$4 sm:$0xff]  }
 0x2e0   : > { %3253 = vmatpush2.bf16.msra.mxu0 %v4830_v48  ;;  %3213 = vmatprep.subr.bf16.mxu1 %v4835_v49  ;;  %v4922_v48 = vld [vmem:[%s6576_s7 + $0x7ac] ss:$16 sps:$4 sm:$0xff]   ;;  %v4917_v49 = vld [vmem:[%s6576_s7 + $0x5a8] ss:$16 sps:$4 sm:$0xff]  }
 0x2e1   : > { %3254 = vmatprep.subr.bf16.mxu0 %v4838_v50  ;;  %v4920_v50 = vld [vmem:[%s6576_s7 + $0x7a8] ss:$16 sps:$4 sm:$0xff]  }
 0x2e3   : > { %3214 = vmatpush2.bf16.msra.mxu1 %v4833_v51  ;;  %v4925_v51 = vld [vmem:[%s6576_s7 + $0x58c] ss:$16 sps:$4 sm:$0xff]  }
 0x2e4   : > { %3255 = vmatpush2.bf16.msra.mxu0 %v4836_v52  ;;  %3215 = vmatprep.subr.bf16.mxu1 %v4841_v53  ;;  %v4928_v52 = vld [vmem:[%s6576_s7 + $0x78c] ss:$16 sps:$4 sm:$0xff]   ;;  %v4923_v53 = vld [vmem:[%s6576_s7 + $0x588] ss:$16 sps:$4 sm:$0xff]  }
 0x2e5   : > { %3256 = vmatprep.subr.bf16.mxu0 %v4844_v54  ;;  %v4926_v54 = vld [vmem:[%s6576_s7 + $0x788] ss:$16 sps:$4 sm:$0xff]  }
 0x2e7   : > { %3216 = vmatpush2.bf16.msra.mxu1 %v4839_v55  ;;  %v4931_v55 = vld [vmem:[%s6576_s7 + $0x56c] ss:$16 sps:$4 sm:$0xff]  }
 0x2e8   : > { %3257 = vmatpush2.bf16.msra.mxu0 %v4842_v56  ;;  %3217 = vmatprep.subr.bf16.mxu1 %v4847_v57  ;;  %v4934_v56 = vld [vmem:[%s6576_s7 + $0x76c] ss:$16 sps:$4 sm:$0xff]   ;;  %v4929_v57 = vld [vmem:[%s6576_s7 + $0x568] ss:$16 sps:$4 sm:$0xff]  }
 0x2e9   : > { %3258 = vmatprep.subr.bf16.mxu0 %v4850_v39  ;;  %v4932_v39 = vld [vmem:[%s6576_s7 + $0x768] ss:$16 sps:$4 sm:$0xff]  }
 0x2eb   : > { %3218 = vmatpush2.bf16.msra.mxu1 %v4845_v43  ;;  %v4937_v43 = vld [vmem:[%s6576_s7 + $0x54c] ss:$16 sps:$4 sm:$0xff]  }
 0x2ec   : > { %3259 = vmatpush2.bf16.msra.mxu0 %v4848_v23  ;;  %3219 = vmatprep.subr.bf16.mxu1 %v4853_v59  ;;  %v4940_v23 = vld [vmem:[%s6576_s7 + $0x74c] ss:$16 sps:$4 sm:$0xff]   ;;  %v4935_v59 = vld [vmem:[%s6576_s7 + $0x548] ss:$16 sps:$4 sm:$0xff]  }
 0x2ed   : > { %3260 = vmatprep.subr.bf16.mxu0 %v4856_v60  ;;  %v4938_v60 = vld [vmem:[%s6576_s7 + $0x748] ss:$16 sps:$4 sm:$0xff]  }
 0x2ef   : > { %3220 = vmatpush2.bf16.msra.mxu1 %v4851_v61  ;;  %v4943_v61 = vld [vmem:[%s6576_s7 + $0x52c] ss:$16 sps:$4 sm:$0xff]  }
 0x2f0   : > { %3261 = vmatpush2.bf16.msra.mxu0 %v4854_v29  ;;  %3271 = vmatprep.subr.bf16.mxu1 %v4859_v62  ;;  %v4946_v29 = vld [vmem:[%s6576_s7 + $0x72c] ss:$16 sps:$4 sm:$0xff]   ;;  %v4941_v62 = vld [vmem:[%s6576_s7 + $0x528] ss:$16 sps:$4 sm:$0xff]  }
 0x2f1   : > { %3312 = vmatprep.subr.bf16.mxu0 %v4862_v30  ;;  %v4944_v30 = vld [vmem:[%s6576_s7 + $0x728] ss:$16 sps:$4 sm:$0xff]  }
 0x2f2   : > { %3222 = vmatmul.mubr.bf16.vlgmr.msra.gmra.mxu1 %v5685_v33  ;;  %v4871_v33 = vld [vmem:[%s6576_s7 + $0x4ac] ss:$16 sps:$4 sm:$0xff]  }
 0x2f3   : > { %3263 = vmatmul.mubr.bf16.vlgmr.msra.gmra.mxu0 %v5687_v34  ;;  %3272 = vmatpush1.bf16.msra.mxu1 %v4857_v63  ;;  %v4874_v34 = vld [vmem:[%s6576_s7 + $0x6ac] ss:$16 sps:$4 sm:$0xff]  }
 0x2f4   : > { %3303 = vmatprep.mubr.bf16.mxu1 %v5699_v35  ;;  %3313 = vmatpush1.bf16.msra.mxu0 %v4860_v0  ;;  %v4869_v35 = vld [vmem:[%s6576_s7 + $0x4a8] ss:$16 sps:$4 sm:$0xff]   ;;  %v4949_v63 = vld [vmem:[%s6576_s7 + $0x50c] ss:$16 sps:$4 sm:$0xff]  }
 0x2f5   : > { %3344 = vmatprep.mubr.bf16.mxu0 %v5701_v36  ;;  %3273 = vmatprep.subr.bf16.mxu1 %v4865_v2  ;;  %v4877_v36 = vld [vmem:[%s6576_s7 + $0x48c] ss:$16 sps:$4 sm:$0xff]   ;;  %v4947_v2 = vld [vmem:[%s6576_s7 + $0x508] ss:$16 sps:$4 sm:$0xff]  }
 0x2f6   : > { %3314 = vmatprep.subr.bf16.mxu0 %v4868_v3  ;;  %v4952_v0 = vld [vmem:[%s6576_s7 + $0x70c] ss:$16 sps:$4 sm:$0xff]   ;;  %v4950_v3 = vld [vmem:[%s6576_s7 + $0x708] ss:$16 sps:$4 sm:$0xff]  }
 0x2f7   : > { %3274 = vmatpush1.bf16.msra.mxu1 %v4863_v4  ;;  %v4955_v4 = vld [vmem:[%s6578_s9 + $0x74] ss:$8 sps:$4 sm:$0xff]  }
 0x2f8   : > { %3315 = vmatpush1.bf16.msra.mxu0 %v4866_v5  ;;  %3275 = vmatprep.subr.bf16.mxu1 %v4871_v33  ;;  %v4953_v5 = vld [vmem:[%s6578_s9 + $0x70] ss:$8 sps:$4 sm:$0xff]   ;;  %v4958_v33 = vld [vmem:[%s6578_s9 + $0x64] ss:$8 sps:$4 sm:$0xff]  }
 0x2f9   : > { %3316 = vmatprep.subr.bf16.mxu0 %v4874_v34 }
 0x2fb   : > { %3276 = vmatpush1.bf16.msra.mxu1 %v4869_v35 }
 0x2fc   : > { %3317 = vmatpush1.bf16.msra.mxu0 %v4872_v6  ;;  %3277 = vmatprep.subr.bf16.mxu1 %v4877_v36  ;;  %v4956_v6 = vld [vmem:[%s6578_s9 + $0x60] ss:$8 sps:$4 sm:$0xff]  }
 0x2fd   : > { %3318 = vmatprep.subr.bf16.mxu0 %v4880_v7 }
 0x2ff   : > { %3278 = vmatpush1.bf16.msra.mxu1 %v4875_v8 }
 0x300   : > { %3319 = vmatpush1.bf16.msra.mxu0 %v4878_v11  ;;  %3279 = vmatprep.subr.bf16.mxu1 %v4883_v13 }
 0x301   : > { %3320 = vmatprep.subr.bf16.mxu0 %v4886_v15 }
 0x303   : > { %3280 = vmatpush1.bf16.msra.mxu1 %v4881_v16  ;;  %v4964_v16 = vld [vmem:[%s6578_s9 + $0x44] ss:$8 sps:$4 sm:$0xff]  }
 0x304   : > { %3321 = vmatpush1.bf16.msra.mxu0 %v4884_v17  ;;  %3281 = vmatprep.subr.bf16.mxu1 %v4889_v10  ;;  %v5001_v17 = vld [vmem:[%s6578_s9 + $0x170] ss:$8 sps:$4 sm:$0xff]   ;;  %v5003_v10 = vld [vmem:[%s6578_s9 + $0x174] ss:$8 sps:$4 sm:$0xff]  }
 0x305   : > { %3322 = vmatprep.subr.bf16.mxu0 %v4892_v19  ;;  %v5006_v19 = vld [vmem:[%s6578_s9 + $0x164] ss:$8 sps:$4 sm:$0xff]  }
 0x307   : > { %3282 = vmatpush1.bf16.msra.mxu1 %v4887_v12  ;;  %v4962_v12 = vld [vmem:[%s6578_s9 + $0x40] ss:$8 sps:$4 sm:$0xff]  }
 0x308   : > { %3323 = vmatpush1.bf16.msra.mxu0 %v4890_v14  ;;  %3283 = vmatprep.subr.bf16.mxu1 %v4895_v18  ;;  %v4967_v14 = vld [vmem:[%s6578_s9 + $0x34] ss:$8 sps:$4 sm:$0xff]   ;;  %v5004_v18 = vld [vmem:[%s6578_s9 + $0x160] ss:$8 sps:$4 sm:$0xff]  }
 0x309   : > { %3324 = vmatprep.subr.bf16.mxu0 %v4898_v20  ;;  %v5009_v20 = vld [vmem:[%s6578_s9 + $0x154] ss:$8 sps:$4 sm:$0xff]  }
 0x30b   : > { %3284 = vmatpush1.bf16.msra.mxu1 %v4893_v21  ;;  %v4965_v21 = vld [vmem:[%s6578_s9 + $0x30] ss:$8 sps:$4 sm:$0xff]  }
 0x30c   : > { %3325 = vmatpush1.bf16.msra.mxu0 %v4896_v22  ;;  %3285 = vmatprep.subr.bf16.mxu1 %v4901_v24  ;;  %v4970_v22 = vld [vmem:[%s6578_s9 + $0x24] ss:$8 sps:$4 sm:$0xff]   ;;  %v5007_v24 = vld [vmem:[%s6578_s9 + $0x150] ss:$8 sps:$4 sm:$0xff]  }
 0x30d   : > { %3326 = vmatprep.subr.bf16.mxu0 %v4904_v1  ;;  %v5012_v1 = vld [vmem:[%s6578_s9 + $0x144] ss:$8 sps:$4 sm:$0xff]  }
 0x30f   : > { %3286 = vmatpush1.bf16.msra.mxu1 %v4899_v25  ;;  %v4968_v25 = vld [vmem:[%s6578_s9 + $0x20] ss:$8 sps:$4 sm:$0xff]  }
 0x310   : > { %3327 = vmatpush1.bf16.msra.mxu0 %v4902_v26  ;;  %3287 = vmatprep.subr.bf16.mxu1 %v4907_v27  ;;  %v4973_v26 = vld [vmem:[%s6578_s9 + $0x14] ss:$8 sps:$4 sm:$0xff]   ;;  %v5010_v27 = vld [vmem:[%s6578_s9 + $0x140] ss:$8 sps:$4 sm:$0xff]  }
 0x311   : > { %3328 = vmatprep.subr.bf16.mxu0 %v4910_v28  ;;  %v5015_v28 = vld [vmem:[%s6578_s9 + $0x134] ss:$8 sps:$4 sm:$0xff]  }
 0x313   : > { %3288 = vmatpush2.bf16.msra.mxu1 %v4905_v31  ;;  %v4971_v31 = vld [vmem:[%s6578_s9 + $0x10] ss:$8 sps:$4 sm:$0xff]  }
 0x314   : > { %3329 = vmatpush2.bf16.msra.mxu0 %v4908_v32  ;;  %3289 = vmatprep.subr.bf16.mxu1 %v4913_v46  ;;  %v4976_v32 = vld [vmem:[%s6578_s9 + $0x4] ss:$8 sps:$4 sm:$0xff]   ;;  %v5013_v46 = vld [vmem:[%s6578_s9 + $0x130] ss:$8 sps:$4 sm:$0xff]  }
 0x315   : > { %3330 = vmatprep.subr.bf16.mxu0 %v4916_v47  ;;  %v5018_v47 = vld [vmem:[%s6578_s9 + $0x124] ss:$8 sps:$4 sm:$0xff]  }
 0x317   : > { %3290 = vmatpush2.bf16.msra.mxu1 %v4911_v37  ;;  %v4974_v37 = vld [vmem:[%s6578_s9] ss:$8 sps:$4 sm:$0xff]  }
 0x318   : > { %3331 = vmatpush2.bf16.msra.mxu0 %v4914_v44  ;;  %3291 = vmatprep.subr.bf16.mxu1 %v4919_v45  ;;  %v4979_v44 = vld [vmem:[%s6578_s9 + $0xf4] ss:$8 sps:$4 sm:$0xff]   ;;  %v5016_v45 = vld [vmem:[%s6578_s9 + $0x120] ss:$8 sps:$4 sm:$0xff]  }
 0x319   : > { %3332 = vmatprep.subr.bf16.mxu0 %v4922_v48  ;;  %v5021_v48 = vld [vmem:[%s6578_s9 + $0x114] ss:$8 sps:$4 sm:$0xff]  }
 0x31b   : > { %3292 = vmatpush2.bf16.msra.mxu1 %v4917_v49  ;;  %v4977_v49 = vld [vmem:[%s6578_s9 + $0xf0] ss:$8 sps:$4 sm:$0xff]  }
 0x31c   : > { %3333 = vmatpush2.bf16.msra.mxu0 %v4920_v50  ;;  %3293 = vmatprep.subr.bf16.mxu1 %v4925_v51  ;;  %v4982_v50 = vld [vmem:[%s6578_s9 + $0xe4] ss:$8 sps:$4 sm:$0xff]   ;;  %v5019_v51 = vld [vmem:[%s6578_s9 + $0x110] ss:$8 sps:$4 sm:$0xff]  }
 0x31d   : > { %3334 = vmatprep.subr.bf16.mxu0 %v4928_v52  ;;  %v5024_v52 = vld [vmem:[%s6578_s9 + $0x104] ss:$8 sps:$4 sm:$0xff]  }
 0x31f   : > { %3294 = vmatpush2.bf16.msra.mxu1 %v4923_v53  ;;  %v4980_v53 = vld [vmem:[%s6578_s9 + $0xe0] ss:$8 sps:$4 sm:$0xff]  }
 0x320   : > { %3335 = vmatpush2.bf16.msra.mxu0 %v4926_v54  ;;  %3295 = vmatprep.subr.bf16.mxu1 %v4931_v55  ;;  %v4985_v54 = vld [vmem:[%s6578_s9 + $0xd4] ss:$8 sps:$4 sm:$0xff]   ;;  %v5022_v55 = vld [vmem:[%s6578_s9 + $0x100] ss:$8 sps:$4 sm:$0xff]  }
 0x321   : > { %3336 = vmatprep.subr.bf16.mxu0 %v4934_v56  ;;  %v5027_v56 = vld [vmem:[%s6578_s9 + $0x1f4] ss:$8 sps:$4 sm:$0xff]  }
 0x323   : > { %3296 = vmatpush2.bf16.msra.mxu1 %v4929_v57  ;;  %v4983_v57 = vld [vmem:[%s6578_s9 + $0xd0] ss:$8 sps:$4 sm:$0xff]  }
 0x324   : > { %3337 = vmatpush2.bf16.msra.mxu0 %v4932_v39  ;;  %3297 = vmatprep.subr.bf16.mxu1 %v4937_v43  ;;  %v4988_v39 = vld [vmem:[%s6578_s9 + $0xc4] ss:$8 sps:$4 sm:$0xff]   ;;  %v5025_v43 = vld [vmem:[%s6578_s9 + $0x1f0] ss:$8 sps:$4 sm:$0xff]  }
 0x325   : > { %3338 = vmatprep.subr.bf16.mxu0 %v4940_v23  ;;  %v5030_v23 = vld [vmem:[%s6578_s9 + $0x1e4] ss:$8 sps:$4 sm:$0xff]  }
 0x327   : > { %3298 = vmatpush2.bf16.msra.mxu1 %v4935_v59  ;;  %v4986_v59 = vld [vmem:[%s6578_s9 + $0xc0] ss:$8 sps:$4 sm:$0xff]  }
 0x328   : > { %3339 = vmatpush2.bf16.msra.mxu0 %v4938_v60  ;;  %3299 = vmatprep.subr.bf16.mxu1 %v4943_v61  ;;  %v4991_v60 = vld [vmem:[%s6578_s9 + $0xb4] ss:$8 sps:$4 sm:$0xff]   ;;  %v5028_v61 = vld [vmem:[%s6578_s9 + $0x1e0] ss:$8 sps:$4 sm:$0xff]  }
 0x329   : > { %3340 = vmatprep.subr.bf16.mxu0 %v4946_v29  ;;  %v5033_v29 = vld [vmem:[%s6578_s9 + $0x1d4] ss:$8 sps:$4 sm:$0xff]  }
 0x32b   : > { %3300 = vmatpush2.bf16.msra.mxu1 %v4941_v62  ;;  %v4989_v62 = vld [vmem:[%s6578_s9 + $0xb0] ss:$8 sps:$4 sm:$0xff]  }
 0x32c   : > { %3341 = vmatpush2.bf16.msra.mxu0 %v4944_v30  ;;  %3301 = vmatprep.subr.bf16.mxu1 %v4949_v63  ;;  %v4994_v30 = vld [vmem:[%s6578_s9 + $0xa4] ss:$8 sps:$4 sm:$0xff]   ;;  %v5031_v63 = vld [vmem:[%s6578_s9 + $0x1d0] ss:$8 sps:$4 sm:$0xff]  }
 0x32d   : > { %3342 = vmatprep.subr.bf16.mxu0 %v4952_v0  ;;  %v5036_v0 = vld [vmem:[%s6578_s9 + $0x1c4] ss:$8 sps:$4 sm:$0xff]  }
 0x32f   : > { %3302 = vmatpush2.bf16.msra.mxu1 %v4947_v2  ;;  %v4992_v2 = vld [vmem:[%s6578_s9 + $0xa0] ss:$8 sps:$4 sm:$0xff]  }
 0x330   : > { %3343 = vmatpush2.bf16.msra.mxu0 %v4950_v3  ;;  %3757 = vmatprep.subr.bf16.mxu1 %v4955_v4  ;;  %v4997_v3 = vld [vmem:[%s6578_s9 + $0x94] ss:$8 sps:$4 sm:$0xff]   ;;  %v5034_v4 = vld [vmem:[%s6578_s9 + $0x1c0] ss:$8 sps:$4 sm:$0xff]  }
 0x331   : > { %3798 = vmatprep.subr.bf16.mxu0 %v5003_v10 }
 0x332   : > { %3304 = vmatmul.mubr.bf16.vlgmr.msra.gmra.mxu1 %v5894_v58  ;;  %v6291_v34 = vpop.f32.mrf.mxu1  ;;  %v6293_v35 = vpop.f32.mrf.mxu0  ;;  %v4961_v58 = vld [vmem:[%s6578_s9 + $0x54] ss:$8 sps:$4 sm:$0xff]  }
 0x333   : > { %3345 = vmatmul.mubr.bf16.vlgmr.msra.gmra.mxu0 %v5896_v38  ;;  %3758 = vmatpush1.bf16.msra.mxu1 %v4953_v5  ;;  %v4959_v38 = vld [vmem:[%s6578_s9 + $0x50] ss:$8 sps:$4 sm:$0xff]   ;;  %v5039_v5 = vld [vmem:[%s6578_s9 + $0x1b4] ss:$8 sps:$4 sm:$0xff]  }
 0x334   : > { %v6299_v36 = vpop.f32.mrf.mxu1  ;;  %v6301_v7 = vpop.f32.mrf.mxu0  ;;  %3759 = vmatprep.subr.bf16.mxu1 %v4958_v33  ;;  %3799 = vmatpush1.bf16.msra.mxu0 %v5001_v17  ;;  %v6456_v33 = vld [vmem:[%s6577_s8] sm:$0xf] }
 0x335   : > { %3800 = vmatprep.subr.bf16.mxu0 %v5006_v19 }
 0x336   : > { %v3063_v8 = vpop.f32.mrf.mxu1  ;;  %v3104_v11 = vpop.f32.mrf.mxu0 }
 0x337   : > { %3760 = vmatpush1.bf16.msra.mxu1 %v4956_v6  ;;  %v4995_v6 = vld [vmem:[%s6578_s9 + $0x90] ss:$8 sps:$4 sm:$0xff]   ;;  %v3008_v11 = vrot.slane %v6456_v33, %v5259_v41 }
 0x338   : > { %v3064_v13 = vpop.f32.mrf.mxu1  ;;  %v3105_v15 = vpop.f32.mrf.mxu0  ;;  %3761 = vmatprep.subr.bf16.mxu1 %v4961_v58  ;;  %3801 = vmatpush1.bf16.msra.mxu0 %v5004_v18  ;;  %v5000_v58 = vld [vmem:[%s6578_s9 + $0x84] ss:$8 sps:$4 sm:$0xff]   ;;  %v5037_v8 = vld [vmem:[%s6578_s9 + $0x1b0] ss:$8 sps:$4 sm:$0xff]  }
 0x339   : > { %3802 = vmatprep.subr.bf16.mxu0 %v5009_v20  ;;  %v4998_v13 = vld [vmem:[%s6578_s9 + $0x80] ss:$8 sps:$4 sm:$0xff]   ;;  %v3060_v15 = vadd.f32 %v6291_v34, %v3008_v11 }
 0x33a   : > { %v5040_v20 = vld [vmem:[%s6578_s9 + $0x1a0] ss:$8 sps:$4 sm:$0xff]  }
 0x33b   : > { %3762 = vmatpush1.bf16.msra.mxu1 %v4959_v38  ;;  %v3012_v38 = vrot.slane %v6456_v33, %v5256_v40  ;;  %v3101_v17 = vadd.f32 %v6293_v35, %v3060_v15 }
 0x33c   : > { %3763 = vmatprep.subr.bf16.mxu1 %v4964_v16  ;;  %3803 = vmatpush1.bf16.msra.mxu0 %v5007_v24 }
 0x33d   : > { %3804 = vmatprep.subr.bf16.mxu0 %v5012_v1  ;;  %v3062_v16 = vadd.f32 %v6299_v36, %v3012_v38  ;;  %v5045_v1 = vld [vmem:[%s6578_s9 + $0x194] ss:$8 sps:$4 sm:$0xff]  }
 0x33f   : > { %3764 = vmatpush1.bf16.msra.mxu1 %v4962_v12  ;;  %v5042_v12 = vld [vmem:[%s6578_s9 + $0x1a4] ss:$8 sps:$4 sm:$0xff]  }
 0x340   : > { %3765 = vmatprep.subr.bf16.mxu1 %v4967_v14  ;;  %3805 = vmatpush1.bf16.msra.mxu0 %v5010_v27  ;;  %v3103_v14 = vadd.f32 %v6301_v7, %v3062_v16  ;;  %v5043_v7 = vld [vmem:[%s6578_s9 + $0x190] ss:$8 sps:$4 sm:$0xff]  }
 0x341   : > { %3806 = vmatprep.subr.bf16.mxu0 %v5015_v28 }
 0x343   : > { %3766 = vmatpush1.bf16.msra.mxu1 %v4965_v21 }
 0x344   : > { %3767 = vmatprep.subr.bf16.mxu1 %v4970_v22  ;;  %3807 = vmatpush1.bf16.msra.mxu0 %v5013_v46 }
 0x345   : > { %3808 = vmatprep.subr.bf16.mxu0 %v5018_v47  ;;  %v5046_v47 = vld [vmem:[%s6578_s9 + $0x180] ss:$8 sps:$4 sm:$0xff]  }
 0x347   : > { %3768 = vmatpush1.bf16.msra.mxu1 %v4968_v25 }
 0x348   : > { %3769 = vmatprep.subr.bf16.mxu1 %v4973_v26  ;;  %3809 = vmatpush1.bf16.msra.mxu0 %v5016_v45 }
 0x349   : > { %3810 = vmatprep.subr.bf16.mxu0 %v5021_v48 }
 0x34b   : > { %3770 = vmatpush1.bf16.msra.mxu1 %v4971_v31 }
 0x34c   : > { %3771 = vmatprep.subr.bf16.mxu1 %v4976_v32  ;;  %3811 = vmatpush1.bf16.msra.mxu0 %v5019_v51  ;;  %v5048_v32 = vld [vmem:[%s6578_s9 + $0x184] ss:$8 sps:$4 sm:$0xff]  }
 0x34d   : > { %3812 = vmatprep.subr.bf16.mxu0 %v5024_v52 }
 0x34f   : > { %3772 = vmatpush1.bf16.msra.mxu1 %v4974_v37 }
 0x350   : > { %3773 = vmatprep.subr.bf16.mxu1 %v4979_v44  ;;  %3813 = vmatpush1.bf16.msra.mxu0 %v5022_v55  ;;  %v5050_v55 = vld [vmem:[%s6580_s11 + $0x38] sm:$0xff]  }
 0x351   : > { %3814 = vmatprep.subr.bf16.mxu0 %v5027_v56  ;;  %v5051_v56 = vld [vmem:[%s6580_s11 + $0x70] sm:$0xff]  }
 0x353   : > { %3774 = vmatpush2.bf16.msra.mxu1 %v4977_v49 }
 0x354   : > { %3775 = vmatprep.subr.bf16.mxu1 %v4982_v50  ;;  %3815 = vmatpush2.bf16.msra.mxu0 %v5025_v43  ;;  %v5054_v43 = vld [vmem:[%s6580_s11 + $0x28] sm:$0xff]  }
 0x355   : > { %3816 = vmatprep.subr.bf16.mxu0 %v5030_v23  ;;  %v5055_v23 = vld [vmem:[%s6580_s11 + $0x60] sm:$0xff]  }
 0x357   : > { %3776 = vmatpush2.bf16.msra.mxu1 %v4980_v53 }
 0x358   : > { %3777 = vmatprep.subr.bf16.mxu1 %v4985_v54  ;;  %3817 = vmatpush2.bf16.msra.mxu0 %v5028_v61  ;;  %v5049_v54 = vld [vmem:[%s6580_s11 + $0x78] sm:$0xff]  }
 0x359   : > { %3818 = vmatprep.subr.bf16.mxu0 %v5033_v29  ;;  %v5058_v61 = vld [vmem:[%s6580_s11 + $0x18] sm:$0xff]   ;;  %v5059_v29 = vld [vmem:[%s6580_s11 + $0x50] sm:$0xff]  }
 0x35b   : > { %3778 = vmatpush2.bf16.msra.mxu1 %v4983_v57  ;;  %v5052_v57 = vld [vmem:[%s6580_s11 + $0x30] sm:$0xff]  }
 0x35c   : > { %3779 = vmatprep.subr.bf16.mxu1 %v4988_v39  ;;  %3819 = vmatpush2.bf16.msra.mxu0 %v5031_v63  ;;  %v5053_v39 = vld [vmem:[%s6580_s11 + $0x68] sm:$0xff]   ;;  %v3020_v63 = vrot.slane %v6456_v33, %v5637_v9 }
 0x35d   : > { %3820 = vmatprep.subr.bf16.mxu0 %v5036_v0 }
 0x35f   : > { %3780 = vmatpush2.bf16.msra.mxu1 %v4986_v59  ;;  %v5056_v59 = vld [vmem:[%s6580_s11 + $0x20] sm:$0xff]  }
 0x360   : > { %3781 = vmatprep.subr.bf16.mxu1 %v4991_v60  ;;  %3821 = vmatpush2.bf16.msra.mxu0 %v5034_v4  ;;  %v5057_v60 = vld [vmem:[%s6580_s11 + $0x58] sm:$0xff]  }
 0x361   : > { %3822 = vmatprep.subr.bf16.mxu0 %v5039_v5 }
 0x363   : > { %3782 = vmatpush2.bf16.msra.mxu1 %v4989_v62  ;;  %v5060_v62 = vld [vmem:[%s6580_s11 + $0x10] sm:$0xff]  }
 0x364   : > { %3783 = vmatprep.subr.bf16.mxu1 %v4994_v30  ;;  %3823 = vmatpush2.bf16.msra.mxu0 %v5037_v8  ;;  %v3016_v30 = vrot.slane %v6456_v33, %v5262_v42 }
 0x365   : > { %3824 = vmatprep.subr.bf16.mxu0 %v5042_v12 }
 0x367   : > { %3784 = vmatpush2.bf16.msra.mxu1 %v4992_v2 }
 0x368   : > { %3785 = vmatprep.subr.bf16.mxu1 %v4997_v3  ;;  %3825 = vmatpush2.bf16.msra.mxu0 %v5040_v20  ;;  %v5061_v20 = vld [vmem:[%s6580_s11 + $0x48] sm:$0xff]  }
 0x369   : > { %3826 = vmatprep.subr.bf16.mxu0 %v5045_v1 }
 0x36b   : > { %3786 = vmatpush2.bf16.msra.mxu1 %v4995_v6 }
 0x36c   : > { %3787 = vmatprep.subr.bf16.mxu1 %v5000_v58  ;;  %3827 = vmatpush2.bf16.msra.mxu0 %v5043_v7 }
 0x36d   : > { %3828 = vmatprep.subr.bf16.mxu0 %v5048_v32 }
 0x36f   : > { %3788 = vmatpush2.bf16.msra.mxu1 %v4998_v13 }
 0x370   : > { %3829 = vmatpush2.bf16.msra.mxu0 %v5046_v47  ;;  %4497 = vmatprep.subr.bf16.mxu1 %v5049_v54 }
 0x372   : > { %v3141_v10 = vpop.f32.mrf.mxu1  ;;  %v3182_v19 = vpop.f32.mrf.mxu0 }
 0x373   : > { %v3142_v18 = vadd.f32 %v3141_v10, %v3101_v17 }
 0x374   : > { %v3143_v21 = vpop.f32.mrf.mxu1  ;;  %v3184_v34 = vpop.f32.mrf.mxu0 }
 0x375   : > { %v3183_v36 = vadd.f32 %v3182_v19, %v3142_v18  ;;  %v3144_v22 = vadd.f32 %v3143_v21, %v3103_v14  ;;  %v5062_v21 = vld [vmem:[%s6580_s11 + $0x8] sm:$0xff]  }
 0x376   : > { %v3145_v35 = vpop.f32.mrf.mxu1  ;;  %v3186_v24 = vpop.f32.mrf.mxu0 }
 0x377   : > { %v3185_v25 = vadd.f32 %v3184_v34, %v3144_v22  ;;  %v3353_v26 = vmax.f32 %v3183_v36, 0.0  ;;  %v5063_v22 = vld [vmem:[%s6580_s11 + $0x40] sm:$0xff]  }
 0x378   : > { %v3146_v27 = vpop.f32.mrf.mxu1  ;;  %v3187_v28 = vpop.f32.mrf.mxu0  ;;  %v5064_v35 = vld [vmem:[%s6580_s11] sm:$0xff]  }
 0x379   : > { %v3354_v31 = vmax.f32 %v3185_v25, 0.0  ;;  %v3357_v37 = vpack.c.bf16 %v3353_v26, %v3353_v26  ;;  %v3425_v24 = vld [vmem:[%s6579_s10] sm:$0x3] }
 0x37a   : > { %v3750_v1 = vrot.slane %v3425_v24, %v5259_v41  ;;  %v3754_v25 = vrot.slane %v3425_v24, %v5256_v40  ;;  %v3875_v40 = vld [vmem:[%s6581_s12] sm:$0x1] }
 0x37b   : > { %v3358_v46 = vpack.c.bf16 %v3354_v31, %v3354_v31 }
 0x37d   : > { %3789 = vmatprep.mubr.bf16.mxu1 %v3358_v46 }
 0x37e   : > { %3790 = vmatmul.mubr.bf16.vlgmr.msra.gmra.mxu1 %v3357_v37 }
 0x37f   : > { %4498 = vmatpush3.bf16.msra.mxu1 %v5050_v55 }
 0x380   : > { %4499 = vmatprep.subr.bf16.mxu1 %v5051_v56 }
 0x383   : > { %4500 = vmatpush3.bf16.msra.mxu1 %v5052_v57 }
 0x384   : > { %4501 = vmatprep.subr.bf16.mxu1 %v5053_v39 }
 0x387   : > { %4502 = vmatpush3.bf16.msra.mxu1 %v5054_v43 }
 0x388   : > { %4503 = vmatprep.subr.bf16.mxu1 %v5055_v23 }
 0x38b   : > { %4504 = vmatpush3.bf16.msra.mxu1 %v5056_v59 }
 0x38c   : > { %4505 = vmatprep.subr.bf16.mxu1 %v5057_v60 }
 0x38f   : > { %4506 = vmatpush3.bf16.msra.mxu1 %v5058_v61 }
 0x390   : > { %4507 = vmatprep.subr.bf16.mxu1 %v5059_v29 }
 0x393   : > { %4508 = vmatpush3.bf16.msra.mxu1 %v5060_v62 }
 0x394   : > { %4509 = vmatprep.subr.bf16.mxu1 %v5061_v20 }
 0x397   : > { %4510 = vmatpush3.bf16.msra.mxu1 %v5062_v21 }
 0x398   : > { %4511 = vmatprep.subr.bf16.mxu1 %v5063_v22 }
 0x39b   : > { %4512 = vmatpush3.bf16.msra.mxu1 %v5064_v35 }
 0x3b2   : > { %v3223_v44 = vpop.f32.mrf.mxu1 }
 0x3b3   : > { %v3264_v45 = vpop.f32.mrf.mxu0  ;;  %v3224_v0 = vadd.f32 %v3223_v44, %v3016_v30 }
 0x3b4   : > { %v3225_v48 = vpop.f32.mrf.mxu1 }
 0x3b5   : > { %v3266_v49 = vpop.f32.mrf.mxu0  ;;  %v3226_v2 = vadd.f32 %v3225_v48, %v3020_v63  ;;  %v3265_v3 = vadd.f32 %v3264_v45, %v3224_v0 }
 0x3b6   : > { %v3227_v50 = vpop.f32.mrf.mxu1 }
 0x3b7   : > { %v3268_v51 = vpop.f32.mrf.mxu0  ;;  %v3267_v5 = vadd.f32 %v3266_v49, %v3226_v2 }
 0x3b8   : > { %v3228_v52 = vpop.f32.mrf.mxu1 }
 0x3b9   : > { %v3269_v53 = vpop.f32.mrf.mxu0 }
 0x3f2   : > { %v3305_v4 = vpop.f32.mrf.mxu1 }
 0x3f3   : > { %v3306_v6 = vadd.f32 %v3305_v4, %v3265_v3  ;;  %v3346_v58 = vpop.f32.mrf.mxu0 }
 0x3f4   : > { %v3307_v8 = vpop.f32.mrf.mxu1 }
 0x3f5   : > { %v3347_v11 = vadd.f32 %v3346_v58, %v3306_v6  ;;  %v3308_v38 = vadd.f32 %v3307_v8, %v3267_v5  ;;  %v3348_v13 = vpop.f32.mrf.mxu0 }
 0x3f6   : > { %v3309_v15 = vpop.f32.mrf.mxu1 }
 0x3f7   : > { %v3349_v16 = vadd.f32 %v3348_v13, %v3308_v38  ;;  %v3350_v17 = vpop.f32.mrf.mxu0  ;;  %v3355_v10 = vmax.f32 %v3347_v11, 0.0 }
 0x3f8   : > { %v3310_v19 = vpop.f32.mrf.mxu1 }
 0x3f9   : > { %v3356_v42 = vmax.f32 %v3349_v16, 0.0  ;;  %v3351_v12 = vpop.f32.mrf.mxu0  ;;  %v3359_v9 = vpack.c.bf16 %v3355_v10, %v3355_v10 }
 0x3fb   : > { %v3360_v14 = vpack.c.bf16 %v3356_v42, %v3356_v42 }
 0x3fd   : > { %3830 = vmatprep.mubr.bf16.mxu0 %v3360_v14 }
 0x3fe   : > { %3831 = vmatmul.mubr.bf16.vlgmr.msra.gmra.mxu0 %v3359_v9 }
 0x43e   : > { %v3791_v33 = vpop.f32.mrf.mxu1 }
 0x43f   : > { %v3792_v7 = vadd.f32 %v3791_v33, %v3750_v1 }
 0x440   : > { %v3793_v18 = vpop.f32.mrf.mxu1 }
 0x441   : > { %v3794_v27 = vadd.f32 %v3793_v18, %v3754_v25 }
 0x442   : > { %v3795_v34 = vpop.f32.mrf.mxu1 }
 0x444   : > { %v3796_v36 = vpop.f32.mrf.mxu1 }
 0x4be   : > { %v3832_v26 = vpop.f32.mrf.mxu0 }
 0x4bf   : > { %v3833_v28 = vadd.f32 %v3832_v26, %v3792_v7 }
 0x4c0   : > { %v3834_v31 = vpop.f32.mrf.mxu0 }
 0x4c1   : > { %v3835_v32 = vadd.f32 %v3834_v31, %v3794_v27  ;;  %v3839_v46 = vmax.f32 %v3833_v28, 0.0 }
 0x4c2   : > { %v3836_v47 = vpop.f32.mrf.mxu0 }
 0x4c3   : > { %v3840_v37 = vmax.f32 %v3835_v32, 0.0  ;;  %v3841_v48 = vpack.c.bf16 %v3839_v46, %v3839_v46 }
 0x4c4   : > { %v3837_v44 = vpop.f32.mrf.mxu0 }
 0x4c5   : > { %v3842_v45 = vpack.c.bf16 %v3840_v37, %v3840_v37 }
 0x4c7   : > { %4004 = vmatprep.mubr.bf16.mxu1 %v3842_v45 }
 0x4c8   : > { %4005 = vmatmul.mubr.bf16.vlgmr.msra.gmra.mxu1 %v3841_v48 }
 0x588   : > { %v4513_v49 = vpop.f32.mrf.mxu1 }
 0x58a   : > { %v4514_v41 = vpop.f32.mrf.mxu1 }
 0x58b   : > { %v4515_v50 = vadd.f32 %v4514_v41, %v4513_v49 }
 0x58c   : > { %v4516_v51 = vpop.f32.mrf.mxu1 }
 0x58d   : > { %v4007_v52 = vadd.f32 %v4515_v50, %v3875_v40 }
 0x58e   : > { %v4517_v53 = vpop.f32.mrf.mxu1 }
 0x58f   : > { %4013 = vst.msk [vmem:[%s464_s21] sm:$0x1] %vm4012_vm2, %v4007_v52 }
 0x590 PF: > { %s23_s27 = sadd.s32 1, %s5087_s27   ;;  %s6583_s25 = smov %s5083_s26 }
 0x591   : > { %p20_p5 = scmp.ge.s32.totalorder %s23_s27, 4   ;;  %s6584_s26 = smov %s6586_s28 }
 0x593   :  { %22 = sbr.rel (!%p20_p5) target bundleno = 2 (0x2), region = 114 }

</bundles_post_ra>
